<compile_context>
chip_gen: v5e
topology: v5e:2x2
jax: 0.10.0
libtpu: 0.0.40
codegen_flags: <defaults>
</compile_context>

<pallas_src>
import functools

import jax
import jax.numpy as jnp
from jax.experimental import pallas as pl
from jax.experimental.pallas import tpu as pltpu


MXU_DTYPE = jnp.bfloat16   # matmul operand dtype; accumulation stays f32


# ----------------------------- fused Pallas kernel ---------------------------

def _fused_conv_kernel(*refs, norm, relu, residual, tanh):
    """One layer: (Co,K) @ (K,HW) matmul + InstanceNorm/ReLU/residual/tanh.

    Runs once per batch sample (grid=(N,)).  Output is (Co, HW): lane axis is
    the flattened spatial dim, so stores are unmasked/lane-dense.
    """
    if norm and residual:
        w_ref, g_ref, b_ref, p_ref, s_ref, o_ref = refs
    elif norm:
        w_ref, g_ref, b_ref, p_ref, o_ref = refs
    else:
        w_ref, p_ref, o_ref = refs

    # MXU matmul, f32 accumulation.
    acc = jnp.dot(w_ref[...], p_ref[0], preferred_element_type=jnp.float32)

    if norm:
        # InstanceNorm2d(affine=True), eps=1e-5, biased variance; the
        # reduction axis (H*W) is the lane-dense last dim.
        mean = jnp.mean(acc, axis=-1, keepdims=True)
        var = jnp.mean(jnp.square(acc - mean), axis=-1, keepdims=True)
        acc = (acc - mean) * jax.lax.rsqrt(var + 1e-5)
        acc = acc * g_ref[...] + b_ref[...]
    if relu:
        acc = jnp.maximum(acc, 0.0)
    if residual:
        acc = acc + s_ref[0]
    if tanh:
        acc = jnp.tanh(acc)
    o_ref[0] = acc.astype(o_ref.dtype)


def fused_conv_layer(patches, w_mat, gamma=None, beta=None, *, skip=None,
                     relu=False, tanh=False):
    """patches: (N, K, HW) bf16; w_mat: (Co, K) bf16; skip: (N, Co, HW) f32.

    Returns the layer output in the (N, Co, HW) activation layout (f32).
    """
    N, K, HW = patches.shape
    Co = w_mat.shape[0]
    norm = gamma is not None
    residual = skip is not None

    inputs = [w_mat]
    in_specs = [pl.BlockSpec((Co, K), lambda n: (0, 0))]
    if norm:
        inputs += [gamma.reshape(Co, 1).astype(jnp.float32),
                   beta.reshape(Co, 1).astype(jnp.float32)]
        in_specs += [pl.BlockSpec((Co, 1), lambda n: (0, 0)),
                     pl.BlockSpec((Co, 1), lambda n: (0, 0))]
    inputs.append(patches)
    in_specs.append(pl.BlockSpec((1, K, HW), lambda n: (n, 0, 0)))
    if residual:
        inputs.append(skip)
        in_specs.append(pl.BlockSpec((1, Co, HW), lambda n: (n, 0, 0)))

    return pl.pallas_call(
        functools.partial(_fused_conv_kernel, norm=norm, relu=relu,
                          residual=residual, tanh=tanh),
        out_shape=jax.ShapeDtypeStruct((N, Co, HW), jnp.float32),
        grid=(N,),
        in_specs=in_specs,
        out_specs=pl.BlockSpec((1, Co, HW), lambda n: (n, 0, 0)),
        compiler_params=pltpu.CompilerParams(
            dimension_semantics=("parallel",)),   # N=2 -> both v7x TCs
    )(*inputs)


# ---------------------------- conv lowering (XLA glue) -----------------------

def _im2col_nchw(x_pad, kh, kw, oh, ow):
    """(N, C, Hp, Wp) -> (N, kh*kw*C, oh*ow), patch order (dy, dx, ci); bf16."""
    N, C = x_pad.shape[:2]
    cols = [x_pad[:, :, dy:dy + oh, dx:dx + ow]
            for dy in range(kh) for dx in range(kw)]
    p = jnp.concatenate(cols, axis=1)            # (N, kh*kw*C, oh, ow)
    return p.reshape(N, kh * kw * C, oh * ow).astype(MXU_DTYPE)


def _conv_w_mat(w_oihw):
    """PyTorch OIHW conv weight -> (Co, kh*kw*Ci) matching the patch order."""
    Co, Ci, kh, kw = w_oihw.shape
    return jnp.transpose(w_oihw, (0, 2, 3, 1)).reshape(
        Co, kh * kw * Ci).astype(MXU_DTYPE)


def _convT_w_mat(w_iohw):
    """PyTorch IOHW ConvTranspose weight -> equivalent forward-conv matrix."""
    # Flip spatially, swap in/out channels -> OIHW, then same layout as above.
    w_eq = jnp.transpose(jnp.flip(w_iohw, axis=(2, 3)), (1, 0, 2, 3))
    return _conv_w_mat(w_eq)


# ------------------------------ Generator model ------------------------------

def init_params(key, conv_dim, repeat_num, num_channel, up_time):
    params = {"res": [], "ups": []}
    k = key

    def nk():
        nonlocal k
        k, sub = jax.random.split(k)
        return sub

    curr = conv_dim
    for _ in range(repeat_num):
        params["res"].append(dict(
            w1=0.1 * jax.random.normal(nk(), (curr, curr, 3, 3), jnp.float32),
            g1=jnp.ones((curr,), jnp.float32),
            b1=jnp.zeros((curr,), jnp.float32),
            w2=0.1 * jax.random.normal(nk(), (curr, curr, 3, 3), jnp.float32),
            g2=jnp.ones((curr,), jnp.float32),
            b2=jnp.zeros((curr,), jnp.float32),
        ))
    for _ in range(up_time):
        nxt = curr // 2
        params["ups"].append(dict(
            w=0.1 * jax.random.normal(nk(), (curr, nxt, 3, 3), jnp.float32),
            g=jnp.ones((nxt,), jnp.float32),
            b=jnp.zeros((nxt,), jnp.float32),
        ))
        curr = nxt
    params["img_w"] = 0.1 * jax.random.normal(
        nk(), (num_channel, curr, 7, 7), jnp.float32)
    return params


def generator_forward(x_nchw, params):
    x = x_nchw.astype(jnp.float32)
    N, C, H, W = x.shape
    feat = x.reshape(N, C, H * W)                 # lane-dense activation layout

    # self.main: repeat_num ResidualBlocks (conv3x3 -> IN -> ReLU -> conv3x3 -> IN, +x)
    for rb in params["res"]:
        xp = jnp.pad(feat.reshape(N, C, H, W),
                     ((0, 0), (0, 0), (1, 1), (1, 1)))
        p = _im2col_nchw(xp, 3, 3, H, W)
        h = fused_conv_layer(p, _conv_w_mat(rb["w1"]), rb["g1"], rb["b1"],
                             relu=True)
        hp = jnp.pad(h.reshape(N, C, H, W),
                     ((0, 0), (0, 0), (1, 1), (1, 1)))
        p = _im2col_nchw(hp, 3, 3, H, W)
        feat = fused_conv_layer(p, _conv_w_mat(rb["w2"]), rb["g2"], rb["b2"],
                                skip=feat)        # x + main(x)

    # ... then up_time x (ConvTranspose2d k3 s2 p1 op1 -> InstanceNorm -> ReLU)
    for up in params["ups"]:
        Co, Ho, Wo = C // 2, 2 * H, 2 * W
        # Input dilation (interior=1) + asymmetric pad (1 before, 2 after) in a
        # single lax.pad; then the transposed conv is a plain 3x3 correlation.
        xd = jax.lax.pad(feat.reshape(N, C, H, W), jnp.array(0.0, jnp.float32),
                         [(0, 0, 0), (0, 0, 0), (1, 2, 1), (1, 2, 1)])
        p = _im2col_nchw(xd, 3, 3, Ho, Wo)
        feat = fused_conv_layer(p, _convT_w_mat(up["w"]), up["g"], up["b"],
                                relu=True)
        C, H, W = Co, Ho, Wo

    # self.img_reg: Conv2d(k=7, p=3, bias=False) -> Tanh (fused in the kernel)
    xp = jnp.pad(feat.reshape(N, C, H, W), ((0, 0), (0, 0), (3, 3), (3, 3)))
    p = _im2col_nchw(xp, 7, 7, H, W)
    out = fused_conv_layer(p, _conv_w_mat(params["img_w"]), tanh=True)
    return out.reshape(N, -1, H, W)               # NCHW, no transpose needed


if __name__ == "__main__":
    conv_dim, repeat_num, num_channel, up_time = 16, 2, 6, 3
    batch, spatial = 2, 8

    key = jax.random.PRNGKey(0)
    kx, kp = jax.random.split(key)
    x = jax.random.normal(kx, (batch, conv_dim, spatial, spatial), jnp.float32)
    params = init_params(kp, conv_dim, repeat_num, num_channel, up_time)

    fwd = jax.jit(generator_forward)
    y = fwd(x, params)
    jax.block_until_ready(y)

    expected = (batch, num_channel, spatial * 2 ** up_time, spatial * 2 ** up_time)
    assert y.shape == expected, (y.shape, expected)
    assert bool(jnp.all(jnp.isfinite(y)))
    assert bool(jnp.all(jnp.abs(y) <= 1.0))  # tanh range
    print("KERNEL_OK")
</pallas_src>

<mosaic_0001>
module attributes {stable_mosaic.version = 11 : i64} {
  func.func @_fused_conv_kernel(%arg0: i32, %arg1: memref<16x144xbf16, #tpu.memory_space<vmem>>, %arg2: memref<16x1xf32, #tpu.memory_space<vmem>>, %arg3: memref<16x1xf32, #tpu.memory_space<vmem>>, %arg4: memref<1x144x64xbf16, #tpu.memory_space<vmem>>, %arg5: memref<1x16x64xf32, #tpu.memory_space<vmem>>) attributes {dimension_semantics = [#tpu.dimension_semantics<parallel>], iteration_bounds = array<i64: 2>, scalar_prefetch = 0 : i64, scratch_operands = 0 : i64, tpu.core_type = #tpu.core_type<tc>, window_params = [{pipeline_mode = #tpu.pipeline_mode<synchronous>, transform_indices = @transform_0, window_bounds = array<i64: 16, 144>}, {pipeline_mode = #tpu.pipeline_mode<synchronous>, transform_indices = @transform_1, window_bounds = array<i64: 16, 1>}, {pipeline_mode = #tpu.pipeline_mode<synchronous>, transform_indices = @transform_2, window_bounds = array<i64: 16, 1>}, {transform_indices = @transform_3, window_bounds = array<i64: 1, 144, 64>}, {transform_indices = @transform_4, window_bounds = array<i64: 1, 16, 64>}]} {
    %c0 = arith.constant 0 : index
    %c0_0 = arith.constant 0 : index
    %0 = vector.load %arg1[%c0, %c0_0] : memref<16x144xbf16, #tpu.memory_space<vmem>>, vector<16x144xbf16>
    %c0_1 = arith.constant 0 : index
    %c0_2 = arith.constant 0 : index
    %c0_3 = arith.constant 0 : index
    %1 = vector.load %arg4[%c0_1, %c0_2, %c0_3] : memref<1x144x64xbf16, #tpu.memory_space<vmem>>, vector<1x144x64xbf16>
    %2 = vector.shape_cast %1 : vector<1x144x64xbf16> to vector<144x64xbf16>
    %cst = arith.constant dense<0.000000e+00> : vector<16x64xf32>
    %3 = tpu.matmul %0, %2, %cst {dimension_numbers = #tpu.dot_dimension_numbers<[1], [0], [0], [1], [0, 0, 1, 1], [], []>} : vector<16x144xbf16>, vector<144x64xbf16>, vector<16x64xf32> -> vector<16x64xf32>
    %cst_4 = arith.constant dense<0.000000e+00> : vector<16xf32>
    %4 = vector.multi_reduction <add>, %3, %cst_4 [1] : vector<16x64xf32> to vector<16xf32>
    %5 = vector.shape_cast %4 : vector<16xf32> to vector<16x1xf32>
    %cst_5 = arith.constant 6.400000e+01 : f32
    %6 = vector.broadcast %cst_5 : f32 to vector<16x1xf32>
    %7 = arith.divf %5, %6 : vector<16x1xf32>
    %8 = vector.broadcast %7 : vector<16x1xf32> to vector<16x64xf32>
    %9 = arith.subf %3, %8 : vector<16x64xf32>
    %10 = arith.mulf %9, %9 : vector<16x64xf32>
    %cst_6 = arith.constant dense<0.000000e+00> : vector<16xf32>
    %11 = vector.multi_reduction <add>, %10, %cst_6 [1] : vector<16x64xf32> to vector<16xf32>
    %12 = vector.shape_cast %11 : vector<16xf32> to vector<16x1xf32>
    %cst_7 = arith.constant 6.400000e+01 : f32
    %13 = vector.broadcast %cst_7 : f32 to vector<16x1xf32>
    %14 = arith.divf %12, %13 : vector<16x1xf32>
    %15 = vector.broadcast %7 : vector<16x1xf32> to vector<16x64xf32>
    %16 = arith.subf %3, %15 : vector<16x64xf32>
    %cst_8 = arith.constant 9.99999974E-6 : f32
    %17 = vector.broadcast %cst_8 : f32 to vector<16x1xf32>
    %18 = arith.addf %14, %17 : vector<16x1xf32>
    %19 = math.rsqrt %18 : vector<16x1xf32>
    %20 = vector.broadcast %19 : vector<16x1xf32> to vector<16x64xf32>
    %21 = arith.mulf %16, %20 : vector<16x64xf32>
    %c0_9 = arith.constant 0 : index
    %c0_10 = arith.constant 0 : index
    %22 = vector.load %arg2[%c0_9, %c0_10] : memref<16x1xf32, #tpu.memory_space<vmem>>, vector<16x1xf32>
    %23 = vector.broadcast %22 : vector<16x1xf32> to vector<16x64xf32>
    %24 = arith.mulf %21, %23 : vector<16x64xf32>
    %c0_11 = arith.constant 0 : index
    %c0_12 = arith.constant 0 : index
    %25 = vector.load %arg3[%c0_11, %c0_12] : memref<16x1xf32, #tpu.memory_space<vmem>>, vector<16x1xf32>
    %26 = vector.broadcast %25 : vector<16x1xf32> to vector<16x64xf32>
    %27 = arith.addf %24, %26 : vector<16x64xf32>
    %cst_13 = arith.constant 0.000000e+00 : f32
    %28 = vector.broadcast %cst_13 : f32 to vector<16x64xf32>
    %29 = arith.maximumf %27, %28 : vector<16x64xf32>
    %c0_14 = arith.constant 0 : index
    %c0_15 = arith.constant 0 : index
    %c0_16 = arith.constant 0 : index
    %30 = vector.load %arg5[%c0_14, %c0_15, %c0_16] : memref<1x16x64xf32, #tpu.memory_space<vmem>>, vector<1x16x64xf32>
    %31 = vector.shape_cast %30 : vector<1x16x64xf32> to vector<16x64xf32>
    %32 = vector.shape_cast %29 : vector<16x64xf32> to vector<1x16x64xf32>
    tpu.vector_store %arg5[%c0_14, %c0_15, %c0_16], %32 {strides = array<i32>} : memref<1x16x64xf32, #tpu.memory_space<vmem>>, vector<1x16x64xf32>,
    return
  }
  func.func @transform_0(%arg0: i32) -> (i32, i32) {
    %c0_i32 = arith.constant 0 : i32
    %c0_i32_0 = arith.constant 0 : i32
    %c0_i32_1 = arith.constant 0 : i32
    return %c0_i32, %c0_i32_0 : i32, i32
  }
  func.func @transform_1(%arg0: i32) -> (i32, i32) {
    %c0_i32 = arith.constant 0 : i32
    %c0_i32_0 = arith.constant 0 : i32
    %c0_i32_1 = arith.constant 0 : i32
    return %c0_i32, %c0_i32_0 : i32, i32
  }
  func.func @transform_2(%arg0: i32) -> (i32, i32) {
    %c0_i32 = arith.constant 0 : i32
    %c0_i32_0 = arith.constant 0 : i32
    %c0_i32_1 = arith.constant 0 : i32
    return %c0_i32, %c0_i32_0 : i32, i32
  }
  func.func @transform_3(%arg0: i32) -> (i32, i32, i32) {
    %c0_i32 = arith.constant 0 : i32
    %c0_i32_0 = arith.constant 0 : i32
    %c0_i32_1 = arith.constant 0 : i32
    return %arg0, %c0_i32, %c0_i32_0 : i32, i32, i32
  }
  func.func @transform_4(%arg0: i32) -> (i32, i32, i32) {
    %c0_i32 = arith.constant 0 : i32
    %c0_i32_0 = arith.constant 0 : i32
    %c0_i32_1 = arith.constant 0 : i32
    return %arg0, %c0_i32, %c0_i32_0 : i32, i32, i32
  }
}

module attributes {stable_mosaic.version = 11 : i64} {
  func.func @_fused_conv_kernel(%arg0: i32, %arg1: memref<16x144xbf16, #tpu.memory_space<vmem>>, %arg2: memref<16x1xf32, #tpu.memory_space<vmem>>, %arg3: memref<16x1xf32, #tpu.memory_space<vmem>>, %arg4: memref<1x144x64xbf16, #tpu.memory_space<vmem>>, %arg5: memref<1x16x64xf32, #tpu.memory_space<vmem>>, %arg6: memref<1x16x64xf32, #tpu.memory_space<vmem>>) attributes {dimension_semantics = [#tpu.dimension_semantics<parallel>], iteration_bounds = array<i64: 2>, scalar_prefetch = 0 : i64, scratch_operands = 0 : i64, tpu.core_type = #tpu.core_type<tc>, window_params = [{pipeline_mode = #tpu.pipeline_mode<synchronous>, transform_indices = @transform_0, window_bounds = array<i64: 16, 144>}, {pipeline_mode = #tpu.pipeline_mode<synchronous>, transform_indices = @transform_1, window_bounds = array<i64: 16, 1>}, {pipeline_mode = #tpu.pipeline_mode<synchronous>, transform_indices = @transform_2, window_bounds = array<i64: 16, 1>}, {transform_indices = @transform_3, window_bounds = array<i64: 1, 144, 64>}, {transform_indices = @transform_4, window_bounds = array<i64: 1, 16, 64>}, {transform_indices = @transform_5, window_bounds = array<i64: 1, 16, 64>}]} {
    %c0 = arith.constant 0 : index
    %c0_0 = arith.constant 0 : index
    %0 = vector.load %arg1[%c0, %c0_0] : memref<16x144xbf16, #tpu.memory_space<vmem>>, vector<16x144xbf16>
    %c0_1 = arith.constant 0 : index
    %c0_2 = arith.constant 0 : index
    %c0_3 = arith.constant 0 : index
    %1 = vector.load %arg4[%c0_1, %c0_2, %c0_3] : memref<1x144x64xbf16, #tpu.memory_space<vmem>>, vector<1x144x64xbf16>
    %2 = vector.shape_cast %1 : vector<1x144x64xbf16> to vector<144x64xbf16>
    %cst = arith.constant dense<0.000000e+00> : vector<16x64xf32>
    %3 = tpu.matmul %0, %2, %cst {dimension_numbers = #tpu.dot_dimension_numbers<[1], [0], [0], [1], [0, 0, 1, 1], [], []>} : vector<16x144xbf16>, vector<144x64xbf16>, vector<16x64xf32> -> vector<16x64xf32>
    %cst_4 = arith.constant dense<0.000000e+00> : vector<16xf32>
    %4 = vector.multi_reduction <add>, %3, %cst_4 [1] : vector<16x64xf32> to vector<16xf32>
    %5 = vector.shape_cast %4 : vector<16xf32> to vector<16x1xf32>
    %cst_5 = arith.constant 6.400000e+01 : f32
    %6 = vector.broadcast %cst_5 : f32 to vector<16x1xf32>
    %7 = arith.divf %5, %6 : vector<16x1xf32>
    %8 = vector.broadcast %7 : vector<16x1xf32> to vector<16x64xf32>
    %9 = arith.subf %3, %8 : vector<16x64xf32>
    %10 = arith.mulf %9, %9 : vector<16x64xf32>
    %cst_6 = arith.constant dense<0.000000e+00> : vector<16xf32>
    %11 = vector.multi_reduction <add>, %10, %cst_6 [1] : vector<16x64xf32> to vector<16xf32>
    %12 = vector.shape_cast %11 : vector<16xf32> to vector<16x1xf32>
    %cst_7 = arith.constant 6.400000e+01 : f32
    %13 = vector.broadcast %cst_7 : f32 to vector<16x1xf32>
    %14 = arith.divf %12, %13 : vector<16x1xf32>
    %15 = vector.broadcast %7 : vector<16x1xf32> to vector<16x64xf32>
    %16 = arith.subf %3, %15 : vector<16x64xf32>
    %cst_8 = arith.constant 9.99999974E-6 : f32
    %17 = vector.broadcast %cst_8 : f32 to vector<16x1xf32>
    %18 = arith.addf %14, %17 : vector<16x1xf32>
    %19 = math.rsqrt %18 : vector<16x1xf32>
    %20 = vector.broadcast %19 : vector<16x1xf32> to vector<16x64xf32>
    %21 = arith.mulf %16, %20 : vector<16x64xf32>
    %c0_9 = arith.constant 0 : index
    %c0_10 = arith.constant 0 : index
    %22 = vector.load %arg2[%c0_9, %c0_10] : memref<16x1xf32, #tpu.memory_space<vmem>>, vector<16x1xf32>
    %23 = vector.broadcast %22 : vector<16x1xf32> to vector<16x64xf32>
    %24 = arith.mulf %21, %23 : vector<16x64xf32>
    %c0_11 = arith.constant 0 : index
    %c0_12 = arith.constant 0 : index
    %25 = vector.load %arg3[%c0_11, %c0_12] : memref<16x1xf32, #tpu.memory_space<vmem>>, vector<16x1xf32>
    %26 = vector.broadcast %25 : vector<16x1xf32> to vector<16x64xf32>
    %27 = arith.addf %24, %26 : vector<16x64xf32>
    %c0_13 = arith.constant 0 : index
    %c0_14 = arith.constant 0 : index
    %c0_15 = arith.constant 0 : index
    %28 = vector.load %arg5[%c0_13, %c0_14, %c0_15] : memref<1x16x64xf32, #tpu.memory_space<vmem>>, vector<1x16x64xf32>
    %29 = vector.shape_cast %28 : vector<1x16x64xf32> to vector<16x64xf32>
    %30 = arith.addf %27, %29 : vector<16x64xf32>
    %c0_16 = arith.constant 0 : index
    %c0_17 = arith.constant 0 : index
    %c0_18 = arith.constant 0 : index
    %31 = vector.load %arg6[%c0_16, %c0_17, %c0_18] : memref<1x16x64xf32, #tpu.memory_space<vmem>>, vector<1x16x64xf32>
    %32 = vector.shape_cast %31 : vector<1x16x64xf32> to vector<16x64xf32>
    %33 = vector.shape_cast %30 : vector<16x64xf32> to vector<1x16x64xf32>
    tpu.vector_store %arg6[%c0_16, %c0_17, %c0_18], %33 {strides = array<i32>} : memref<1x16x64xf32, #tpu.memory_space<vmem>>, vector<1x16x64xf32>,
    return
  }
  func.func @transform_0(%arg0: i32) -> (i32, i32) {
    %c0_i32 = arith.constant 0 : i32
    %c0_i32_0 = arith.constant 0 : i32
    %c0_i32_1 = arith.constant 0 : i32
    return %c0_i32, %c0_i32_0 : i32, i32
  }
  func.func @transform_1(%arg0: i32) -> (i32, i32) {
    %c0_i32 = arith.constant 0 : i32
    %c0_i32_0 = arith.constant 0 : i32
    %c0_i32_1 = arith.constant 0 : i32
    return %c0_i32, %c0_i32_0 : i32, i32
  }
  func.func @transform_2(%arg0: i32) -> (i32, i32) {
    %c0_i32 = arith.constant 0 : i32
    %c0_i32_0 = arith.constant 0 : i32
    %c0_i32_1 = arith.constant 0 : i32
    return %c0_i32, %c0_i32_0 : i32, i32
  }
  func.func @transform_3(%arg0: i32) -> (i32, i32, i32) {
    %c0_i32 = arith.constant 0 : i32
    %c0_i32_0 = arith.constant 0 : i32
    %c0_i32_1 = arith.constant 0 : i32
    return %arg0, %c0_i32, %c0_i32_0 : i32, i32, i32
  }
  func.func @transform_4(%arg0: i32) -> (i32, i32, i32) {
    %c0_i32 = arith.constant 0 : i32
    %c0_i32_0 = arith.constant 0 : i32
    %c0_i32_1 = arith.constant 0 : i32
    return %arg0, %c0_i32, %c0_i32_0 : i32, i32, i32
  }
  func.func @transform_5(%arg0: i32) -> (i32, i32, i32) {
    %c0_i32 = arith.constant 0 : i32
    %c0_i32_0 = arith.constant 0 : i32
    %c0_i32_1 = arith.constant 0 : i32
    return %arg0, %c0_i32, %c0_i32_0 : i32, i32, i32
  }
}

module attributes {stable_mosaic.version = 11 : i64} {
  func.func @_fused_conv_kernel(%arg0: i32, %arg1: memref<8x144xbf16, #tpu.memory_space<vmem>>, %arg2: memref<8x1xf32, #tpu.memory_space<vmem>>, %arg3: memref<8x1xf32, #tpu.memory_space<vmem>>, %arg4: memref<1x144x256xbf16, #tpu.memory_space<vmem>>, %arg5: memref<1x8x256xf32, #tpu.memory_space<vmem>>) attributes {dimension_semantics = [#tpu.dimension_semantics<parallel>], iteration_bounds = array<i64: 2>, scalar_prefetch = 0 : i64, scratch_operands = 0 : i64, tpu.core_type = #tpu.core_type<tc>, window_params = [{pipeline_mode = #tpu.pipeline_mode<synchronous>, transform_indices = @transform_0, window_bounds = array<i64: 8, 144>}, {pipeline_mode = #tpu.pipeline_mode<synchronous>, transform_indices = @transform_1, window_bounds = array<i64: 8, 1>}, {pipeline_mode = #tpu.pipeline_mode<synchronous>, transform_indices = @transform_2, window_bounds = array<i64: 8, 1>}, {transform_indices = @transform_3, window_bounds = array<i64: 1, 144, 256>}, {transform_indices = @transform_4, window_bounds = array<i64: 1, 8, 256>}]} {
    %c0 = arith.constant 0 : index
    %c0_0 = arith.constant 0 : index
    %0 = vector.load %arg1[%c0, %c0_0] : memref<8x144xbf16, #tpu.memory_space<vmem>>, vector<8x144xbf16>
    %c0_1 = arith.constant 0 : index
    %c0_2 = arith.constant 0 : index
    %c0_3 = arith.constant 0 : index
    %1 = vector.load %arg4[%c0_1, %c0_2, %c0_3] : memref<1x144x256xbf16, #tpu.memory_space<vmem>>, vector<1x144x256xbf16>
    %2 = vector.shape_cast %1 : vector<1x144x256xbf16> to vector<144x256xbf16>
    %cst = arith.constant dense<0.000000e+00> : vector<8x256xf32>
    %3 = tpu.matmul %0, %2, %cst {dimension_numbers = #tpu.dot_dimension_numbers<[1], [0], [0], [1], [0, 0, 1, 1], [], []>} : vector<8x144xbf16>, vector<144x256xbf16>, vector<8x256xf32> -> vector<8x256xf32>
    %cst_4 = arith.constant dense<0.000000e+00> : vector<8xf32>
    %4 = vector.multi_reduction <add>, %3, %cst_4 [1] : vector<8x256xf32> to vector<8xf32>
    %5 = vector.shape_cast %4 : vector<8xf32> to vector<8x1xf32>
    %cst_5 = arith.constant 2.560000e+02 : f32
    %6 = vector.broadcast %cst_5 : f32 to vector<8x1xf32>
    %7 = arith.divf %5, %6 : vector<8x1xf32>
    %8 = vector.broadcast %7 : vector<8x1xf32> to vector<8x256xf32>
    %9 = arith.subf %3, %8 : vector<8x256xf32>
    %10 = arith.mulf %9, %9 : vector<8x256xf32>
    %cst_6 = arith.constant dense<0.000000e+00> : vector<8xf32>
    %11 = vector.multi_reduction <add>, %10, %cst_6 [1] : vector<8x256xf32> to vector<8xf32>
    %12 = vector.shape_cast %11 : vector<8xf32> to vector<8x1xf32>
    %cst_7 = arith.constant 2.560000e+02 : f32
    %13 = vector.broadcast %cst_7 : f32 to vector<8x1xf32>
    %14 = arith.divf %12, %13 : vector<8x1xf32>
    %15 = vector.broadcast %7 : vector<8x1xf32> to vector<8x256xf32>
    %16 = arith.subf %3, %15 : vector<8x256xf32>
    %cst_8 = arith.constant 9.99999974E-6 : f32
    %17 = vector.broadcast %cst_8 : f32 to vector<8x1xf32>
    %18 = arith.addf %14, %17 : vector<8x1xf32>
    %19 = math.rsqrt %18 : vector<8x1xf32>
    %20 = vector.broadcast %19 : vector<8x1xf32> to vector<8x256xf32>
    %21 = arith.mulf %16, %20 : vector<8x256xf32>
    %c0_9 = arith.constant 0 : index
    %c0_10 = arith.constant 0 : index
    %22 = vector.load %arg2[%c0_9, %c0_10] : memref<8x1xf32, #tpu.memory_space<vmem>>, vector<8x1xf32>
    %23 = vector.broadcast %22 : vector<8x1xf32> to vector<8x256xf32>
    %24 = arith.mulf %21, %23 : vector<8x256xf32>
    %c0_11 = arith.constant 0 : index
    %c0_12 = arith.constant 0 : index
    %25 = vector.load %arg3[%c0_11, %c0_12] : memref<8x1xf32, #tpu.memory_space<vmem>>, vector<8x1xf32>
    %26 = vector.broadcast %25 : vector<8x1xf32> to vector<8x256xf32>
    %27 = arith.addf %24, %26 : vector<8x256xf32>
    %cst_13 = arith.constant 0.000000e+00 : f32
    %28 = vector.broadcast %cst_13 : f32 to vector<8x256xf32>
    %29 = arith.maximumf %27, %28 : vector<8x256xf32>
    %c0_14 = arith.constant 0 : index
    %c0_15 = arith.constant 0 : index
    %c0_16 = arith.constant 0 : index
    %30 = vector.load %arg5[%c0_14, %c0_15, %c0_16] : memref<1x8x256xf32, #tpu.memory_space<vmem>>, vector<1x8x256xf32>
    %31 = vector.shape_cast %30 : vector<1x8x256xf32> to vector<8x256xf32>
    %32 = vector.shape_cast %29 : vector<8x256xf32> to vector<1x8x256xf32>
    tpu.vector_store %arg5[%c0_14, %c0_15, %c0_16], %32 {strides = array<i32>} : memref<1x8x256xf32, #tpu.memory_space<vmem>>, vector<1x8x256xf32>,
    return
  }
  func.func @transform_0(%arg0: i32) -> (i32, i32) {
    %c0_i32 = arith.constant 0 : i32
    %c0_i32_0 = arith.constant 0 : i32
    %c0_i32_1 = arith.constant 0 : i32
    return %c0_i32, %c0_i32_0 : i32, i32
  }
  func.func @transform_1(%arg0: i32) -> (i32, i32) {
    %c0_i32 = arith.constant 0 : i32
    %c0_i32_0 = arith.constant 0 : i32
    %c0_i32_1 = arith.constant 0 : i32
    return %c0_i32, %c0_i32_0 : i32, i32
  }
  func.func @transform_2(%arg0: i32) -> (i32, i32) {
    %c0_i32 = arith.constant 0 : i32
    %c0_i32_0 = arith.constant 0 : i32
    %c0_i32_1 = arith.constant 0 : i32
    return %c0_i32, %c0_i32_0 : i32, i32
  }
  func.func @transform_3(%arg0: i32) -> (i32, i32, i32) {
    %c0_i32 = arith.constant 0 : i32
    %c0_i32_0 = arith.constant 0 : i32
    %c0_i32_1 = arith.constant 0 : i32
    return %arg0, %c0_i32, %c0_i32_0 : i32, i32, i32
  }
  func.func @transform_4(%arg0: i32) -> (i32, i32, i32) {
    %c0_i32 = arith.constant 0 : i32
    %c0_i32_0 = arith.constant 0 : i32
    %c0_i32_1 = arith.constant 0 : i32
    return %arg0, %c0_i32, %c0_i32_0 : i32, i32, i32
  }
}

module attributes {stable_mosaic.version = 11 : i64} {
  func.func @_fused_conv_kernel(%arg0: i32, %arg1: memref<4x72xbf16, #tpu.memory_space<vmem>>, %arg2: memref<4x1xf32, #tpu.memory_space<vmem>>, %arg3: memref<4x1xf32, #tpu.memory_space<vmem>>, %arg4: memref<1x72x1024xbf16, #tpu.memory_space<vmem>>, %arg5: memref<1x4x1024xf32, #tpu.memory_space<vmem>>) attributes {dimension_semantics = [#tpu.dimension_semantics<parallel>], iteration_bounds = array<i64: 2>, scalar_prefetch = 0 : i64, scratch_operands = 0 : i64, tpu.core_type = #tpu.core_type<tc>, window_params = [{pipeline_mode = #tpu.pipeline_mode<synchronous>, transform_indices = @transform_0, window_bounds = array<i64: 4, 72>}, {pipeline_mode = #tpu.pipeline_mode<synchronous>, transform_indices = @transform_1, window_bounds = array<i64: 4, 1>}, {pipeline_mode = #tpu.pipeline_mode<synchronous>, transform_indices = @transform_2, window_bounds = array<i64: 4, 1>}, {transform_indices = @transform_3, window_bounds = array<i64: 1, 72, 1024>}, {transform_indices = @transform_4, window_bounds = array<i64: 1, 4, 1024>}]} {
    %c0 = arith.constant 0 : index
    %c0_0 = arith.constant 0 : index
    %0 = vector.load %arg1[%c0, %c0_0] : memref<4x72xbf16, #tpu.memory_space<vmem>>, vector<4x72xbf16>
    %c0_1 = arith.constant 0 : index
    %c0_2 = arith.constant 0 : index
    %c0_3 = arith.constant 0 : index
    %1 = vector.load %arg4[%c0_1, %c0_2, %c0_3] : memref<1x72x1024xbf16, #tpu.memory_space<vmem>>, vector<1x72x1024xbf16>
    %2 = vector.shape_cast %1 : vector<1x72x1024xbf16> to vector<72x1024xbf16>
    %cst = arith.constant dense<0.000000e+00> : vector<4x1024xf32>
    %3 = tpu.matmul %0, %2, %cst {dimension_numbers = #tpu.dot_dimension_numbers<[1], [0], [0], [1], [0, 0, 1, 1], [], []>} : vector<4x72xbf16>, vector<72x1024xbf16>, vector<4x1024xf32> -> vector<4x1024xf32>
    %cst_4 = arith.constant dense<0.000000e+00> : vector<4xf32>
    %4 = vector.multi_reduction <add>, %3, %cst_4 [1] : vector<4x1024xf32> to vector<4xf32>
    %5 = vector.shape_cast %4 : vector<4xf32> to vector<4x1xf32>
    %cst_5 = arith.constant 1.024000e+03 : f32
    %6 = vector.broadcast %cst_5 : f32 to vector<4x1xf32>
    %7 = arith.divf %5, %6 : vector<4x1xf32>
    %8 = vector.broadcast %7 : vector<4x1xf32> to vector<4x1024xf32>
    %9 = arith.subf %3, %8 : vector<4x1024xf32>
    %10 = arith.mulf %9, %9 : vector<4x1024xf32>
    %cst_6 = arith.constant dense<0.000000e+00> : vector<4xf32>
    %11 = vector.multi_reduction <add>, %10, %cst_6 [1] : vector<4x1024xf32> to vector<4xf32>
    %12 = vector.shape_cast %11 : vector<4xf32> to vector<4x1xf32>
    %cst_7 = arith.constant 1.024000e+03 : f32
    %13 = vector.broadcast %cst_7 : f32 to vector<4x1xf32>
    %14 = arith.divf %12, %13 : vector<4x1xf32>
    %15 = vector.broadcast %7 : vector<4x1xf32> to vector<4x1024xf32>
    %16 = arith.subf %3, %15 : vector<4x1024xf32>
    %cst_8 = arith.constant 9.99999974E-6 : f32
    %17 = vector.broadcast %cst_8 : f32 to vector<4x1xf32>
    %18 = arith.addf %14, %17 : vector<4x1xf32>
    %19 = math.rsqrt %18 : vector<4x1xf32>
    %20 = vector.broadcast %19 : vector<4x1xf32> to vector<4x1024xf32>
    %21 = arith.mulf %16, %20 : vector<4x1024xf32>
    %c0_9 = arith.constant 0 : index
    %c0_10 = arith.constant 0 : index
    %22 = vector.load %arg2[%c0_9, %c0_10] : memref<4x1xf32, #tpu.memory_space<vmem>>, vector<4x1xf32>
    %23 = vector.broadcast %22 : vector<4x1xf32> to vector<4x1024xf32>
    %24 = arith.mulf %21, %23 : vector<4x1024xf32>
    %c0_11 = arith.constant 0 : index
    %c0_12 = arith.constant 0 : index
    %25 = vector.load %arg3[%c0_11, %c0_12] : memref<4x1xf32, #tpu.memory_space<vmem>>, vector<4x1xf32>
    %26 = vector.broadcast %25 : vector<4x1xf32> to vector<4x1024xf32>
    %27 = arith.addf %24, %26 : vector<4x1024xf32>
    %cst_13 = arith.constant 0.000000e+00 : f32
    %28 = vector.broadcast %cst_13 : f32 to vector<4x1024xf32>
    %29 = arith.maximumf %27, %28 : vector<4x1024xf32>
    %c0_14 = arith.constant 0 : index
    %c0_15 = arith.constant 0 : index
    %c0_16 = arith.constant 0 : index
    %30 = vector.load %arg5[%c0_14, %c0_15, %c0_16] : memref<1x4x1024xf32, #tpu.memory_space<vmem>>, vector<1x4x1024xf32>
    %31 = vector.shape_cast %30 : vector<1x4x1024xf32> to vector<4x1024xf32>
    %32 = vector.shape_cast %29 : vector<4x1024xf32> to vector<1x4x1024xf32>
    tpu.vector_store %arg5[%c0_14, %c0_15, %c0_16], %32 {strides = array<i32>} : memref<1x4x1024xf32, #tpu.memory_space<vmem>>, vector<1x4x1024xf32>,
    return
  }
  func.func @transform_0(%arg0: i32) -> (i32, i32) {
    %c0_i32 = arith.constant 0 : i32
    %c0_i32_0 = arith.constant 0 : i32
    %c0_i32_1 = arith.constant 0 : i32
    return %c0_i32, %c0_i32_0 : i32, i32
  }
  func.func @transform_1(%arg0: i32) -> (i32, i32) {
    %c0_i32 = arith.constant 0 : i32
    %c0_i32_0 = arith.constant 0 : i32
    %c0_i32_1 = arith.constant 0 : i32
    return %c0_i32, %c0_i32_0 : i32, i32
  }
  func.func @transform_2(%arg0: i32) -> (i32, i32) {
    %c0_i32 = arith.constant 0 : i32
    %c0_i32_0 = arith.constant 0 : i32
    %c0_i32_1 = arith.constant 0 : i32
    return %c0_i32, %c0_i32_0 : i32, i32
  }
  func.func @transform_3(%arg0: i32) -> (i32, i32, i32) {
    %c0_i32 = arith.constant 0 : i32
    %c0_i32_0 = arith.constant 0 : i32
    %c0_i32_1 = arith.constant 0 : i32
    return %arg0, %c0_i32, %c0_i32_0 : i32, i32, i32
  }
  func.func @transform_4(%arg0: i32) -> (i32, i32, i32) {
    %c0_i32 = arith.constant 0 : i32
    %c0_i32_0 = arith.constant 0 : i32
    %c0_i32_1 = arith.constant 0 : i32
    return %arg0, %c0_i32, %c0_i32_0 : i32, i32, i32
  }
}

module attributes {stable_mosaic.version = 11 : i64} {
  func.func @_fused_conv_kernel(%arg0: i32, %arg1: memref<2x36xbf16, #tpu.memory_space<vmem>>, %arg2: memref<2x1xf32, #tpu.memory_space<vmem>>, %arg3: memref<2x1xf32, #tpu.memory_space<vmem>>, %arg4: memref<1x36x4096xbf16, #tpu.memory_space<vmem>>, %arg5: memref<1x2x4096xf32, #tpu.memory_space<vmem>>) attributes {dimension_semantics = [#tpu.dimension_semantics<parallel>], iteration_bounds = array<i64: 2>, scalar_prefetch = 0 : i64, scratch_operands = 0 : i64, tpu.core_type = #tpu.core_type<tc>, window_params = [{pipeline_mode = #tpu.pipeline_mode<synchronous>, transform_indices = @transform_0, window_bounds = array<i64: 2, 36>}, {pipeline_mode = #tpu.pipeline_mode<synchronous>, transform_indices = @transform_1, window_bounds = array<i64: 2, 1>}, {pipeline_mode = #tpu.pipeline_mode<synchronous>, transform_indices = @transform_2, window_bounds = array<i64: 2, 1>}, {transform_indices = @transform_3, window_bounds = array<i64: 1, 36, 4096>}, {transform_indices = @transform_4, window_bounds = array<i64: 1, 2, 4096>}]} {
    %c0 = arith.constant 0 : index
    %c0_0 = arith.constant 0 : index
    %0 = vector.load %arg1[%c0, %c0_0] : memref<2x36xbf16, #tpu.memory_space<vmem>>, vector<2x36xbf16>
    %c0_1 = arith.constant 0 : index
    %c0_2 = arith.constant 0 : index
    %c0_3 = arith.constant 0 : index
    %1 = vector.load %arg4[%c0_1, %c0_2, %c0_3] : memref<1x36x4096xbf16, #tpu.memory_space<vmem>>, vector<1x36x4096xbf16>
    %2 = vector.shape_cast %1 : vector<1x36x4096xbf16> to vector<36x4096xbf16>
    %cst = arith.constant dense<0.000000e+00> : vector<2x4096xf32>
    %3 = tpu.matmul %0, %2, %cst {dimension_numbers = #tpu.dot_dimension_numbers<[1], [0], [0], [1], [0, 0, 1, 1], [], []>} : vector<2x36xbf16>, vector<36x4096xbf16>, vector<2x4096xf32> -> vector<2x4096xf32>
    %cst_4 = arith.constant dense<0.000000e+00> : vector<2xf32>
    %4 = vector.multi_reduction <add>, %3, %cst_4 [1] : vector<2x4096xf32> to vector<2xf32>
    %5 = vector.shape_cast %4 : vector<2xf32> to vector<2x1xf32>
    %cst_5 = arith.constant 4.096000e+03 : f32
    %6 = vector.broadcast %cst_5 : f32 to vector<2x1xf32>
    %7 = arith.divf %5, %6 : vector<2x1xf32>
    %8 = vector.broadcast %7 : vector<2x1xf32> to vector<2x4096xf32>
    %9 = arith.subf %3, %8 : vector<2x4096xf32>
    %10 = arith.mulf %9, %9 : vector<2x4096xf32>
    %cst_6 = arith.constant dense<0.000000e+00> : vector<2xf32>
    %11 = vector.multi_reduction <add>, %10, %cst_6 [1] : vector<2x4096xf32> to vector<2xf32>
    %12 = vector.shape_cast %11 : vector<2xf32> to vector<2x1xf32>
    %cst_7 = arith.constant 4.096000e+03 : f32
    %13 = vector.broadcast %cst_7 : f32 to vector<2x1xf32>
    %14 = arith.divf %12, %13 : vector<2x1xf32>
    %15 = vector.broadcast %7 : vector<2x1xf32> to vector<2x4096xf32>
    %16 = arith.subf %3, %15 : vector<2x4096xf32>
    %cst_8 = arith.constant 9.99999974E-6 : f32
    %17 = vector.broadcast %cst_8 : f32 to vector<2x1xf32>
    %18 = arith.addf %14, %17 : vector<2x1xf32>
    %19 = math.rsqrt %18 : vector<2x1xf32>
    %20 = vector.broadcast %19 : vector<2x1xf32> to vector<2x4096xf32>
    %21 = arith.mulf %16, %20 : vector<2x4096xf32>
    %c0_9 = arith.constant 0 : index
    %c0_10 = arith.constant 0 : index
    %22 = vector.load %arg2[%c0_9, %c0_10] : memref<2x1xf32, #tpu.memory_space<vmem>>, vector<2x1xf32>
    %23 = vector.broadcast %22 : vector<2x1xf32> to vector<2x4096xf32>
    %24 = arith.mulf %21, %23 : vector<2x4096xf32>
    %c0_11 = arith.constant 0 : index
    %c0_12 = arith.constant 0 : index
    %25 = vector.load %arg3[%c0_11, %c0_12] : memref<2x1xf32, #tpu.memory_space<vmem>>, vector<2x1xf32>
    %26 = vector.broadcast %25 : vector<2x1xf32> to vector<2x4096xf32>
    %27 = arith.addf %24, %26 : vector<2x4096xf32>
    %cst_13 = arith.constant 0.000000e+00 : f32
    %28 = vector.broadcast %cst_13 : f32 to vector<2x4096xf32>
    %29 = arith.maximumf %27, %28 : vector<2x4096xf32>
    %c0_14 = arith.constant 0 : index
    %c0_15 = arith.constant 0 : index
    %c0_16 = arith.constant 0 : index
    %30 = vector.load %arg5[%c0_14, %c0_15, %c0_16] : memref<1x2x4096xf32, #tpu.memory_space<vmem>>, vector<1x2x4096xf32>
    %31 = vector.shape_cast %30 : vector<1x2x4096xf32> to vector<2x4096xf32>
    %32 = vector.shape_cast %29 : vector<2x4096xf32> to vector<1x2x4096xf32>
    tpu.vector_store %arg5[%c0_14, %c0_15, %c0_16], %32 {strides = array<i32>} : memref<1x2x4096xf32, #tpu.memory_space<vmem>>, vector<1x2x4096xf32>,
    return
  }
  func.func @transform_0(%arg0: i32) -> (i32, i32) {
    %c0_i32 = arith.constant 0 : i32
    %c0_i32_0 = arith.constant 0 : i32
    %c0_i32_1 = arith.constant 0 : i32
    return %c0_i32, %c0_i32_0 : i32, i32
  }
  func.func @transform_1(%arg0: i32) -> (i32, i32) {
    %c0_i32 = arith.constant 0 : i32
    %c0_i32_0 = arith.constant 0 : i32
    %c0_i32_1 = arith.constant 0 : i32
    return %c0_i32, %c0_i32_0 : i32, i32
  }
  func.func @transform_2(%arg0: i32) -> (i32, i32) {
    %c0_i32 = arith.constant 0 : i32
    %c0_i32_0 = arith.constant 0 : i32
    %c0_i32_1 = arith.constant 0 : i32
    return %c0_i32, %c0_i32_0 : i32, i32
  }
  func.func @transform_3(%arg0: i32) -> (i32, i32, i32) {
    %c0_i32 = arith.constant 0 : i32
    %c0_i32_0 = arith.constant 0 : i32
    %c0_i32_1 = arith.constant 0 : i32
    return %arg0, %c0_i32, %c0_i32_0 : i32, i32, i32
  }
  func.func @transform_4(%arg0: i32) -> (i32, i32, i32) {
    %c0_i32 = arith.constant 0 : i32
    %c0_i32_0 = arith.constant 0 : i32
    %c0_i32_1 = arith.constant 0 : i32
    return %arg0, %c0_i32, %c0_i32_0 : i32, i32, i32
  }
}

module attributes {stable_mosaic.version = 11 : i64} {
  func.func @_fused_conv_kernel(%arg0: i32, %arg1: memref<6x98xbf16, #tpu.memory_space<vmem>>, %arg2: memref<1x98x4096xbf16, #tpu.memory_space<vmem>>, %arg3: memref<1x6x4096xf32, #tpu.memory_space<vmem>>) attributes {dimension_semantics = [#tpu.dimension_semantics<parallel>], iteration_bounds = array<i64: 2>, scalar_prefetch = 0 : i64, scratch_operands = 0 : i64, tpu.core_type = #tpu.core_type<tc>, window_params = [{pipeline_mode = #tpu.pipeline_mode<synchronous>, transform_indices = @transform_0, window_bounds = array<i64: 6, 98>}, {transform_indices = @transform_1, window_bounds = array<i64: 1, 98, 4096>}, {transform_indices = @transform_2, window_bounds = array<i64: 1, 6, 4096>}]} {
    %c0 = arith.constant 0 : index
    %c0_0 = arith.constant 0 : index
    %0 = vector.load %arg1[%c0, %c0_0] : memref<6x98xbf16, #tpu.memory_space<vmem>>, vector<6x98xbf16>
    %c0_1 = arith.constant 0 : index
    %c0_2 = arith.constant 0 : index
    %c0_3 = arith.constant 0 : index
    %1 = vector.load %arg2[%c0_1, %c0_2, %c0_3] : memref<1x98x4096xbf16, #tpu.memory_space<vmem>>, vector<1x98x4096xbf16>
    %2 = vector.shape_cast %1 : vector<1x98x4096xbf16> to vector<98x4096xbf16>
    %cst = arith.constant dense<0.000000e+00> : vector<6x4096xf32>
    %3 = tpu.matmul %0, %2, %cst {dimension_numbers = #tpu.dot_dimension_numbers<[1], [0], [0], [1], [0, 0, 1, 1], [], []>} : vector<6x98xbf16>, vector<98x4096xbf16>, vector<6x4096xf32> -> vector<6x4096xf32>
    %4 = math.tanh %3 : vector<6x4096xf32>
    %c0_4 = arith.constant 0 : index
    %c0_5 = arith.constant 0 : index
    %c0_6 = arith.constant 0 : index
    %5 = vector.load %arg3[%c0_4, %c0_5, %c0_6] : memref<1x6x4096xf32, #tpu.memory_space<vmem>>, vector<1x6x4096xf32>
    %6 = vector.shape_cast %5 : vector<1x6x4096xf32> to vector<6x4096xf32>
    %7 = vector.shape_cast %4 : vector<6x4096xf32> to vector<1x6x4096xf32>
    tpu.vector_store %arg3[%c0_4, %c0_5, %c0_6], %7 {strides = array<i32>} : memref<1x6x4096xf32, #tpu.memory_space<vmem>>, vector<1x6x4096xf32>,
    return
  }
  func.func @transform_0(%arg0: i32) -> (i32, i32) {
    %c0_i32 = arith.constant 0 : i32
    %c0_i32_0 = arith.constant 0 : i32
    %c0_i32_1 = arith.constant 0 : i32
    return %c0_i32, %c0_i32_0 : i32, i32
  }
  func.func @transform_1(%arg0: i32) -> (i32, i32, i32) {
    %c0_i32 = arith.constant 0 : i32
    %c0_i32_0 = arith.constant 0 : i32
    %c0_i32_1 = arith.constant 0 : i32
    return %arg0, %c0_i32, %c0_i32_0 : i32, i32, i32
  }
  func.func @transform_2(%arg0: i32) -> (i32, i32, i32) {
    %c0_i32 = arith.constant 0 : i32
    %c0_i32_0 = arith.constant 0 : i32
    %c0_i32_1 = arith.constant 0 : i32
    return %arg0, %c0_i32, %c0_i32_0 : i32, i32, i32
  }
}

</mosaic_0001>

<bundles_post_ra>
// kernel: generator_forward.8
= control target key start
LH: loop header
LB: loop body
LE: loop exit
PB: predicated region body
PF: predicated region fallthrough
CT: control target
= control target key end

     0   :  { %s575_s15 = smov 0   ;;  %s626_s0 = inlined_call_operand.vmem [shape: bf16[16,144], index: 0, kind: input, shape index: {}]   ;;  %s627_s1 = inlined_call_operand.vmem [shape: f32[16,1], index: 1, kind: input, shape index: {}]   ;;  %s628_s2 = inlined_call_operand.vmem [shape: f32[16,1], index: 2, kind: input, shape index: {}]   ;;  %s629_s3 = inlined_call_operand.vmem [shape: bf16[2,144,64], index: 3, kind: input, shape index: {}]   ;;  %s630_s4 = inlined_call_operand.vmem [shape: f32[2,16,64], index: 4, kind: output, shape index: {}]  }
   0x1 LB: > { %s453_s16 = sadd.s32 4294967295, %s546_s15   ;;  %p457_p0 = scmp.ge.s32.totalorder %s546_s15, 1  ;;  %s546_s15 = sphi %s575_s15, %s14_s15  }
   0x2   : > { %p162_p1 = scmp.lt.s32.totalorder %s546_s15, 3 }
   0x4   : > { %p163_p2 = pnand %p457_p0, %p162_p1 }
   0x5   : > { %p188_p3 = scmp.lt.s32.totalorder (!%p163_p2), %s453_s16, 1 }
   0x6   : > { %166 = sbr.rel (%p163_p2) target bundleno = 454 (0x1c6), region = 36 }
   0xb   : > { %s632_s16 = smov (!%p188_p3, %s453_s16), 1  ;;  %v509_v1 = vld [vmem:[%s626_s0 + $0x4] sm:$0xf]  ;;  %v465_v2 = vld [vmem:[%s626_s0 + $0x8] sm:$0xf0]  ;;  %vm282_vm0 = vcmask 130048  }
   0xc   : > { %s520_s17 = smul.u32 72, %s632_s16  ;;  %v468_v5 = vor.u32 %v509_v1, %v465_v2  ;;  %v463_v12 = vld [vmem:[%s626_s0] sm:$0xf]  ;;  %v510_v13 = vld [vmem:[%s626_s0 + $0x4] sm:$0xf0]  ;;  %vm314_vm1 = vcmask 523264  }
   0xd   : > { %v464_v14 = vor.u32 %v510_v13, %v463_v12  ;;  %v548_v23 = vmov 64.0   ;;  %v380_v26 = vld [vmem:[%s628_s2] sm:$0xff]  ;;  %v549_v27 = vmov 0   ;;  %v367_v43 = vld [vmem:[%s627_s1 + $0x8] sm:$0xff]  ;;  %s508_s11 = sshll.u32 %s632_s16, 4 }
   0xe   : > { %s192_s20 = scalar_lea.vmem %s629_s3, %s520_s17  ;;  %534 = vrcp.f32 %v548_v23  ;;  %532 = vset.pattern.permute.xlu0 %v549_v27  ;;  %533 = vset.pattern.permute.xlu1 %v549_v27  ;;  %v366_v39 = vld [vmem:[%s627_s1] sm:$0xff]  ;;  %v381_v44 = vld [vmem:[%s628_s2 + $0x8] sm:$0xff]  ;;  %s197_s14 = scalar_lea.vmem %s630_s4, %s508_s11 }
   0xf   : > { %v518_v0 = vld [vmem:[%s192_s20 + $0x38] sm:$0xff]  ;;  %v517_v3 = vld [vmem:[%s192_s20 + $0x30] sm:$0xff]  ;;  %v519_v4 = vld [vmem:[%s192_s20 + $0x40] sm:$0xff]  ;;  %531 = vset.pattern.permute.xlu2 %v549_v27 }
  0x10   : > { %286 = vmatpush.bf16.msra.mxu0 %v518_v0  ;;  %307 = vmatpush.bf16.msra.mxu1 %v519_v4  ;;  %v516_v6 = vld [vmem:[%s192_s20 + $0x28] sm:$0xff]  ;;  %v515_v7 = vld [vmem:[%s192_s20 + $0x20] sm:$0xff]  ;;  %v514_v8 = vld [vmem:[%s192_s20 + $0x18] sm:$0xff] }
  0x11   : > { %v513_v9 = vld [vmem:[%s192_s20 + $0x10] sm:$0xff]  ;;  %v512_v10 = vld [vmem:[%s192_s20 + $0x8] sm:$0xff]  ;;  %v511_v11 = vld [vmem:[%s192_s20] sm:$0xff]  ;;  %370 = vperm.xlu2 %531, %v366_v39  }
  0x13   : > { %505 = vmatmul.msk.bf16.vlgmr.msra.gmra.mxu1 %vm282_vm0, %v468_v5 }
  0x14   : > { %287 = vmatpush.bf16.msra.mxu0 %v517_v3  ;;  %v535_v24 = vpop.eup %534 }
  0x15   : > { %v322_v25 = vmul.f32 64.0, %v535_v24  ;;  %vm326_vm2 = vweird.f32 %v535_v24 }
  0x17   : > { %v323_v28 = vsub.f32 1.0, %v322_v25 }
  0x18   : > { %288 = vmatpush.bf16.msra.mxu0 %v516_v6 }
  0x19   : > { %v324_v29 = vmul.f32 %v535_v24, %v323_v28  ;;  %375 = vperm.xlu2 %531, %v367_v43  }
  0x1b   : > { %v325_v30 = vadd.f32 %v535_v24, %v324_v29 }
  0x1c   : > { %289 = vmatpush.bf16.msra.mxu0 %v515_v7 }
  0x1d   : > { %v327_v31 = vsel %vm326_vm2, %v535_v24, %v325_v30 }
  0x20   : > { %290 = vmatpush.bf16.msra.mxu0 %v514_v8 }
  0x24   : > { %291 = vmatpush.bf16.msra.mxu0 %v513_v9 }
  0x28   : > { %292 = vmatpush.bf16.msra.mxu0 %v512_v10 }
  0x2c   : > { %293 = vmatpush.bf16.msra.mxu0 %v511_v11 }
  0x2f   : > { %294 = vmatmul.bf16.vlgmr.msra.gmra.mxu0 %v464_v14 }
  0x6b   : > { %v371_v60 = vpop.permute.xlu2 %370 }
  0x73   : > { %v376_v8 = vpop.permute.xlu2 %375 }
  0x90   : > { %v309_v15 = vpop.f32.mrf.mxu1 }
  0x98   : > { %v311_v19 = vpop.f32.mrf.mxu1 }
  0xac   : > { %v295_v16 = vpop.f32.mrf.mxu0 }
  0xad   : > { %v310_v17 = vadd.f32 %v309_v15, %v295_v16 }
  0xaf   : > { %v315_v18 = vsel %vm314_vm1, %v310_v17, 0.0 }
  0xb0   : > { %316 = vadd.xlane.f32.xlu0 %v315_v18 }
  0xb4   : > { %v297_v20 = vpop.f32.mrf.mxu0 }
  0xb5   : > { %v312_v21 = vadd.f32 %v311_v19, %v297_v20 }
  0xb7   : > { %v318_v22 = vsel %vm314_vm1, %v312_v21, 0.0 }
  0xb8   : > { %319 = vadd.xlane.f32.xlu0 %v318_v22 }
  0xcc   : > { %384 = vperm.xlu0 %532, %v380_v26  }
 0x123   : > { %v317_v32 = vpop.xlane.xlu0 %316 }
 0x124   : > { %v328_v33 = vmul.f32 %v327_v31, %v317_v32 }
 0x126   : > { %v330_v34 = vsub.f32 %v310_v17, %v328_v33 }
 0x128   : > { %v332_v35 = vmul.f32 %v330_v34, %v330_v34 }
 0x12a   : > { %v334_v36 = vsel %vm314_vm1, %v332_v35, 0.0 }
 0x12b   : > { %335 = vadd.xlane.f32.xlu1 %v334_v36  ;;  %v320_v37 = vpop.xlane.xlu0 %319 }
 0x12c   : > { %v329_v38 = vmul.f32 %v327_v31, %v320_v37 }
 0x12e   : > { %v331_v40 = vsub.f32 %v312_v21, %v329_v38 }
 0x130   : > { %v333_v41 = vmul.f32 %v331_v40, %v331_v40 }
 0x132   : > { %v337_v42 = vsel %vm314_vm1, %v333_v41, 0.0 }
 0x133   : > { %338 = vadd.xlane.f32.xlu1 %v337_v42 }
 0x13e   : > { %v385_v0 = vpop.permute.xlu0 %384 }
 0x14c   : > { %389 = vperm.xlu1 %533, %v381_v44  }
 0x19e   : > { %v336_v45 = vpop.xlane.xlu1 %335 }
 0x19f   : > { %v340_v46 = vmul.f32 %v336_v45, %v327_v31 }
 0x1a1   : > { %v342_v47 = vadd.f32 1e-05, %v340_v46 }
 0x1a3   : > { %536 = vrsqrt.f32 %v342_v47  ;;  %vm350_vm4 = vweird.f32 %v342_v47 }
 0x1a6   : > { %v339_v48 = vpop.xlane.xlu1 %338 }
 0x1a7   : > { %v341_v49 = vmul.f32 %v339_v48, %v327_v31 }
 0x1a9   : > { %v537_v50 = vpop.eup %536  ;;  %v343_v51 = vadd.f32 1e-05, %v341_v49 }
 0x1aa   : > { %v345_v52 = vmul.f32 %v537_v50, %v342_v47  ;;  %vm351_vm3 = vweird.f32 %v537_v50 }
 0x1ab   : > { %538 = vrsqrt.f32 %v343_v51  ;;  %vm352_vm5 = vmor %vm350_vm4, %vm351_vm3  ;;  %vm360_vm7 = vweird.f32 %v343_v51 }
 0x1ac   : > { %v346_v53 = vmul.f32 %v537_v50, %v345_v52 }
 0x1ae   : > { %v347_v54 = vmul.f32 0.5, %v346_v53 }
 0x1b0   : > { %v348_v55 = vsub.f32 1.5, %v347_v54 }
 0x1b1   : > { %v539_v56 = vpop.eup %538 }
 0x1b2   : > { %v355_v57 = vmul.f32 %v539_v56, %v343_v51  ;;  %v349_v58 = vmul.f32 %v537_v50, %v348_v55  ;;  %vm361_vm6 = vweird.f32 %v539_v56 }
 0x1b3   : > { %vm362_vm8 = vmor %vm360_vm7, %vm361_vm6 }
 0x1b4   : > { %v356_v59 = vmul.f32 %v539_v56, %v355_v57  ;;  %v353_v61 = vsel %vm352_vm5, %v537_v50, %v349_v58 }
 0x1b5   : > { %v364_v62 = vmul.f32 %v353_v61, %v330_v34 }
 0x1b6   : > { %v357_v63 = vmul.f32 0.5, %v356_v59 }
 0x1b7   : > { %v378_v1 = vmul.f32 %v371_v60, %v364_v62 }
 0x1b8   : > { %v358_v2 = vsub.f32 1.5, %v357_v63 }
 0x1b9   : > { %v392_v3 = vadd.f32 %v385_v0, %v378_v1 }
 0x1ba   : > { %v359_v4 = vmul.f32 %v539_v56, %v358_v2 }
 0x1bb   : > { %v394_v5 = vmax.f32 %v392_v3, 0.0 }
 0x1bc   : > { %v363_v6 = vsel %vm362_vm8, %v539_v56, %v359_v4 }
 0x1bd   : > { %v365_v7 = vmul.f32 %v363_v6, %v331_v40  ;;  %396 = vst.msk [vmem:[%s197_s14] sm:$0xff] %vm314_vm1, %v394_v5 }
 0x1be   : > { %v390_v9 = vpop.permute.xlu1 %389 }
 0x1bf   : > { %v379_v10 = vmul.f32 %v376_v8, %v365_v7 }
 0x1c1   : > { %v393_v11 = vadd.f32 %v390_v9, %v379_v10 }
 0x1c3   : > { %v395_v12 = vmax.f32 %v393_v11, 0.0 }
 0x1c5   : > { %397 = vst.msk [vmem:[%s197_s14 + $0x8] sm:$0xff] %vm314_vm1, %v395_v12 }
 0x1c6 PF: > { %s14_s15 = sadd.s32 1, %s546_s15  }
 0x1c7   : > { %p11_p4 = scmp.ge.s32.totalorder %s14_s15, 4  }
 0x1c9   :  { %13 = sbr.rel (!%p11_p4) target bundleno = 1 (0x1), region = 66 }

// kernel: generator_forward.9
= control target key start
LH: loop header
LB: loop body
LE: loop exit
PB: predicated region body
PF: predicated region fallthrough
CT: control target
= control target key end

     0   :  { %s644_s18 = smov 0   ;;  %s698_s0 = inlined_call_operand.vmem [shape: bf16[16,144], index: 0, kind: input, shape index: {}]   ;;  %s699_s1 = inlined_call_operand.vmem [shape: f32[16,1], index: 1, kind: input, shape index: {}]   ;;  %s700_s2 = inlined_call_operand.vmem [shape: f32[16,1], index: 2, kind: input, shape index: {}]   ;;  %s701_s3 = inlined_call_operand.vmem [shape: bf16[2,144,64], index: 3, kind: input, shape index: {}]   ;;  %s702_s4 = inlined_call_operand.vmem [shape: f32[2,16,64], index: 4, kind: input, shape index: {}]   ;;  %s703_s5 = inlined_call_operand.vmem [shape: f32[2,16,64], index: 5, kind: output, shape index: {}]  }
   0x1 LB: > { %s514_s19 = sadd.s32 4294967295, %s610_s18   ;;  %p518_p0 = scmp.ge.s32.totalorder %s610_s18, 1  ;;  %s610_s18 = sphi %s644_s18, %s15_s18  }
   0x2   : > { %p197_p1 = scmp.lt.s32.totalorder %s610_s18, 3 }
   0x4   : > { %p198_p2 = pnand %p518_p0, %p197_p1 }
   0x5   : > { %p230_p3 = scmp.lt.s32.totalorder (!%p198_p2), %s514_s19, 1 }
   0x6   : > { %201 = sbr.rel (%p198_p2) target bundleno = 454 (0x1c6), region = 40 }
   0xb   : > { %s705_s19 = smov (!%p230_p3, %s514_s19), 1  ;;  %v573_v1 = vld [vmem:[%s698_s0 + $0x4] sm:$0xf]  ;;  %v528_v2 = vld [vmem:[%s698_s0 + $0x8] sm:$0xf0]  ;;  %vm329_vm0 = vcmask 130048  }
   0xc   : > { %s584_s20 = smul.u32 72, %s705_s19  ;;  %v531_v5 = vor.u32 %v573_v1, %v528_v2  ;;  %v526_v12 = vld [vmem:[%s698_s0] sm:$0xf]  ;;  %v574_v13 = vld [vmem:[%s698_s0 + $0x4] sm:$0xf0]  ;;  %vm361_vm1 = vcmask 523264  }
   0xd   : > { %v527_v14 = vor.u32 %v574_v13, %v526_v12  ;;  %v612_v23 = vmov 64.0   ;;  %v427_v26 = vld [vmem:[%s700_s2] sm:$0xff]  ;;  %v613_v27 = vmov 0   ;;  %v414_v43 = vld [vmem:[%s699_s1 + $0x8] sm:$0xff]  ;;  %s571_s15 = sshll.u32 %s705_s19, 4 }
   0xe   : > { %s234_s23 = scalar_lea.vmem %s701_s3, %s584_s20  ;;  %598 = vrcp.f32 %v612_v23  ;;  %596 = vset.pattern.permute.xlu0 %v613_v27  ;;  %597 = vset.pattern.permute.xlu1 %v613_v27  ;;  %v413_v39 = vld [vmem:[%s699_s1] sm:$0xff]  ;;  %v428_v44 = vld [vmem:[%s700_s2 + $0x8] sm:$0xff]  ;;  %s239_s20 = scalar_lea.vmem %s702_s4, %s571_s15 }
   0xf   : > { %v582_v0 = vld [vmem:[%s234_s23 + $0x38] sm:$0xff]  ;;  %v581_v3 = vld [vmem:[%s234_s23 + $0x30] sm:$0xff]  ;;  %v583_v4 = vld [vmem:[%s234_s23 + $0x40] sm:$0xff]  ;;  %595 = vset.pattern.permute.xlu2 %v613_v27  ;;  %s244_s22 = scalar_lea.vmem %s703_s5, %s571_s15 }
  0x10   : > { %333 = vmatpush.bf16.msra.mxu0 %v582_v0  ;;  %354 = vmatpush.bf16.msra.mxu1 %v583_v4  ;;  %v580_v6 = vld [vmem:[%s234_s23 + $0x28] sm:$0xff]  ;;  %v579_v7 = vld [vmem:[%s234_s23 + $0x20] sm:$0xff]  ;;  %v578_v8 = vld [vmem:[%s234_s23 + $0x18] sm:$0xff] }
  0x11   : > { %v577_v9 = vld [vmem:[%s234_s23 + $0x10] sm:$0xff]  ;;  %v576_v10 = vld [vmem:[%s234_s23 + $0x8] sm:$0xff]  ;;  %v575_v11 = vld [vmem:[%s234_s23] sm:$0xff]  ;;  %417 = vperm.xlu2 %595, %v413_v39  }
  0x12   : > { %v442_v12 = vld [vmem:[%s239_s20 + $0x8] sm:$0xff] }
  0x13   : > { %568 = vmatmul.msk.bf16.vlgmr.msra.gmra.mxu1 %vm329_vm0, %v531_v5 }
  0x14   : > { %334 = vmatpush.bf16.msra.mxu0 %v581_v3  ;;  %v599_v24 = vpop.eup %598  ;;  %v441_v3 = vld [vmem:[%s239_s20] sm:$0xff] }
  0x15   : > { %v369_v25 = vmul.f32 64.0, %v599_v24  ;;  %vm373_vm2 = vweird.f32 %v599_v24 }
  0x17   : > { %v370_v28 = vsub.f32 1.0, %v369_v25 }
  0x18   : > { %335 = vmatpush.bf16.msra.mxu0 %v580_v6 }
  0x19   : > { %v371_v29 = vmul.f32 %v599_v24, %v370_v28  ;;  %422 = vperm.xlu2 %595, %v414_v43  }
  0x1b   : > { %v372_v30 = vadd.f32 %v599_v24, %v371_v29 }
  0x1c   : > { %336 = vmatpush.bf16.msra.mxu0 %v579_v7 }
  0x1d   : > { %v374_v31 = vsel %vm373_vm2, %v599_v24, %v372_v30 }
  0x20   : > { %337 = vmatpush.bf16.msra.mxu0 %v578_v8 }
  0x24   : > { %338 = vmatpush.bf16.msra.mxu0 %v577_v9 }
  0x28   : > { %339 = vmatpush.bf16.msra.mxu0 %v576_v10 }
  0x2c   : > { %340 = vmatpush.bf16.msra.mxu0 %v575_v11 }
  0x2f   : > { %341 = vmatmul.bf16.vlgmr.msra.gmra.mxu0 %v527_v14 }
  0x6b   : > { %v418_v60 = vpop.permute.xlu2 %417 }
  0x73   : > { %v423_v9 = vpop.permute.xlu2 %422 }
  0x90   : > { %v356_v15 = vpop.f32.mrf.mxu1 }
  0x98   : > { %v358_v19 = vpop.f32.mrf.mxu1 }
  0xac   : > { %v342_v16 = vpop.f32.mrf.mxu0 }
  0xad   : > { %v357_v17 = vadd.f32 %v356_v15, %v342_v16 }
  0xaf   : > { %v362_v18 = vsel %vm361_vm1, %v357_v17, 0.0 }
  0xb0   : > { %363 = vadd.xlane.f32.xlu0 %v362_v18 }
  0xb4   : > { %v344_v20 = vpop.f32.mrf.mxu0 }
  0xb5   : > { %v359_v21 = vadd.f32 %v358_v19, %v344_v20 }
  0xb7   : > { %v365_v22 = vsel %vm361_vm1, %v359_v21, 0.0 }
  0xb8   : > { %366 = vadd.xlane.f32.xlu0 %v365_v22 }
  0xcc   : > { %431 = vperm.xlu0 %596, %v427_v26  }
 0x123   : > { %v364_v32 = vpop.xlane.xlu0 %363 }
 0x124   : > { %v375_v33 = vmul.f32 %v374_v31, %v364_v32 }
 0x126   : > { %v377_v34 = vsub.f32 %v357_v17, %v375_v33 }
 0x128   : > { %v379_v35 = vmul.f32 %v377_v34, %v377_v34 }
 0x12a   : > { %v381_v36 = vsel %vm361_vm1, %v379_v35, 0.0 }
 0x12b   : > { %382 = vadd.xlane.f32.xlu1 %v381_v36  ;;  %v367_v37 = vpop.xlane.xlu0 %366 }
 0x12c   : > { %v376_v38 = vmul.f32 %v374_v31, %v367_v37 }
 0x12e   : > { %v378_v40 = vsub.f32 %v359_v21, %v376_v38 }
 0x130   : > { %v380_v41 = vmul.f32 %v378_v40, %v378_v40 }
 0x132   : > { %v384_v42 = vsel %vm361_vm1, %v380_v41, 0.0 }
 0x133   : > { %385 = vadd.xlane.f32.xlu1 %v384_v42 }
 0x13e   : > { %v432_v0 = vpop.permute.xlu0 %431 }
 0x14c   : > { %436 = vperm.xlu1 %597, %v428_v44  }
 0x19e   : > { %v383_v45 = vpop.xlane.xlu1 %382 }
 0x19f   : > { %v387_v46 = vmul.f32 %v383_v45, %v374_v31 }
 0x1a1   : > { %v389_v47 = vadd.f32 1e-05, %v387_v46 }
 0x1a3   : > { %600 = vrsqrt.f32 %v389_v47  ;;  %vm397_vm4 = vweird.f32 %v389_v47 }
 0x1a6   : > { %v386_v48 = vpop.xlane.xlu1 %385 }
 0x1a7   : > { %v388_v49 = vmul.f32 %v386_v48, %v374_v31 }
 0x1a9   : > { %v601_v50 = vpop.eup %600  ;;  %v390_v51 = vadd.f32 1e-05, %v388_v49 }
 0x1aa   : > { %v392_v52 = vmul.f32 %v601_v50, %v389_v47  ;;  %vm398_vm3 = vweird.f32 %v601_v50 }
 0x1ab   : > { %602 = vrsqrt.f32 %v390_v51  ;;  %vm399_vm5 = vmor %vm397_vm4, %vm398_vm3  ;;  %vm407_vm7 = vweird.f32 %v390_v51 }
 0x1ac   : > { %v393_v53 = vmul.f32 %v601_v50, %v392_v52 }
 0x1ae   : > { %v394_v54 = vmul.f32 0.5, %v393_v53 }
 0x1b0   : > { %v395_v55 = vsub.f32 1.5, %v394_v54 }
 0x1b1   : > { %v603_v56 = vpop.eup %602 }
 0x1b2   : > { %v402_v57 = vmul.f32 %v603_v56, %v390_v51  ;;  %v396_v58 = vmul.f32 %v601_v50, %v395_v55  ;;  %vm408_vm6 = vweird.f32 %v603_v56 }
 0x1b3   : > { %vm409_vm8 = vmor %vm407_vm7, %vm408_vm6 }
 0x1b4   : > { %v403_v59 = vmul.f32 %v603_v56, %v402_v57  ;;  %v400_v61 = vsel %vm399_vm5, %v601_v50, %v396_v58 }
 0x1b5   : > { %v411_v62 = vmul.f32 %v400_v61, %v377_v34 }
 0x1b6   : > { %v404_v63 = vmul.f32 0.5, %v403_v59 }
 0x1b7   : > { %v425_v1 = vmul.f32 %v418_v60, %v411_v62 }
 0x1b8   : > { %v405_v2 = vsub.f32 1.5, %v404_v63 }
 0x1b9   : > { %v439_v4 = vadd.f32 %v432_v0, %v425_v1 }
 0x1ba   : > { %v406_v5 = vmul.f32 %v603_v56, %v405_v2 }
 0x1bb   : > { %v443_v6 = vadd.f32 %v441_v3, %v439_v4 }
 0x1bc   : > { %v410_v7 = vsel %vm409_vm8, %v603_v56, %v406_v5 }
 0x1bd   : > { %v412_v8 = vmul.f32 %v410_v7, %v378_v40  ;;  %445 = vst.msk [vmem:[%s244_s22] sm:$0xff] %vm361_vm1, %v443_v6 }
 0x1be   : > { %v437_v10 = vpop.permute.xlu1 %436 }
 0x1bf   : > { %v426_v11 = vmul.f32 %v423_v9, %v412_v8 }
 0x1c1   : > { %v440_v13 = vadd.f32 %v437_v10, %v426_v11 }
 0x1c3   : > { %v444_v14 = vadd.f32 %v442_v12, %v440_v13 }
 0x1c5   : > { %446 = vst.msk [vmem:[%s244_s22 + $0x8] sm:$0xff] %vm361_vm1, %v444_v14 }
 0x1c6 PF: > { %s15_s18 = sadd.s32 1, %s610_s18  }
 0x1c7   : > { %p12_p4 = scmp.ge.s32.totalorder %s15_s18, 4  }
 0x1c9   :  { %14 = sbr.rel (!%p12_p4) target bundleno = 1 (0x1), region = 73 }

// kernel: generator_forward.12
= control target key start
LH: loop header
LB: loop body
LE: loop exit
PB: predicated region body
PF: predicated region fallthrough
CT: control target
= control target key end

     0   :  { %s632_s15 = smov 0   ;;  %s706_s0 = inlined_call_operand.vmem [shape: bf16[8,144], index: 0, kind: input, shape index: {}]   ;;  %s707_s1 = inlined_call_operand.vmem [shape: f32[8,1], index: 1, kind: input, shape index: {}]   ;;  %s708_s2 = inlined_call_operand.vmem [shape: f32[8,1], index: 2, kind: input, shape index: {}]   ;;  %s709_s3 = inlined_call_operand.vmem [shape: bf16[2,144,256], index: 3, kind: input, shape index: {}]   ;;  %s710_s4 = inlined_call_operand.vmem [shape: f32[2,8,256], index: 4, kind: output, shape index: {}]  }
   0x1 LB: > { %s477_s16 = sadd.s32 4294967295, %s603_s15   ;;  %p481_p0 = scmp.ge.s32.totalorder %s603_s15, 1  ;;  %s603_s15 = sphi %s632_s15, %s14_s15  }
   0x2   : > { %p162_p1 = scmp.lt.s32.totalorder %s603_s15, 3 }
   0x4   : > { %p163_p2 = pnand %p481_p0, %p162_p1 }
   0x5   : > { %p188_p3 = scmp.lt.s32.totalorder (!%p163_p2), %s477_s16, 1 }
   0x6   : > { %166 = sbr.rel (%p163_p2) target bundleno = 458 (0x1ca), region = 36 }
   0xb   : > { %s712_s16 = smov (!%p188_p3, %s477_s16), 1  ;;  %v659_v11 = vld [vmem:[%s706_s0] sm:$0xff]  ;;  %vm314_vm0 = vcmask 130048  }
   0xc   : > { %s580_s17 = smul.u32 144, %s712_s16  ;;  %v220_v17 = vunpack.c.h.b16 %v659_v11  ;;  %v219_v55 = vunpack.c.l.b16 %v659_v11  ;;  %v410_v11 = vld [vmem:[%s708_s2] sm:$0xff]  ;;  %s561_s27 = sshll.u32 %s712_s16, 4 }
   0xd   : > { %s197_s30 = scalar_lea.vmem %s710_s4, %s561_s27 }
   0xe   : > { %s646_s20 = scalar_lea.vmem %s709_s3, %s580_s17  ;;  %v222_v27 = vpack.c.b16 %v220_v17, %v220_v17  ;;  %v221_v58 = vpack.c.b16 %v219_v55, %v219_v55 }
   0xf   : > { %v543_v0 = vld [vmem:[%s646_s20 + $0x70] sm:$0xf]  ;;  %v577_v1 = vld [vmem:[%s646_s20 + $0x74] sm:$0xf0]  ;;  %v576_v2 = vld [vmem:[%s646_s20 + $0x74] sm:$0xf] }
  0x10   : > { %v544_v3 = vor.u32 %v577_v1, %v543_v0  ;;  %v545_v4 = vld [vmem:[%s646_s20 + $0x78] sm:$0xf0]  ;;  %v535_v5 = vld [vmem:[%s646_s20 + $0x60] sm:$0xf]  ;;  %v575_v6 = vld [vmem:[%s646_s20 + $0x64] sm:$0xf0] }
  0x11   : > { %v548_v7 = vor.u32 %v576_v2, %v545_v4  ;;  %v574_v8 = vld [vmem:[%s646_s20 + $0x64] sm:$0xf]  ;;  %v537_v9 = vld [vmem:[%s646_s20 + $0x68] sm:$0xf0]  ;;  %v536_v10 = vor.u32 %v575_v6, %v535_v5  ;;  %v527_v13 = vld [vmem:[%s646_s20 + $0x50] sm:$0xf] }
  0x12   : > { %318 = vmatpush.bf16.msra.mxu0 %v544_v3  ;;  %v540_v12 = vor.u32 %v574_v8, %v537_v9  ;;  %v573_v14 = vld [vmem:[%s646_s20 + $0x54] sm:$0xf0]  ;;  %v572_v15 = vld [vmem:[%s646_s20 + $0x54] sm:$0xf]  ;;  %v529_v16 = vld [vmem:[%s646_s20 + $0x58] sm:$0xf0] }
  0x13   : > { %344 = vmatpush.bf16.msra.mxu2 %v548_v7  ;;  %v528_v18 = vor.u32 %v573_v14, %v527_v13  ;;  %v519_v19 = vld [vmem:[%s646_s20 + $0x40] sm:$0xf]  ;;  %v532_v20 = vor.u32 %v572_v15, %v529_v16  ;;  %v571_v21 = vld [vmem:[%s646_s20 + $0x44] sm:$0xf0]  ;;  %v578_v22 = vld [vmem:[%s646_s20 + $0x84] sm:$0xf] }
  0x14   : > { %v553_v23 = vld [vmem:[%s646_s20 + $0x88] sm:$0xf0]  ;;  %v570_v24 = vld [vmem:[%s646_s20 + $0x44] sm:$0xf]  ;;  %v551_v28 = vld [vmem:[%s646_s20 + $0x80] sm:$0xf]  ;;  %v520_v30 = vor.u32 %v571_v21, %v519_v19 }
  0x15   : > { %v521_v25 = vld [vmem:[%s646_s20 + $0x48] sm:$0xf0]  ;;  %v556_v26 = vor.u32 %v578_v22, %v553_v23  ;;  %v579_v29 = vld [vmem:[%s646_s20 + $0x84] sm:$0xf0]  ;;  %v511_v33 = vld [vmem:[%s646_s20 + $0x30] sm:$0xf] }
  0x16   : > { %319 = vmatpush.bf16.msra.mxu0 %v536_v10  ;;  %v552_v31 = vor.u32 %v579_v29, %v551_v28  ;;  %v524_v32 = vor.u32 %v570_v24, %v521_v25  ;;  %v569_v34 = vld [vmem:[%s646_s20 + $0x34] sm:$0xf0]  ;;  %v568_v35 = vld [vmem:[%s646_s20 + $0x34] sm:$0xf]  ;;  %v513_v36 = vld [vmem:[%s646_s20 + $0x38] sm:$0xf0] }
  0x17   : > { %345 = vmatpush.bf16.msra.mxu2 %v540_v12  ;;  %364 = vmatpush.bf16.msra.mxu3 %v556_v26  ;;  %v512_v37 = vor.u32 %v569_v34, %v511_v33  ;;  %v516_v38 = vor.u32 %v568_v35, %v513_v36  ;;  %v503_v39 = vld [vmem:[%s646_s20 + $0x20] sm:$0xf]  ;;  %v567_v40 = vld [vmem:[%s646_s20 + $0x24] sm:$0xf0]  ;;  %v566_v41 = vld [vmem:[%s646_s20 + $0x24] sm:$0xf] }
  0x18   : > { %338 = vmatpush.bf16.msra.mxu1 %v552_v31  ;;  %v505_v42 = vld [vmem:[%s646_s20 + $0x28] sm:$0xf0]  ;;  %v504_v43 = vor.u32 %v567_v40, %v503_v39  ;;  %v495_v45 = vld [vmem:[%s646_s20 + $0x10] sm:$0xf]  ;;  %v565_v46 = vld [vmem:[%s646_s20 + $0x14] sm:$0xf0] }
  0x19   : > { %v508_v44 = vor.u32 %v566_v41, %v505_v42  ;;  %v564_v47 = vld [vmem:[%s646_s20 + $0x14] sm:$0xf]  ;;  %v497_v48 = vld [vmem:[%s646_s20 + $0x18] sm:$0xf0]  ;;  %v496_v49 = vor.u32 %v565_v46, %v495_v45  ;;  %v487_v51 = vld [vmem:[%s646_s20] sm:$0xf] }
  0x1a   : > { %320 = vmatpush.bf16.msra.mxu0 %v528_v18  ;;  %558 = vmatmul.msk.bf16.vlgmr.msra.gmra.mxu3 %vm314_vm0, %v222_v27  ;;  %v500_v50 = vor.u32 %v564_v47, %v497_v48  ;;  %v563_v52 = vld [vmem:[%s646_s20 + $0x4] sm:$0xf0]  ;;  %v562_v53 = vld [vmem:[%s646_s20 + $0x4] sm:$0xf]  ;;  %v489_v54 = vld [vmem:[%s646_s20 + $0x8] sm:$0xf0] }
  0x1b   : > { %346 = vmatpush.bf16.msra.mxu2 %v532_v20  ;;  %557 = vmatmul.msk.bf16.vlgmr.msra.gmra.mxu1 %vm314_vm0, %v222_v27  ;;  %v488_v56 = vor.u32 %v563_v52, %v487_v51  ;;  %v492_v57 = vor.u32 %v562_v53, %v489_v54  ;;  %v605_v6 = vmov 256.0   ;;  %v402_v7 = vld [vmem:[%s707_s1] sm:$0xff]  ;;  %v606_v8 = vmov 0  }
  0x1c   : > { %593 = vrcp.f32 %v605_v6  ;;  %591 = vset.pattern.permute.xlu1 %v606_v8  ;;  %592 = vset.pattern.permute.xlu0 %v606_v8 }
  0x1d   : > { %405 = vperm.xlu1 %591, %v402_v7  }
  0x1e   : > { %321 = vmatpush.bf16.msra.mxu0 %v520_v30 }
  0x1f   : > { %347 = vmatpush.bf16.msra.mxu2 %v524_v32 }
  0x22   : > { %322 = vmatpush.bf16.msra.mxu0 %v512_v37  ;;  %v594_v9 = vpop.eup %593 }
  0x23   : > { %348 = vmatpush.bf16.msra.mxu2 %v516_v38  ;;  %v374_v10 = vmul.f32 256.0, %v594_v9  ;;  %vm378_vm1 = vweird.f32 %v594_v9 }
  0x25   : > { %v375_v12 = vsub.f32 1.0, %v374_v10  ;;  %413 = vperm.xlu1 %591, %v410_v11  }
  0x26   : > { %323 = vmatpush.bf16.msra.mxu0 %v504_v43 }
  0x27   : > { %349 = vmatpush.bf16.msra.mxu2 %v508_v44  ;;  %v376_v13 = vmul.f32 %v594_v9, %v375_v12 }
  0x29   : > { %v377_v14 = vadd.f32 %v594_v9, %v376_v13 }
  0x2a   : > { %324 = vmatpush.bf16.msra.mxu0 %v496_v49 }
  0x2b   : > { %350 = vmatpush.bf16.msra.mxu2 %v500_v50  ;;  %v379_v15 = vsel %vm378_vm1, %v594_v9, %v377_v14 }
  0x2e   : > { %325 = vmatpush.bf16.msra.mxu0 %v488_v56 }
  0x2f   : > { %351 = vmatpush.bf16.msra.mxu2 %v492_v57 }
  0x31   : > { %326 = vmatmul.bf16.vlgmr.msra.gmra.mxu0 %v221_v58 }
  0x32   : > { %352 = vmatmul.bf16.vlgmr.msra.gmra.mxu2 %v221_v58 }
  0x8f   : > { %v406_v30 = vpop.permute.xlu1 %405 }
  0x97   : > { %v414_v38 = vpop.permute.xlu1 %413 }
  0x98   : > { %v340_v59 = vpop.f32.mrf.mxu1 }
  0x9d   : > { %v366_v60 = vpop.f32.mrf.mxu3 }
  0xa0   : > { %v342_v61 = vpop.f32.mrf.mxu1 }
  0xa5   : > { %v368_v62 = vpop.f32.mrf.mxu3 }
  0xae   : > { %v327_v63 = vpop.f32.mrf.mxu0 }
  0xaf   : > { %v341_v0 = vadd.f32 %v340_v59, %v327_v63 }
  0xb5   : > { %v353_v1 = vpop.f32.mrf.mxu2 }
  0xb6   : > { %v367_v2 = vadd.f32 %v366_v60, %v353_v1  ;;  %v329_v3 = vpop.f32.mrf.mxu0 }
  0xb8   : > { %v370_v4 = vadd.f32 %v367_v2, %v341_v0 }
  0xba   : > { %371 = vadd.xlane.f32.xlu0 %v370_v4 }
  0xbd   : > { %v355_v5 = vpop.f32.mrf.mxu2 }
 0x12d   : > { %v372_v16 = vpop.xlane.xlu0 %371 }
 0x12e   : > { %v380_v17 = vmul.f32 %v379_v15, %v372_v16 }
 0x130   : > { %v381_v18 = vsub.f32 %v341_v0, %v380_v17  ;;  %v382_v19 = vsub.f32 %v367_v2, %v380_v17 }
 0x132   : > { %v383_v20 = vmul.f32 %v381_v18, %v381_v18  ;;  %v384_v21 = vmul.f32 %v382_v19, %v382_v19 }
 0x134   : > { %v385_v22 = vadd.f32 %v384_v21, %v383_v20 }
 0x136   : > { %386 = vadd.xlane.f32.xlu0 %v385_v22 }
 0x1a9   : > { %v387_v23 = vpop.xlane.xlu0 %386 }
 0x1aa   : > { %v388_v24 = vmul.f32 %v387_v23, %v379_v15 }
 0x1ac   : > { %v389_v25 = vadd.f32 1e-05, %v388_v24 }
 0x1ae   : > { %595 = vrsqrt.f32 %v389_v25  ;;  %vm396_vm3 = vweird.f32 %v389_v25 }
 0x1b4   : > { %v596_v26 = vpop.eup %595 }
 0x1b5   : > { %v391_v27 = vmul.f32 %v596_v26, %v389_v25  ;;  %vm397_vm2 = vweird.f32 %v596_v26 }
 0x1b6   : > { %vm398_vm4 = vmor %vm396_vm3, %vm397_vm2 }
 0x1b7   : > { %v392_v28 = vmul.f32 %v596_v26, %v391_v27 }
 0x1b9   : > { %v393_v29 = vmul.f32 0.5, %v392_v28 }
 0x1bb   : > { %v394_v31 = vsub.f32 1.5, %v393_v29 }
 0x1bd   : > { %v395_v32 = vmul.f32 %v596_v26, %v394_v31 }
 0x1bf   : > { %v399_v33 = vsel %vm398_vm4, %v596_v26, %v395_v32 }
 0x1c0   : > { %v400_v34 = vmul.f32 %v399_v33, %v381_v18  ;;  %v401_v35 = vmul.f32 %v399_v33, %v382_v19 }
 0x1c2   : > { %v408_v36 = vmul.f32 %v406_v30, %v400_v34  ;;  %v409_v37 = vmul.f32 %v406_v30, %v401_v35 }
 0x1c4   : > { %v416_v39 = vadd.f32 %v414_v38, %v408_v36  ;;  %v417_v40 = vadd.f32 %v414_v38, %v409_v37 }
 0x1c6   : > { %v418_v41 = vmax.f32 %v416_v39, 0.0  ;;  %v419_v42 = vmax.f32 %v417_v40, 0.0 }
 0x1c8   : > { %420 = vst [vmem:[%s197_s30] sm:$0xff] %v418_v41 }
 0x1c9   : > { %421 = vst [vmem:[%s197_s30 + $0x8] sm:$0xff] %v419_v42 }
 0x1ca PF: > { %s14_s15 = sadd.s32 1, %s603_s15  }
 0x1cb   : > { %p11_p4 = scmp.ge.s32.totalorder %s14_s15, 4  }
 0x1cd   :  { %13 = sbr.rel (!%p11_p4) target bundleno = 1 (0x1), region = 66 }

// kernel: generator_forward.13
= control target key start
LH: loop header
LB: loop body
LE: loop exit
PB: predicated region body
PF: predicated region fallthrough
CT: control target
= control target key end

     0   :  { %s973_s15 = smov 0   ;;  %s1119_s0 = inlined_call_operand.vmem [shape: bf16[4,72], index: 0, kind: input, shape index: {}]   ;;  %s1120_s1 = inlined_call_operand.vmem [shape: f32[4,1], index: 1, kind: input, shape index: {}]   ;;  %s1121_s2 = inlined_call_operand.vmem [shape: f32[4,1], index: 2, kind: input, shape index: {}]   ;;  %s1122_s3 = inlined_call_operand.vmem [shape: bf16[2,72,1024], index: 3, kind: input, shape index: {}]   ;;  %s1123_s4 = inlined_call_operand.vmem [shape: f32[2,4,1024], index: 4, kind: output, shape index: {}]  }
   0x1 LB: > { %s742_s16 = sadd.s32 4294967295, %s944_s15   ;;  %p746_p0 = scmp.ge.s32.totalorder %s944_s15, 1  ;;  %s944_s15 = sphi %s973_s15, %s14_s15  }
   0x2   : > { %p162_p1 = scmp.lt.s32.totalorder %s944_s15, 3 }
   0x4   : > { %p163_p2 = pnand %p746_p0, %p162_p1 }
   0x5   : > { %p188_p3 = scmp.lt.s32.totalorder (!%p163_p2), %s742_s16, 1 }
   0x6   : > { %166 = sbr.rel (%p163_p2) target bundleno = 488 (0x1e8), region = 36 }
   0xb   : > { %s1125_s16 = smov (!%p188_p3, %s742_s16), 1  ;;  %vm420_vm0 = vcmask 1043456   ;;  %vm416_vm1 = vcmask 588800  }
   0xc   : > { %s921_s17 = smul.u32 288, %s1125_s16  ;;  %s888_s27 = sshll.u32 %s1125_s16, 5 }
   0xd   : > { %s197_s30 = scalar_lea.vmem %s1123_s4, %s888_s27 }
   0xe   : > { %s987_s20 = scalar_lea.vmem %s1122_s3, %s921_s17 }
   0xf   : > { %v232_v0 = vld [vmem:[%s987_s20 + $0x100] sm:$0xff]  ;;  %v233_v1 = vld [vmem:[%s987_s20 + $0x108] sm:$0xff]  ;;  %v234_v46 = vld [vmem:[%s987_s20 + $0x110] sm:$0xff] }
  0x10   : > { %v336_v2 = vunpack.c.l.b16 %v232_v0  ;;  %v337_v3 = vunpack.c.h.b16 %v232_v0  ;;  %v338_v4 = vunpack.c.l.b16 %v233_v1  ;;  %v339_v5 = vunpack.c.h.b16 %v233_v1  ;;  %v848_v6 = vld [vmem:[%s987_s20 + $0xc0] sm:$0xf]  ;;  %v913_v12 = vld [vmem:[%s987_s20 + $0xc4] sm:$0xf]  ;;  %v856_v14 = vld [vmem:[%s987_s20 + $0xc8] sm:$0xf] }
  0x11   : > { %v917_v7 = vld [vmem:[%s987_s20 + $0xdc] sm:$0xf0]  ;;  %v850_v13 = vld [vmem:[%s987_s20 + $0xe0] sm:$0xf0]  ;;  %v918_v15 = vld [vmem:[%s987_s20 + $0xe4] sm:$0xf0]  ;;  %v340_v48 = vunpack.c.l.b16 %v234_v46  ;;  %v341_v49 = vunpack.c.h.b16 %v234_v46 }
  0x12   : > { %v376_v8 = vpack.c.b16 %v336_v2, %v336_v2  ;;  %v377_v9 = vpack.c.b16 %v337_v3, %v337_v3  ;;  %v378_v10 = vpack.c.b16 %v338_v4, %v338_v4  ;;  %v379_v11 = vpack.c.b16 %v339_v5, %v339_v5  ;;  %v914_v16 = vld [vmem:[%s987_s20 + $0xcc] sm:$0xf]  ;;  %v816_v24 = vld [vmem:[%s987_s20 + $0x80] sm:$0xf]  ;;  %v905_v28 = vld [vmem:[%s987_s20 + $0x84] sm:$0xf] }
  0x13   : > { %v858_v17 = vld [vmem:[%s987_s20 + $0xe8] sm:$0xf0]  ;;  %v849_v22 = vor.u32 %v917_v7, %v848_v6  ;;  %v853_v23 = vor.u32 %v913_v12, %v850_v13  ;;  %v909_v25 = vld [vmem:[%s987_s20 + $0x9c] sm:$0xf0]  ;;  %v857_v26 = vor.u32 %v918_v15, %v856_v14  ;;  %v818_v29 = vld [vmem:[%s987_s20 + $0xa0] sm:$0xf0]  ;;  %v380_v1 = vpack.c.b16 %v340_v48, %v340_v48 }
  0x14   : > { %v422_v18 = vsel %vm420_vm0, %v376_v8, 0  ;;  %v425_v19 = vsel %vm420_vm0, %v377_v9, 0  ;;  %v428_v20 = vsel %vm420_vm0, %v378_v10, 0  ;;  %v431_v21 = vsel %vm420_vm0, %v379_v11, 0  ;;  %v824_v30 = vld [vmem:[%s987_s20 + $0x88] sm:$0xf] }
  0x15   : > { %448 = vmatpush.bf16.msra.mxu0 %v422_v18  ;;  %461 = vmatpush.bf16.msra.mxu1 %v425_v19  ;;  %v861_v27 = vor.u32 %v914_v16, %v858_v17  ;;  %v910_v31 = vld [vmem:[%s987_s20 + $0xa4] sm:$0xf0]  ;;  %v906_v32 = vld [vmem:[%s987_s20 + $0x8c] sm:$0xf]  ;;  %v784_v34 = vld [vmem:[%s987_s20 + $0x40] sm:$0xf]  ;;  %v817_v35 = vor.u32 %v909_v25, %v816_v24  ;;  %v821_v36 = vor.u32 %v905_v28, %v818_v29 }
  0x16   : > { %474 = vmatpush.bf16.msra.mxu2 %v428_v20  ;;  %487 = vmatpush.bf16.msra.mxu3 %v431_v21  ;;  %v826_v33 = vld [vmem:[%s987_s20 + $0xa8] sm:$0xf0]  ;;  %v901_v37 = vld [vmem:[%s987_s20 + $0x5c] sm:$0xf0]  ;;  %v897_v38 = vld [vmem:[%s987_s20 + $0x44] sm:$0xf]  ;;  %v825_v40 = vor.u32 %v910_v31, %v824_v30  ;;  %v381_v2 = vpack.c.b16 %v341_v49, %v341_v49 }
  0x17   : > { %v786_v39 = vld [vmem:[%s987_s20 + $0x60] sm:$0xf0]  ;;  %v829_v41 = vor.u32 %v906_v32, %v826_v33  ;;  %v792_v42 = vld [vmem:[%s987_s20 + $0x48] sm:$0xf]  ;;  %v898_v44 = vld [vmem:[%s987_s20 + $0x4c] sm:$0xf]  ;;  %v785_v50 = vor.u32 %v901_v37, %v784_v34 }
  0x18   : > { %v902_v43 = vld [vmem:[%s987_s20 + $0x64] sm:$0xf0]  ;;  %v794_v45 = vld [vmem:[%s987_s20 + $0x68] sm:$0xf0]  ;;  %v235_v47 = vld [vmem:[%s987_s20 + $0x118] sm:$0xff]  ;;  %v789_v51 = vor.u32 %v897_v38, %v786_v39  ;;  %v434_v12 = vsel %vm420_vm0, %v380_v1, 0 }
  0x19   : > { %449 = vmatpush.bf16.msra.mxu0 %v849_v22  ;;  %462 = vmatpush.bf16.msra.mxu1 %v853_v23  ;;  %v752_v52 = vld [vmem:[%s987_s20] sm:$0xf]  ;;  %v342_v54 = vunpack.c.l.b16 %v235_v47  ;;  %v343_v55 = vunpack.c.h.b16 %v235_v47  ;;  %v793_v56 = vor.u32 %v902_v43, %v792_v42  ;;  %v797_v57 = vor.u32 %v898_v44, %v794_v45  ;;  %v889_v58 = vld [vmem:[%s987_s20 + $0x4] sm:$0xf]  ;;  %v760_v60 = vld [vmem:[%s987_s20 + $0x8] sm:$0xf] }
  0x1a   : > { %475 = vmatpush.bf16.msra.mxu2 %v857_v26  ;;  %488 = vmatpush.bf16.msra.mxu3 %v861_v27  ;;  %v893_v53 = vld [vmem:[%s987_s20 + $0x1c] sm:$0xf0]  ;;  %v754_v59 = vld [vmem:[%s987_s20 + $0x20] sm:$0xf0]  ;;  %v894_v61 = vld [vmem:[%s987_s20 + $0x24] sm:$0xf0] }
  0x1b   : > { %v890_v62 = vld [vmem:[%s987_s20 + $0xc] sm:$0xf]  ;;  %v753_v0 = vor.u32 %v893_v53, %v752_v52  ;;  %v757_v3 = vor.u32 %v889_v58, %v754_v59  ;;  %v382_v4 = vpack.c.b16 %v342_v54, %v342_v54  ;;  %v383_v5 = vpack.c.b16 %v343_v55, %v343_v55  ;;  %v864_v8 = vld [vmem:[%s987_s20 + $0xd0] sm:$0xf]  ;;  %v915_v10 = vld [vmem:[%s987_s20 + $0xd4] sm:$0xf] }
  0x1c   : > { %v762_v63 = vld [vmem:[%s987_s20 + $0x28] sm:$0xf0]  ;;  %v761_v6 = vor.u32 %v894_v61, %v760_v60  ;;  %v919_v9 = vld [vmem:[%s987_s20 + $0xec] sm:$0xf0]  ;;  %v866_v11 = vld [vmem:[%s987_s20 + $0xf0] sm:$0xf0] }
  0x1d   : > { %450 = vmatpush.bf16.msra.mxu0 %v817_v35  ;;  %463 = vmatpush.bf16.msra.mxu1 %v821_v36  ;;  %v765_v7 = vor.u32 %v890_v62, %v762_v63  ;;  %v437_v13 = vsel %vm420_vm0, %v381_v2, 0  ;;  %v872_v14 = vld [vmem:[%s987_s20 + $0xd8] sm:$0xf]  ;;  %v440_v16 = vsel %vm420_vm0, %v382_v4, 0  ;;  %v443_v17 = vsel %vm420_vm0, %v383_v5, 0 }
  0x1e   : > { %476 = vmatpush.bf16.msra.mxu2 %v825_v40  ;;  %489 = vmatpush.bf16.msra.mxu3 %v829_v41  ;;  %v920_v15 = vld [vmem:[%s987_s20 + $0xf4] sm:$0xf0]  ;;  %v916_v18 = vld [vmem:[%s987_s20 + $0xdc] sm:$0xf]  ;;  %v1044_v20 = vld [vmem:[%s1119_s0] sm:$0x3]  ;;  %v865_v21 = vor.u32 %v919_v9, %v864_v8  ;;  %v869_v22 = vor.u32 %v915_v10, %v866_v11 }
  0x1f   : > { %v874_v19 = vld [vmem:[%s987_s20 + $0xf8] sm:$0xf0]  ;;  %v832_v23 = vld [vmem:[%s987_s20 + $0x90] sm:$0xf]  ;;  %v873_v25 = vor.u32 %v920_v15, %v872_v14  ;;  %v907_v27 = vld [vmem:[%s987_s20 + $0x94] sm:$0xf] }
  0x20   : > { %v911_v24 = vld [vmem:[%s987_s20 + $0xac] sm:$0xf0]  ;;  %v877_v26 = vor.u32 %v916_v18, %v874_v19  ;;  %v834_v28 = vld [vmem:[%s987_s20 + $0xb0] sm:$0xf0]  ;;  %v840_v29 = vld [vmem:[%s987_s20 + $0x98] sm:$0xf] }
  0x21   : > { %451 = vmatpush.bf16.msra.mxu0 %v785_v50  ;;  %464 = vmatpush.bf16.msra.mxu1 %v789_v51  ;;  %v912_v30 = vld [vmem:[%s987_s20 + $0xb4] sm:$0xf0]  ;;  %v908_v31 = vld [vmem:[%s987_s20 + $0x9c] sm:$0xf]  ;;  %v833_v33 = vor.u32 %v911_v24, %v832_v23  ;;  %v837_v34 = vor.u32 %v907_v27, %v834_v28  ;;  %v800_v35 = vld [vmem:[%s987_s20 + $0x50] sm:$0xf] }
  0x22   : > { %477 = vmatpush.bf16.msra.mxu2 %v793_v56  ;;  %490 = vmatpush.bf16.msra.mxu3 %v797_v57  ;;  %v842_v32 = vld [vmem:[%s987_s20 + $0xb8] sm:$0xf0]  ;;  %v903_v36 = vld [vmem:[%s987_s20 + $0x6c] sm:$0xf0]  ;;  %v841_v37 = vor.u32 %v912_v30, %v840_v29  ;;  %v899_v39 = vld [vmem:[%s987_s20 + $0x54] sm:$0xf] }
  0x23   : > { %v845_v38 = vor.u32 %v908_v31, %v842_v32  ;;  %v802_v40 = vld [vmem:[%s987_s20 + $0x70] sm:$0xf0]  ;;  %v808_v41 = vld [vmem:[%s987_s20 + $0x58] sm:$0xf]  ;;  %v900_v43 = vld [vmem:[%s987_s20 + $0x5c] sm:$0xf]  ;;  %v801_v45 = vor.u32 %v903_v36, %v800_v35 }
  0x24   : > { %v904_v42 = vld [vmem:[%s987_s20 + $0x74] sm:$0xf0]  ;;  %v810_v44 = vld [vmem:[%s987_s20 + $0x78] sm:$0xf0]  ;;  %v805_v46 = vor.u32 %v899_v39, %v802_v40  ;;  %v768_v47 = vld [vmem:[%s987_s20 + $0x10] sm:$0xf] }
  0x25   : > { %452 = vmatpush.bf16.msra.mxu0 %v753_v0  ;;  %465 = vmatpush.bf16.msra.mxu1 %v757_v3  ;;  %v895_v48 = vld [vmem:[%s987_s20 + $0x2c] sm:$0xf0]  ;;  %v809_v49 = vor.u32 %v904_v42, %v808_v41  ;;  %v813_v50 = vor.u32 %v900_v43, %v810_v44  ;;  %v891_v51 = vld [vmem:[%s987_s20 + $0x14] sm:$0xf]  ;;  %v776_v53 = vld [vmem:[%s987_s20 + $0x18] sm:$0xf] }
  0x26   : > { %478 = vmatpush.bf16.msra.mxu2 %v761_v6  ;;  %491 = vmatpush.bf16.msra.mxu3 %v765_v7  ;;  %v770_v52 = vld [vmem:[%s987_s20 + $0x30] sm:$0xf0]  ;;  %v896_v54 = vld [vmem:[%s987_s20 + $0x34] sm:$0xf0]  ;;  %v892_v55 = vld [vmem:[%s987_s20 + $0x1c] sm:$0xf]  ;;  %v769_v57 = vor.u32 %v895_v48, %v768_v47 }
  0x27   : > { %v778_v56 = vld [vmem:[%s987_s20 + $0x38] sm:$0xf0]  ;;  %v773_v58 = vor.u32 %v891_v51, %v770_v52  ;;  %v777_v59 = vor.u32 %v896_v54, %v776_v53  ;;  %v946_v28 = vmov 1024.0   ;;  %v641_v36 = vld [vmem:[%s1121_s2] sm:$0xf] }
  0x28   : > { %878 = vmatmul.msk.bf16.vlgmr.msra.gmra.mxu0 %vm416_vm1, %v1044_v20  ;;  %879 = vmatmul.msk.bf16.vlgmr.msra.gmra.mxu1 %vm416_vm1, %v1044_v20  ;;  %v781_v60 = vor.u32 %v892_v55, %v778_v56  ;;  %934 = vrcp.f32 %v946_v28 }
  0x29   : > { %500 = vmatpush.bf16.msrb.mxu0 %v434_v12  ;;  %513 = vmatpush.bf16.msrb.mxu1 %v437_v13 }
  0x2a   : > { %526 = vmatpush.bf16.msrb.mxu2 %v440_v16  ;;  %539 = vmatpush.bf16.msrb.mxu3 %v443_v17 }
  0x2b   : > { %880 = vmatmul.msk.bf16.vlgmr.msra.gmra.mxu2 %vm416_vm1, %v1044_v20  ;;  %881 = vmatmul.msk.bf16.vlgmr.msra.gmra.mxu3 %vm416_vm1, %v1044_v20 }
  0x2d   : > { %501 = vmatpush.bf16.msrb.mxu0 %v865_v21  ;;  %514 = vmatpush.bf16.msrb.mxu1 %v869_v22 }
  0x2e   : > { %527 = vmatpush.bf16.msrb.mxu2 %v873_v25  ;;  %540 = vmatpush.bf16.msrb.mxu3 %v877_v26  ;;  %v935_v29 = vpop.eup %934 }
  0x2f   : > { %v567_v30 = vmul.f32 1024.0, %v935_v29  ;;  %vm571_vm2 = vweird.f32 %v935_v29 }
  0x31   : > { %502 = vmatpush.bf16.msrb.mxu0 %v833_v33  ;;  %515 = vmatpush.bf16.msrb.mxu1 %v837_v34  ;;  %v568_v31 = vsub.f32 1.0, %v567_v30  ;;  %v627_v33 = vld [vmem:[%s1120_s1] sm:$0xf]  ;;  %v947_v34 = vmov 0  }
  0x32   : > { %528 = vmatpush.bf16.msrb.mxu2 %v841_v37  ;;  %541 = vmatpush.bf16.msrb.mxu3 %v845_v38 }
  0x33   : > { %v569_v32 = vmul.f32 %v935_v29, %v568_v31  ;;  %932 = vset.pattern.permute.xlu1 %v947_v34  ;;  %933 = vset.pattern.permute.xlu0 %v947_v34 }
  0x34   : > { %630 = vperm.xlu1 %932, %v627_v33  }
  0x35   : > { %503 = vmatpush.bf16.msrb.mxu0 %v801_v45  ;;  %516 = vmatpush.bf16.msrb.mxu1 %v805_v46  ;;  %v570_v35 = vadd.f32 %v935_v29, %v569_v32 }
  0x36   : > { %529 = vmatpush.bf16.msrb.mxu2 %v809_v49  ;;  %542 = vmatpush.bf16.msrb.mxu3 %v813_v50 }
  0x37   : > { %v572_v37 = vsel %vm571_vm2, %v935_v29, %v570_v35 }
  0x39   : > { %504 = vmatpush.bf16.msrb.mxu0 %v769_v57  ;;  %517 = vmatpush.bf16.msrb.mxu1 %v773_v58 }
  0x3a   : > { %530 = vmatpush.bf16.msrb.mxu2 %v777_v59  ;;  %543 = vmatpush.bf16.msrb.mxu3 %v781_v60 }
  0x3c   : > { %882 = vmatmul.msk.bf16.vlgmr.msrb.gmra.mxu0 %vm416_vm1, %v1044_v20  ;;  %883 = vmatmul.msk.bf16.vlgmr.msrb.gmra.mxu1 %vm416_vm1, %v1044_v20 }
  0x3d   : > { %884 = vmatmul.msk.bf16.vlgmr.msrb.gmra.mxu2 %vm416_vm1, %v1044_v20  ;;  %885 = vmatmul.msk.bf16.vlgmr.msrb.gmra.mxu3 %vm416_vm1, %v1044_v20 }
  0x3e   : > { %644 = vperm.xlu1 %932, %v641_v36  }
  0xa5   : > { %v454_v61 = vpop.f32.mrf.mxu0  ;;  %v467_v62 = vpop.f32.mrf.mxu1 }
  0xa6   : > { %v549_v63 = vsel %vm420_vm0, %v454_v61, 0.0  ;;  %v550_v0 = vsel %vm420_vm0, %v467_v62, 0.0 }
  0xa7   : > { %v551_v5 = vadd.f32 %v550_v0, %v549_v63 }
  0xad   : > { %v456_v3 = vpop.f32.mrf.mxu0  ;;  %v469_v4 = vpop.f32.mrf.mxu1 }
  0xae   : > { %v480_v1 = vpop.f32.mrf.mxu2  ;;  %v493_v2 = vpop.f32.mrf.mxu3 }
  0xaf   : > { %v552_v6 = vsel %vm420_vm0, %v480_v1, 0.0  ;;  %v554_v8 = vsel %vm420_vm0, %v493_v2, 0.0 }
  0xb0   : > { %v553_v7 = vadd.f32 %v552_v6, %v551_v5 }
  0xb2   : > { %v555_v13 = vadd.f32 %v554_v8, %v553_v7 }
  0xb6   : > { %v482_v9 = vpop.f32.mrf.mxu2  ;;  %v495_v10 = vpop.f32.mrf.mxu3 }
  0xb9   : > { %v506_v11 = vpop.f32.mrf.mxu0  ;;  %v519_v12 = vpop.f32.mrf.mxu1 }
  0xba   : > { %v556_v14 = vsel %vm420_vm0, %v506_v11, 0.0  ;;  %v558_v16 = vsel %vm420_vm0, %v519_v12, 0.0 }
  0xbb   : > { %v557_v15 = vadd.f32 %v556_v14, %v555_v13  ;;  %v631_v14 = vpop.permute.xlu1 %630 }
  0xbd   : > { %v559_v17 = vadd.f32 %v558_v16, %v557_v15 }
  0xc0   : > { %v532_v18 = vpop.f32.mrf.mxu2  ;;  %v545_v19 = vpop.f32.mrf.mxu3 }
  0xc1   : > { %v560_v20 = vsel %vm420_vm0, %v532_v18, 0.0  ;;  %v508_v21 = vpop.f32.mrf.mxu0  ;;  %v521_v22 = vpop.f32.mrf.mxu1  ;;  %v562_v23 = vsel %vm420_vm0, %v545_v19, 0.0 }
  0xc2   : > { %v561_v24 = vadd.f32 %v560_v20, %v559_v17 }
  0xc3   : > { %v645_v30 = vpop.permute.xlu1 %644 }
  0xc4   : > { %v563_v25 = vadd.f32 %v562_v23, %v561_v24 }
  0xc6   : > { %564 = vadd.xlane.f32.xlu0 %v563_v25 }
  0xc8   : > { %v534_v26 = vpop.f32.mrf.mxu2  ;;  %v547_v27 = vpop.f32.mrf.mxu3 }
 0x139   : > { %v565_v38 = vpop.xlane.xlu0 %564 }
 0x13a   : > { %v573_v39 = vmul.f32 %v572_v37, %v565_v38 }
 0x13c   : > { %v574_v40 = vsub.f32 %v454_v61, %v573_v39  ;;  %v575_v41 = vsub.f32 %v467_v62, %v573_v39  ;;  %v576_v42 = vsub.f32 %v480_v1, %v573_v39  ;;  %v577_v43 = vsub.f32 %v493_v2, %v573_v39 }
 0x13d   : > { %v578_v44 = vsub.f32 %v506_v11, %v573_v39  ;;  %v579_v48 = vsub.f32 %v519_v12, %v573_v39  ;;  %v580_v53 = vsub.f32 %v532_v18, %v573_v39  ;;  %v581_v57 = vsub.f32 %v545_v19, %v573_v39 }
 0x13e   : > { %v582_v45 = vmul.f32 %v574_v40, %v574_v40  ;;  %v583_v46 = vmul.f32 %v575_v41, %v575_v41  ;;  %v584_v47 = vmul.f32 %v576_v42, %v576_v42  ;;  %v585_v49 = vmul.f32 %v577_v43, %v577_v43 }
 0x13f   : > { %v586_v54 = vmul.f32 %v578_v44, %v578_v44  ;;  %v587_v58 = vmul.f32 %v579_v48, %v579_v48  ;;  %v588_v61 = vmul.f32 %v580_v53, %v580_v53  ;;  %v589_v0 = vmul.f32 %v581_v57, %v581_v57 }
 0x140   : > { %v590_v50 = vsel %vm420_vm0, %v582_v45, 0.0  ;;  %v591_v51 = vsel %vm420_vm0, %v583_v46, 0.0  ;;  %v593_v55 = vsel %vm420_vm0, %v584_v47, 0.0  ;;  %v595_v59 = vsel %vm420_vm0, %v585_v49, 0.0 }
 0x141   : > { %v592_v52 = vadd.f32 %v591_v51, %v590_v50  ;;  %v597_v62 = vsel %vm420_vm0, %v586_v54, 0.0  ;;  %v599_v1 = vsel %vm420_vm0, %v587_v58, 0.0  ;;  %v601_v3 = vsel %vm420_vm0, %v588_v61, 0.0 }
 0x142   : > { %v603_v5 = vsel %vm420_vm0, %v589_v0, 0.0 }
 0x143   : > { %v594_v56 = vadd.f32 %v593_v55, %v592_v52 }
 0x145   : > { %v596_v60 = vadd.f32 %v595_v59, %v594_v56 }
 0x147   : > { %v598_v63 = vadd.f32 %v597_v62, %v596_v60 }
 0x149   : > { %v600_v2 = vadd.f32 %v599_v1, %v598_v63 }
 0x14b   : > { %v602_v4 = vadd.f32 %v601_v3, %v600_v2 }
 0x14d   : > { %v604_v6 = vadd.f32 %v603_v5, %v602_v4 }
 0x14f   : > { %605 = vadd.xlane.f32.xlu0 %v604_v6 }
 0x1c2   : > { %v606_v7 = vpop.xlane.xlu0 %605 }
 0x1c3   : > { %v607_v8 = vmul.f32 %v606_v7, %v572_v37 }
 0x1c5   : > { %v608_v9 = vadd.f32 1e-05, %v607_v8 }
 0x1c7   : > { %936 = vrsqrt.f32 %v608_v9  ;;  %vm615_vm4 = vweird.f32 %v608_v9 }
 0x1cd   : > { %v937_v10 = vpop.eup %936 }
 0x1ce   : > { %v610_v11 = vmul.f32 %v937_v10, %v608_v9  ;;  %vm616_vm3 = vweird.f32 %v937_v10 }
 0x1cf   : > { %vm617_vm5 = vmor %vm615_vm4, %vm616_vm3 }
 0x1d0   : > { %v611_v12 = vmul.f32 %v937_v10, %v610_v11 }
 0x1d2   : > { %v612_v13 = vmul.f32 0.5, %v611_v12 }
 0x1d4   : > { %v613_v15 = vsub.f32 1.5, %v612_v13 }
 0x1d6   : > { %v614_v16 = vmul.f32 %v937_v10, %v613_v15 }
 0x1d8   : > { %v618_v17 = vsel %vm617_vm5, %v937_v10, %v614_v16 }
 0x1d9   : > { %v619_v18 = vmul.f32 %v618_v17, %v574_v40  ;;  %v620_v19 = vmul.f32 %v618_v17, %v575_v41  ;;  %v621_v20 = vmul.f32 %v618_v17, %v576_v42  ;;  %v622_v21 = vmul.f32 %v618_v17, %v577_v43 }
 0x1da   : > { %v623_v22 = vmul.f32 %v618_v17, %v578_v44  ;;  %v624_v23 = vmul.f32 %v618_v17, %v579_v48  ;;  %v625_v24 = vmul.f32 %v618_v17, %v580_v53  ;;  %v626_v25 = vmul.f32 %v618_v17, %v581_v57 }
 0x1db   : > { %v633_v26 = vmul.f32 %v631_v14, %v619_v18  ;;  %v634_v27 = vmul.f32 %v631_v14, %v620_v19  ;;  %v635_v28 = vmul.f32 %v631_v14, %v621_v20  ;;  %v636_v29 = vmul.f32 %v631_v14, %v622_v21 }
 0x1dc   : > { %v637_v31 = vmul.f32 %v631_v14, %v623_v22  ;;  %v638_v32 = vmul.f32 %v631_v14, %v624_v23  ;;  %v639_v33 = vmul.f32 %v631_v14, %v625_v24  ;;  %v640_v34 = vmul.f32 %v631_v14, %v626_v25 }
 0x1dd   : > { %v647_v35 = vadd.f32 %v645_v30, %v633_v26  ;;  %v648_v36 = vadd.f32 %v645_v30, %v634_v27  ;;  %v649_v37 = vadd.f32 %v645_v30, %v635_v28  ;;  %v650_v38 = vadd.f32 %v645_v30, %v636_v29 }
 0x1de   : > { %v651_v39 = vadd.f32 %v645_v30, %v637_v31  ;;  %v652_v40 = vadd.f32 %v645_v30, %v638_v32  ;;  %v653_v41 = vadd.f32 %v645_v30, %v639_v33  ;;  %v654_v42 = vadd.f32 %v645_v30, %v640_v34 }
 0x1df   : > { %v656_v43 = vmax.f32 %v648_v36, 0.0  ;;  %v658_v44 = vmax.f32 %v650_v38, 0.0  ;;  %v655_v47 = vmax.f32 %v647_v35, 0.0  ;;  %v657_v48 = vmax.f32 %v649_v37, 0.0 }
 0x1e0   : > { %v660_v45 = vmax.f32 %v652_v40, 0.0  ;;  %v662_v46 = vmax.f32 %v654_v42, 0.0  ;;  %v659_v51 = vmax.f32 %v651_v39, 0.0  ;;  %v661_v52 = vmax.f32 %v653_v41, 0.0 }
 0x1e1   : > { %v671_v49 = vrot.slane %v656_v43, 4  ;;  %v672_v50 = vrot.slane %v658_v44, 4 }
 0x1e2   : > { %v673_v53 = vrot.slane %v660_v45, 4  ;;  %v674_v54 = vrot.slane %v662_v46, 4 }
 0x1e3   : > { %v675_v55 = vsel %vm420_vm0, %v655_v47, %v671_v49  ;;  %v676_v56 = vsel %vm420_vm0, %v657_v48, %v672_v50 }
 0x1e4   : > { %v677_v57 = vsel %vm420_vm0, %v659_v51, %v673_v53  ;;  %v678_v58 = vsel %vm420_vm0, %v661_v52, %v674_v54  ;;  %683 = vst [vmem:[%s197_s30] sm:$0xff] %v675_v55 }
 0x1e5   : > { %684 = vst [vmem:[%s197_s30 + $0x8] sm:$0xff] %v676_v56 }
 0x1e6   : > { %685 = vst [vmem:[%s197_s30 + $0x10] sm:$0xff] %v677_v57 }
 0x1e7   : > { %686 = vst [vmem:[%s197_s30 + $0x18] sm:$0xff] %v678_v58 }
 0x1e8 PF: > { %s14_s15 = sadd.s32 1, %s944_s15  }
 0x1e9   : > { %p11_p4 = scmp.ge.s32.totalorder %s14_s15, 4  }
 0x1eb   :  { %13 = sbr.rel (!%p11_p4) target bundleno = 1 (0x1), region = 66 }

// kernel: generator_forward.14
= control target key start
LH: loop header
LB: loop body
LE: loop exit
PB: predicated region body
PF: predicated region fallthrough
CT: control target
= control target key end

     0   :  { %s2119_s15 = smov 0   ;;  %s2872_s0 = inlined_call_operand.vmem [shape: bf16[2,36], index: 0, kind: input, shape index: {}]   ;;  %s2873_s1 = inlined_call_operand.vmem [shape: f32[2,1], index: 1, kind: input, shape index: {}]   ;;  %s2874_s2 = inlined_call_operand.vmem [shape: f32[2,1], index: 2, kind: input, shape index: {}]   ;;  %s2875_s3 = inlined_call_operand.vmem [shape: bf16[2,36,4096], index: 3, kind: input, shape index: {}]   ;;  %s2876_s4 = inlined_call_operand.vmem [shape: f32[2,2,4096], index: 4, kind: output, shape index: {}]  }
   0x1 LB: > { %s1704_s16 = sadd.s32 4294967295, %s2090_s15   ;;  %p1708_p0 = scmp.ge.s32.totalorder %s2090_s15, 1  ;;  %s2090_s15 = sphi %s2119_s15, %s14_s15  }
   0x2   : > { %p162_p1 = scmp.lt.s32.totalorder %s2090_s15, 3 }
   0x4   : > { %p163_p2 = pnand %p1708_p0, %p162_p1 }
   0x5   : > { %p188_p3 = scmp.lt.s32.totalorder (!%p163_p2), %s1704_s16, 1 }
   0x6   : > { %166 = sbr.rel (%p163_p2) target bundleno = 653 (0x28d), region = 36 }
   0xb   : > { %s2878_s16 = smov (!%p188_p3, %s1704_s16), 1  ;;  %vm684_vm0 = vcmask 1041408   ;;  %v2170_v56 = vld [vmem:[%s2872_s0] sm:$0x1]  ;;  %vm680_vm1 = vcmask 293888   ;;  %vm1608_vm6 = vcmask 1045508  }
   0xc   : > { %s2067_s17 = smul.u32 640, %s2878_s16  ;;  %vm1610_vm7 = vcmask 1043456   ;;  %s2002_s27 = sshll.u32 %s2878_s16, 6 }
   0xd   : > { %s2835_s30 = scalar_lea.vmem %s2876_s4, %s2002_s27 }
   0xe   : > { %s2133_s20 = scalar_lea.vmem %s2875_s3, %s2067_s17 }
   0xf   : > { %v264_v0 = vld [vmem:[%s2133_s20 + $0x200] sm:$0x33]  ;;  %v265_v1 = vld [vmem:[%s2133_s20 + $0x208] sm:$0x33]  ;;  %v267_v27 = vld [vmem:[%s2133_s20 + $0x218] sm:$0x33] }
  0x10   : > { %v488_v2 = vunpack.c.l.b16 %v264_v0  ;;  %v489_v3 = vunpack.c.h.b16 %v264_v0  ;;  %v490_v4 = vunpack.c.l.b16 %v265_v1  ;;  %v491_v5 = vunpack.c.h.b16 %v265_v1  ;;  %v1842_v6 = vld [vmem:[%s2133_s20 + $0x100] sm:$0xf]  ;;  %v2035_v12 = vld [vmem:[%s2133_s20 + $0x104] sm:$0xf]  ;;  %v1850_v14 = vld [vmem:[%s2133_s20 + $0x108] sm:$0xf] }
  0x11   : > { %v2051_v7 = vld [vmem:[%s2133_s20 + $0x17c] sm:$0xf0]  ;;  %v1844_v13 = vld [vmem:[%s2133_s20 + $0x180] sm:$0xf0]  ;;  %v2052_v15 = vld [vmem:[%s2133_s20 + $0x184] sm:$0xf0]  ;;  %v494_v32 = vunpack.c.l.b16 %v267_v27  ;;  %v495_v38 = vunpack.c.h.b16 %v267_v27 }
  0x12   : > { %v584_v8 = vpack.c.b16 %v488_v2, %v488_v2  ;;  %v585_v9 = vpack.c.b16 %v489_v3, %v489_v3  ;;  %v586_v10 = vpack.c.b16 %v490_v4, %v490_v4  ;;  %v587_v11 = vpack.c.b16 %v491_v5, %v491_v5  ;;  %v2036_v16 = vld [vmem:[%s2133_s20 + $0x10c] sm:$0xf]  ;;  %v1714_v22 = vld [vmem:[%s2133_s20] sm:$0xf]  ;;  %v2003_v26 = vld [vmem:[%s2133_s20 + $0x4] sm:$0xf] }
  0x13   : > { %v1852_v17 = vld [vmem:[%s2133_s20 + $0x188] sm:$0xf0]  ;;  %v1843_v23 = vor.u32 %v2051_v7, %v1842_v6  ;;  %v1847_v24 = vor.u32 %v2035_v12, %v1844_v13  ;;  %v2019_v25 = vld [vmem:[%s2133_s20 + $0x7c] sm:$0xf0]  ;;  %v1851_v28 = vor.u32 %v2052_v15, %v1850_v14  ;;  %v1716_v30 = vld [vmem:[%s2133_s20 + $0x80] sm:$0xf0]  ;;  %v590_v40 = vpack.c.b16 %v494_v32, %v494_v32 }
  0x14   : > { %v686_v18 = vsel %vm684_vm0, %v584_v8, 0  ;;  %v689_v19 = vsel %vm684_vm0, %v585_v9, 0  ;;  %v692_v20 = vsel %vm684_vm0, %v586_v10, 0  ;;  %v695_v21 = vsel %vm684_vm0, %v587_v11, 0  ;;  %v1722_v31 = vld [vmem:[%s2133_s20 + $0x8] sm:$0xf] }
  0x15   : > { %786 = vmatpush.bf16.msra.mxu0 %v686_v18  ;;  %799 = vmatpush.bf16.msra.mxu1 %v689_v19  ;;  %v1855_v29 = vor.u32 %v2036_v16, %v1852_v17  ;;  %v266_v33 = vld [vmem:[%s2133_s20 + $0x210] sm:$0x33]  ;;  %v2020_v34 = vld [vmem:[%s2133_s20 + $0x84] sm:$0xf0]  ;;  %v2004_v35 = vld [vmem:[%s2133_s20 + $0xc] sm:$0xf]  ;;  %v1715_v41 = vor.u32 %v2019_v25, %v1714_v22  ;;  %v1719_v42 = vor.u32 %v2003_v26, %v1716_v30 }
  0x16   : > { %812 = vmatpush.bf16.msra.mxu2 %v692_v20  ;;  %825 = vmatpush.bf16.msra.mxu3 %v695_v21  ;;  %v1724_v36 = vld [vmem:[%s2133_s20 + $0x88] sm:$0xf0]  ;;  %v492_v37 = vunpack.c.l.b16 %v266_v33  ;;  %v493_v39 = vunpack.c.h.b16 %v266_v33  ;;  %v1723_v44 = vor.u32 %v2020_v34, %v1722_v31  ;;  %v1866_v46 = vld [vmem:[%s2133_s20 + $0x118] sm:$0xf]  ;;  %v591_v47 = vpack.c.b16 %v495_v38, %v495_v38  ;;  %v1858_v50 = vld [vmem:[%s2133_s20 + $0x110] sm:$0xf] }
  0x17   : > { %v1727_v45 = vor.u32 %v2004_v35, %v1724_v36  ;;  %v2054_v49 = vld [vmem:[%s2133_s20 + $0x194] sm:$0xf0]  ;;  %v2053_v51 = vld [vmem:[%s2133_s20 + $0x18c] sm:$0xf0]  ;;  %v704_v52 = vsel %vm684_vm0, %v590_v40, 0 }
  0x18   : > { %v588_v43 = vpack.c.b16 %v492_v37, %v492_v37  ;;  %v589_v48 = vpack.c.b16 %v493_v39, %v493_v39  ;;  %v269_v54 = vld [vmem:[%s2133_s20 + $0x228] sm:$0x33]  ;;  %v268_v55 = vld [vmem:[%s2133_s20 + $0x220] sm:$0x33]  ;;  %v2038_v59 = vld [vmem:[%s2133_s20 + $0x11c] sm:$0xf]  ;;  %v1867_v0 = vor.u32 %v2054_v49, %v1866_v46  ;;  %v1859_v1 = vor.u32 %v2053_v51, %v1858_v50 }
  0x19   : > { %787 = vmatpush.bf16.msra.mxu0 %v1843_v23  ;;  %800 = vmatpush.bf16.msra.mxu1 %v1847_v24  ;;  %v498_v57 = vunpack.c.l.b16 %v269_v54  ;;  %v496_v58 = vunpack.c.l.b16 %v268_v55  ;;  %v1868_v60 = vld [vmem:[%s2133_s20 + $0x198] sm:$0xf0]  ;;  %v2037_v61 = vld [vmem:[%s2133_s20 + $0x114] sm:$0xf]  ;;  %v707_v62 = vsel %vm684_vm0, %v591_v47, 0  ;;  %v499_v7 = vunpack.c.h.b16 %v269_v54 }
  0x1a   : > { %813 = vmatpush.bf16.msra.mxu2 %v1851_v28  ;;  %826 = vmatpush.bf16.msra.mxu3 %v1855_v29  ;;  %v698_v53 = vsel %vm684_vm0, %v588_v43, 0  ;;  %v701_v63 = vsel %vm684_vm0, %v589_v48, 0  ;;  %v1860_v2 = vld [vmem:[%s2133_s20 + $0x190] sm:$0xf0]  ;;  %v1738_v3 = vld [vmem:[%s2133_s20 + $0x18] sm:$0xf]  ;;  %v497_v8 = vunpack.c.h.b16 %v268_v55  ;;  %v1871_v11 = vor.u32 %v2038_v59, %v1868_v60 }
  0x1b   : > { %v2022_v4 = vld [vmem:[%s2133_s20 + $0x94] sm:$0xf0]  ;;  %v1730_v5 = vld [vmem:[%s2133_s20 + $0x10] sm:$0xf]  ;;  %v594_v9 = vpack.c.b16 %v498_v57, %v498_v57  ;;  %v592_v10 = vpack.c.b16 %v496_v58, %v496_v58  ;;  %v1863_v12 = vor.u32 %v2037_v61, %v1860_v2  ;;  %v2005_v13 = vld [vmem:[%s2133_s20 + $0x14] sm:$0xf]  ;;  %v595_v19 = vpack.c.b16 %v499_v7, %v499_v7 }
  0x1c   : > { %v2021_v6 = vld [vmem:[%s2133_s20 + $0x8c] sm:$0xf0]  ;;  %v1739_v14 = vor.u32 %v2022_v4, %v1738_v3  ;;  %v1732_v16 = vld [vmem:[%s2133_s20 + $0x90] sm:$0xf0]  ;;  %v2006_v17 = vld [vmem:[%s2133_s20 + $0x1c] sm:$0xf]  ;;  %v593_v20 = vpack.c.b16 %v497_v8, %v497_v8 }
  0x1d   : > { %788 = vmatpush.bf16.msra.mxu0 %v1715_v41  ;;  %801 = vmatpush.bf16.msra.mxu1 %v1719_v42  ;;  %v1731_v15 = vor.u32 %v2021_v6, %v1730_v5  ;;  %v1740_v18 = vld [vmem:[%s2133_s20 + $0x98] sm:$0xf0]  ;;  %v1882_v21 = vld [vmem:[%s2133_s20 + $0x128] sm:$0xf]  ;;  %v716_v23 = vsel %vm684_vm0, %v594_v9, 0  ;;  %v710_v24 = vsel %vm684_vm0, %v592_v10, 0  ;;  %v1735_v27 = vor.u32 %v2005_v13, %v1732_v16 }
  0x1e   : > { %814 = vmatpush.bf16.msra.mxu2 %v1723_v44  ;;  %827 = vmatpush.bf16.msra.mxu3 %v1727_v45  ;;  %v2056_v22 = vld [vmem:[%s2133_s20 + $0x1a4] sm:$0xf0]  ;;  %v1874_v25 = vld [vmem:[%s2133_s20 + $0x120] sm:$0xf]  ;;  %v1743_v28 = vor.u32 %v2006_v17, %v1740_v18  ;;  %v271_v29 = vld [vmem:[%s2133_s20 + $0x238] sm:$0x33] }
  0x1f   : > { %v2055_v26 = vld [vmem:[%s2133_s20 + $0x19c] sm:$0xf0]  ;;  %v270_v30 = vld [vmem:[%s2133_s20 + $0x230] sm:$0x33]  ;;  %v2040_v31 = vld [vmem:[%s2133_s20 + $0x12c] sm:$0xf]  ;;  %v1883_v35 = vor.u32 %v2056_v22, %v1882_v21  ;;  %v502_v39 = vunpack.c.l.b16 %v271_v29  ;;  %v503_v43 = vunpack.c.h.b16 %v271_v29 }
  0x20   : > { %1968 = vmatmul.msk.bf16.vlgmr.msra.gmra.mxu0 %vm680_vm1, %v2170_v56  ;;  %1969 = vmatmul.msk.bf16.vlgmr.msra.gmra.mxu1 %vm680_vm1, %v2170_v56  ;;  %v1884_v32 = vld [vmem:[%s2133_s20 + $0x1a8] sm:$0xf0]  ;;  %v719_v33 = vsel %vm684_vm0, %v595_v19, 0  ;;  %v713_v34 = vsel %vm684_vm0, %v593_v20, 0  ;;  %v1875_v36 = vor.u32 %v2055_v26, %v1874_v25  ;;  %v2039_v37 = vld [vmem:[%s2133_s20 + $0x124] sm:$0xf]  ;;  %v500_v40 = vunpack.c.l.b16 %v270_v30 }
  0x21   : > { %838 = vmatpush.bf16.msrb.mxu0 %v698_v53  ;;  %1970 = vmatmul.msk.bf16.vlgmr.msra.gmra.mxu2 %vm680_vm1, %v2170_v56  ;;  %v1876_v38 = vld [vmem:[%s2133_s20 + $0x1a0] sm:$0xf0]  ;;  %v1754_v41 = vld [vmem:[%s2133_s20 + $0x28] sm:$0xf]  ;;  %v501_v44 = vunpack.c.h.b16 %v270_v30  ;;  %v1887_v45 = vor.u32 %v2040_v31, %v1884_v32  ;;  %v1746_v47 = vld [vmem:[%s2133_s20 + $0x20] sm:$0xf]  ;;  %v598_v53 = vpack.c.b16 %v502_v39, %v502_v39  ;;  %v599_v58 = vpack.c.b16 %v503_v43, %v503_v43 }
  0x22   : > { %864 = vmatpush.bf16.msrb.mxu2 %v704_v52  ;;  %1971 = vmatmul.msk.bf16.vlgmr.msra.gmra.mxu3 %vm680_vm1, %v2170_v56  ;;  %v2024_v42 = vld [vmem:[%s2133_s20 + $0xa4] sm:$0xf0]  ;;  %v1879_v46 = vor.u32 %v2039_v37, %v1876_v38  ;;  %v2023_v48 = vld [vmem:[%s2133_s20 + $0x9c] sm:$0xf0]  ;;  %v2007_v49 = vld [vmem:[%s2133_s20 + $0x24] sm:$0xf]  ;;  %v596_v54 = vpack.c.b16 %v500_v40, %v500_v40 }
  0x23   : > { %877 = vmatpush.bf16.msrb.mxu3 %v707_v62  ;;  %851 = vmatpush.bf16.msrb.mxu1 %v701_v63  ;;  %v1748_v50 = vld [vmem:[%s2133_s20 + $0xa0] sm:$0xf0]  ;;  %v2008_v51 = vld [vmem:[%s2133_s20 + $0x2c] sm:$0xf]  ;;  %v1755_v55 = vor.u32 %v2024_v42, %v1754_v41  ;;  %v1747_v57 = vor.u32 %v2023_v48, %v1746_v47  ;;  %v597_v59 = vpack.c.b16 %v501_v44, %v501_v44  ;;  %v1898_v62 = vld [vmem:[%s2133_s20 + $0x138] sm:$0xf] }
  0x24   : > { %v1756_v52 = vld [vmem:[%s2133_s20 + $0xa8] sm:$0xf0]  ;;  %v1751_v60 = vor.u32 %v2007_v49, %v1748_v50  ;;  %v2058_v63 = vld [vmem:[%s2133_s20 + $0x1b4] sm:$0xf0]  ;;  %v728_v2 = vsel %vm684_vm0, %v598_v53, 0  ;;  %v722_v3 = vsel %vm684_vm0, %v596_v54, 0 }
  0x25   : > { %839 = vmatpush.bf16.msrb.mxu0 %v1859_v1  ;;  %v1759_v61 = vor.u32 %v2008_v51, %v1756_v52  ;;  %v2057_v1 = vld [vmem:[%s2133_s20 + $0x1ac] sm:$0xf0]  ;;  %v2042_v4 = vld [vmem:[%s2133_s20 + $0x13c] sm:$0xf]  ;;  %v731_v6 = vsel %vm684_vm0, %v599_v58, 0  ;;  %v725_v7 = vsel %vm684_vm0, %v597_v59, 0 }
  0x26   : > { %865 = vmatpush.bf16.msrb.mxu2 %v1867_v0  ;;  %v1890_v0 = vld [vmem:[%s2133_s20 + $0x130] sm:$0xf]  ;;  %v1900_v5 = vld [vmem:[%s2133_s20 + $0x1b8] sm:$0xf0]  ;;  %v2041_v8 = vld [vmem:[%s2133_s20 + $0x134] sm:$0xf] }
  0x27   : > { %878 = vmatpush.bf16.msrb.mxu3 %v1871_v11  ;;  %852 = vmatpush.bf16.msrb.mxu1 %v1863_v12  ;;  %v1892_v9 = vld [vmem:[%s2133_s20 + $0x1b0] sm:$0xf0]  ;;  %v1770_v10 = vld [vmem:[%s2133_s20 + $0x38] sm:$0xf]  ;;  %v1899_v11 = vor.u32 %v2058_v63, %v1898_v62  ;;  %v1891_v12 = vor.u32 %v2057_v1, %v1890_v0  ;;  %v1903_v16 = vor.u32 %v2042_v4, %v1900_v5  ;;  %v1762_v18 = vld [vmem:[%s2133_s20 + $0x30] sm:$0xf] }
  0x28   : > { %v2026_v13 = vld [vmem:[%s2133_s20 + $0xb4] sm:$0xf0]  ;;  %v1895_v17 = vor.u32 %v2041_v8, %v1892_v9  ;;  %v2025_v19 = vld [vmem:[%s2133_s20 + $0xac] sm:$0xf0]  ;;  %v2009_v20 = vld [vmem:[%s2133_s20 + $0x34] sm:$0xf] }
  0x29   : > { %840 = vmatpush.bf16.msrb.mxu0 %v1731_v15  ;;  %v272_v15 = vld [vmem:[%s2133_s20 + $0x240] sm:$0x33]  ;;  %v1764_v21 = vld [vmem:[%s2133_s20 + $0xb0] sm:$0xf0]  ;;  %v2010_v22 = vld [vmem:[%s2133_s20 + $0x3c] sm:$0xf]  ;;  %v1771_v26 = vor.u32 %v2026_v13, %v1770_v10 }
  0x2a   : > { %866 = vmatpush.bf16.msrb.mxu2 %v1739_v14  ;;  %v273_v14 = vld [vmem:[%s2133_s20 + $0x248] sm:$0x33]  ;;  %v504_v25 = vunpack.c.l.b16 %v272_v15  ;;  %v505_v29 = vunpack.c.h.b16 %v272_v15  ;;  %v1767_v30 = vor.u32 %v2009_v20, %v1764_v21  ;;  %v1906_v38 = vld [vmem:[%s2133_s20 + $0x140] sm:$0xf]  ;;  %v1908_v47 = vld [vmem:[%s2133_s20 + $0x1c0] sm:$0xf0] }
  0x2b   : > { %853 = vmatpush.bf16.msrb.mxu1 %v1735_v27  ;;  %879 = vmatpush.bf16.msrb.mxu3 %v1743_v28  ;;  %v1763_v27 = vor.u32 %v2025_v19, %v1762_v18  ;;  %v507_v28 = vunpack.c.h.b16 %v273_v14  ;;  %v2060_v37 = vld [vmem:[%s2133_s20 + $0x1c4] sm:$0xf0]  ;;  %v2059_v39 = vld [vmem:[%s2133_s20 + $0x1bc] sm:$0xf0]  ;;  %v2044_v42 = vld [vmem:[%s2133_s20 + $0x14c] sm:$0xf] }
  0x2c   : > { %v1916_v43 = vld [vmem:[%s2133_s20 + $0x1c8] sm:$0xf0]  ;;  %v1786_v48 = vld [vmem:[%s2133_s20 + $0x48] sm:$0xf]  ;;  %v1907_v50 = vor.u32 %v2059_v39, %v1906_v38  ;;  %v1778_v52 = vld [vmem:[%s2133_s20 + $0x40] sm:$0xf] }
  0x2d   : > { %890 = vmatpush.bf16.msra.mxu0 %v710_v24  ;;  %v506_v24 = vunpack.c.l.b16 %v273_v14  ;;  %v2028_v51 = vld [vmem:[%s2133_s20 + $0xc4] sm:$0xf0]  ;;  %v2027_v53 = vld [vmem:[%s2133_s20 + $0xbc] sm:$0xf0]  ;;  %v1919_v54 = vor.u32 %v2044_v42, %v1916_v43  ;;  %v1780_v58 = vld [vmem:[%s2133_s20 + $0xc0] sm:$0xf0] }
  0x2e   : > { %916 = vmatpush.bf16.msra.mxu2 %v716_v23  ;;  %v1772_v23 = vld [vmem:[%s2133_s20 + $0xb8] sm:$0xf0]  ;;  %v2012_v59 = vld [vmem:[%s2133_s20 + $0x4c] sm:$0xf]  ;;  %v274_v62 = vld [vmem:[%s2133_s20 + $0x250] sm:$0x33]  ;;  %v1787_v63 = vor.u32 %v2028_v51, %v1786_v48  ;;  %v1779_v0 = vor.u32 %v2027_v53, %v1778_v52 }
  0x2f   : > { %929 = vmatpush.bf16.msra.mxu3 %v719_v33  ;;  %903 = vmatpush.bf16.msra.mxu1 %v713_v34  ;;  %v1775_v31 = vor.u32 %v2010_v22, %v1772_v23  ;;  %v602_v32 = vpack.c.b16 %v506_v24, %v506_v24  ;;  %v600_v33 = vpack.c.b16 %v504_v25, %v504_v25  ;;  %v508_v4 = vunpack.c.l.b16 %v274_v62  ;;  %v1922_v13 = vld [vmem:[%s2133_s20 + $0x150] sm:$0xf]  ;;  %v1932_v18 = vld [vmem:[%s2133_s20 + $0x1d8] sm:$0xf0]  ;;  %v2045_v21 = vld [vmem:[%s2133_s20 + $0x154] sm:$0xf] }
  0x30   : > { %1972 = vmatmul.msk.bf16.vlgmr.msrb.gmra.mxu0 %vm680_vm1, %v2170_v56  ;;  %1973 = vmatmul.msk.bf16.vlgmr.msrb.gmra.mxu1 %vm680_vm1, %v2170_v56  ;;  %v603_v34 = vpack.c.b16 %v507_v28, %v507_v28  ;;  %v2061_v14 = vld [vmem:[%s2133_s20 + $0x1cc] sm:$0xf0]  ;;  %v1924_v22 = vld [vmem:[%s2133_s20 + $0x1d0] sm:$0xf0]  ;;  %v1802_v23 = vld [vmem:[%s2133_s20 + $0x58] sm:$0xf] }
  0x31   : > { %891 = vmatpush.bf16.msra.mxu0 %v1875_v36  ;;  %1974 = vmatmul.msk.bf16.vlgmr.msrb.gmra.mxu2 %vm680_vm1, %v2170_v56  ;;  %v1914_v36 = vld [vmem:[%s2133_s20 + $0x148] sm:$0xf]  ;;  %v740_v40 = vsel %vm684_vm0, %v602_v32, 0  ;;  %v734_v41 = vsel %vm684_vm0, %v600_v33, 0  ;;  %v604_v8 = vpack.c.b16 %v508_v4, %v508_v4  ;;  %v1923_v25 = vor.u32 %v2061_v14, %v1922_v13  ;;  %v2029_v28 = vld [vmem:[%s2133_s20 + $0xcc] sm:$0xf0] }
  0x32   : > { %917 = vmatpush.bf16.msra.mxu2 %v1883_v35  ;;  %1975 = vmatmul.msk.bf16.vlgmr.msrb.gmra.mxu3 %vm680_vm1, %v2170_v56  ;;  %v601_v35 = vpack.c.b16 %v505_v29, %v505_v29  ;;  %v743_v44 = vsel %vm684_vm0, %v603_v34, 0  ;;  %v1915_v49 = vor.u32 %v2060_v37, %v1914_v36  ;;  %v1796_v32 = vld [vmem:[%s2133_s20 + $0xd0] sm:$0xf0]  ;;  %v2014_v33 = vld [vmem:[%s2133_s20 + $0x5c] sm:$0xf] }
  0x33   : > { %930 = vmatpush.bf16.msra.mxu3 %v1887_v45  ;;  %904 = vmatpush.bf16.msra.mxu1 %v1879_v46  ;;  %v2043_v46 = vld [vmem:[%s2133_s20 + $0x144] sm:$0xf]  ;;  %v1804_v34 = vld [vmem:[%s2133_s20 + $0xd8] sm:$0xf0]  ;;  %v1938_v51 = vld [vmem:[%s2133_s20 + $0x160] sm:$0xf] }
  0x34   : > { %v737_v45 = vsel %vm684_vm0, %v601_v35, 0  ;;  %v277_v35 = vld [vmem:[%s2133_s20 + $0x268] sm:$0x33]  ;;  %v276_v36 = vld [vmem:[%s2133_s20 + $0x260] sm:$0x33] }
  0x35   : > { %892 = vmatpush.bf16.msra.mxu0 %v1747_v57  ;;  %v2011_v57 = vld [vmem:[%s2133_s20 + $0x44] sm:$0xf]  ;;  %v512_v42 = vunpack.c.l.b16 %v276_v36  ;;  %v515_v43 = vunpack.c.h.b16 %v277_v35  ;;  %v2063_v52 = vld [vmem:[%s2133_s20 + $0x1dc] sm:$0xf0] }
  0x36   : > { %918 = vmatpush.bf16.msra.mxu2 %v1755_v55  ;;  %v1911_v55 = vor.u32 %v2043_v46, %v1908_v47  ;;  %v1783_v1 = vor.u32 %v2011_v57, %v1780_v58  ;;  %v1948_v57 = vld [vmem:[%s2133_s20 + $0x1e8] sm:$0xf0] }
  0x37   : > { %905 = vmatpush.bf16.msra.mxu1 %v1751_v60  ;;  %931 = vmatpush.bf16.msra.mxu3 %v1759_v61  ;;  %v1788_v60 = vld [vmem:[%s2133_s20 + $0xc8] sm:$0xf0]  ;;  %v275_v61 = vld [vmem:[%s2133_s20 + $0x258] sm:$0x33]  ;;  %v608_v46 = vpack.c.b16 %v512_v42, %v512_v42  ;;  %v611_v47 = vpack.c.b16 %v515_v43, %v515_v43  ;;  %v1826_v42 = vld [vmem:[%s2133_s20 + $0x70] sm:$0xf] }
  0x38   : > { %v511_v5 = vunpack.c.h.b16 %v275_v61  ;;  %v2033_v43 = vld [vmem:[%s2133_s20 + $0xec] sm:$0xf0] }
  0x39   : > { %942 = vmatpush.bf16.msrb.mxu0 %v722_v3  ;;  %v510_v3 = vunpack.c.l.b16 %v275_v61  ;;  %v767_v58 = vsel %vm684_vm0, %v611_v47, 0  ;;  %v1940_v61 = vld [vmem:[%s2133_s20 + $0x1e0] sm:$0xf0]  ;;  %v1836_v47 = vld [vmem:[%s2133_s20 + $0xf8] sm:$0xf0] }
  0x3a   : > { %968 = vmatpush.bf16.msrb.mxu2 %v728_v2  ;;  %v1791_v2 = vor.u32 %v2012_v59, %v1788_v60  ;;  %v607_v9 = vpack.c.b16 %v511_v5, %v511_v5  ;;  %v2047_v60 = vld [vmem:[%s2133_s20 + $0x164] sm:$0xf] }
  0x3b   : > { %981 = vmatpush.bf16.msrb.mxu3 %v731_v6  ;;  %955 = vmatpush.bf16.msrb.mxu1 %v725_v7  ;;  %v509_v6 = vunpack.c.h.b16 %v274_v62  ;;  %v606_v7 = vpack.c.b16 %v510_v3, %v510_v3  ;;  %v1818_v62 = vld [vmem:[%s2133_s20 + $0x68] sm:$0xf]  ;;  %v2031_v3 = vld [vmem:[%s2133_s20 + $0xdc] sm:$0xf0]  ;;  %v1943_v5 = vor.u32 %v2047_v60, %v1940_v61 }
  0x3c   : > { %v755_v19 = vsel %vm684_vm0, %v607_v9, 0  ;;  %v1820_v9 = vld [vmem:[%s2133_s20 + $0xe8] sm:$0xf0] }
  0x3d   : > { %943 = vmatpush.bf16.msrb.mxu0 %v1891_v12  ;;  %v605_v10 = vpack.c.b16 %v509_v6, %v509_v6  ;;  %v2062_v12 = vld [vmem:[%s2133_s20 + $0x1d4] sm:$0xf0]  ;;  %v752_v15 = vsel %vm684_vm0, %v606_v7, 0  ;;  %v2015_v6 = vld [vmem:[%s2133_s20 + $0x64] sm:$0xf] }
  0x3e   : > { %969 = vmatpush.bf16.msrb.mxu2 %v1899_v11  ;;  %v1930_v11 = vld [vmem:[%s2133_s20 + $0x158] sm:$0xf]  ;;  %v1812_v7 = vld [vmem:[%s2133_s20 + $0xe0] sm:$0xf0] }
  0x3f   : > { %982 = vmatpush.bf16.msrb.mxu3 %v1903_v16  ;;  %956 = vmatpush.bf16.msrb.mxu1 %v1895_v17  ;;  %v746_v16 = vsel %vm684_vm0, %v604_v8, 0  ;;  %v2046_v17 = vld [vmem:[%s2133_s20 + $0x15c] sm:$0xf]  ;;  %v749_v20 = vsel %vm684_vm0, %v605_v10, 0  ;;  %v1931_v24 = vor.u32 %v2062_v12, %v1930_v11  ;;  %v2016_v8 = vld [vmem:[%s2133_s20 + $0x6c] sm:$0xf]  ;;  %v1815_v14 = vor.u32 %v2015_v6, %v1812_v7 }
  0x40   : > { %1976 = vmatmul.msk.bf16.vlgmr.msra.gmra.mxu0 %vm680_vm1, %v2170_v56  ;;  %1977 = vmatmul.msk.bf16.vlgmr.msra.gmra.mxu1 %vm680_vm1, %v2170_v56  ;;  %v1935_v29 = vor.u32 %v2046_v17, %v1932_v18  ;;  %v279_v10 = vld [vmem:[%s2133_s20 + $0x278] sm:$0x33]  ;;  %v278_v11 = vld [vmem:[%s2133_s20 + $0x270] sm:$0x33] }
  0x41   : > { %944 = vmatpush.bf16.msrb.mxu0 %v1763_v27  ;;  %1978 = vmatmul.msk.bf16.vlgmr.msra.gmra.mxu2 %vm680_vm1, %v2170_v56  ;;  %v1794_v27 = vld [vmem:[%s2133_s20 + $0x50] sm:$0xf]  ;;  %v516_v17 = vunpack.c.l.b16 %v278_v11  ;;  %v519_v18 = vunpack.c.h.b16 %v279_v10 }
  0x42   : > { %970 = vmatpush.bf16.msrb.mxu2 %v1771_v26  ;;  %1979 = vmatmul.msk.bf16.vlgmr.msra.gmra.mxu3 %vm680_vm1, %v2170_v56  ;;  %v2030_v26 = vld [vmem:[%s2133_s20 + $0xd4] sm:$0xf0]  ;;  %v1795_v38 = vor.u32 %v2029_v28, %v1794_v27  ;;  %v2065_v27 = vld [vmem:[%s2133_s20 + $0x1ec] sm:$0xf0] }
  0x43   : > { %957 = vmatpush.bf16.msrb.mxu1 %v1767_v30  ;;  %983 = vmatpush.bf16.msrb.mxu3 %v1775_v31  ;;  %v1927_v30 = vor.u32 %v2045_v21, %v1924_v22  ;;  %v2013_v31 = vld [vmem:[%s2133_s20 + $0x54] sm:$0xf]  ;;  %v1803_v37 = vor.u32 %v2030_v26, %v1802_v23  ;;  %v612_v21 = vpack.c.b16 %v516_v17, %v516_v17  ;;  %v1954_v26 = vld [vmem:[%s2133_s20 + $0x170] sm:$0xf] }
  0x44   : > { %v1799_v39 = vor.u32 %v2013_v31, %v1796_v32  ;;  %v615_v22 = vpack.c.b16 %v519_v18, %v519_v18  ;;  %v1964_v31 = vld [vmem:[%s2133_s20 + $0x1f8] sm:$0xf0] }
  0x45   : > { %994 = vmatpush.bf16.msra.mxu0 %v734_v41  ;;  %v514_v41 = vunpack.c.l.b16 %v277_v35  ;;  %v1956_v35 = vld [vmem:[%s2133_s20 + $0x1f0] sm:$0xf0] }
  0x46   : > { %1020 = vmatpush.bf16.msra.mxu2 %v740_v40  ;;  %v1807_v40 = vor.u32 %v2014_v33, %v1804_v34  ;;  %v779_v32 = vsel %vm684_vm0, %v615_v22, 0  ;;  %v2049_v34 = vld [vmem:[%s2133_s20 + $0x174] sm:$0xf] }
  0x47   : > { %1033 = vmatpush.bf16.msra.mxu3 %v743_v44  ;;  %1007 = vmatpush.bf16.msra.mxu1 %v737_v45  ;;  %v513_v44 = vunpack.c.h.b16 %v276_v36  ;;  %v610_v45 = vpack.c.b16 %v514_v41, %v514_v41  ;;  %v1959_v41 = vor.u32 %v2049_v34, %v1956_v35 }
  0x49   : > { %995 = vmatpush.bf16.msra.mxu0 %v1907_v50  ;;  %v609_v48 = vpack.c.b16 %v513_v44, %v513_v44  ;;  %v2064_v50 = vld [vmem:[%s2133_s20 + $0x1e4] sm:$0xf0]  ;;  %v764_v53 = vsel %vm684_vm0, %v610_v45, 0  ;;  %v2017_v44 = vld [vmem:[%s2133_s20 + $0x74] sm:$0xf] }
  0x4a   : > { %1021 = vmatpush.bf16.msra.mxu2 %v1915_v49  ;;  %v1946_v49 = vld [vmem:[%s2133_s20 + $0x168] sm:$0xf]  ;;  %v1828_v45 = vld [vmem:[%s2133_s20 + $0xf0] sm:$0xf0] }
  0x4b   : > { %1034 = vmatpush.bf16.msra.mxu3 %v1919_v54  ;;  %1008 = vmatpush.bf16.msra.mxu1 %v1911_v55  ;;  %v758_v54 = vsel %vm684_vm0, %v608_v46, 0  ;;  %v2048_v55 = vld [vmem:[%s2133_s20 + $0x16c] sm:$0xf]  ;;  %v761_v59 = vsel %vm684_vm0, %v609_v48, 0  ;;  %v2018_v46 = vld [vmem:[%s2133_s20 + $0x7c] sm:$0xf] }
  0x4c   : > { %v1951_v4 = vor.u32 %v2048_v55, %v1948_v57 }
  0x4d   : > { %996 = vmatpush.bf16.msra.mxu0 %v1779_v0  ;;  %v1939_v0 = vor.u32 %v2063_v52, %v1938_v51  ;;  %v1839_v51 = vor.u32 %v2018_v46, %v1836_v47 }
  0x4e   : > { %1022 = vmatpush.bf16.msra.mxu2 %v1787_v63  ;;  %v1947_v63 = vor.u32 %v2064_v50, %v1946_v49  ;;  %v1827_v49 = vor.u32 %v2033_v43, %v1826_v42  ;;  %v1831_v50 = vor.u32 %v2017_v44, %v1828_v45 }
  0x4f   : > { %1009 = vmatpush.bf16.msra.mxu1 %v1783_v1  ;;  %1035 = vmatpush.bf16.msra.mxu3 %v1791_v2  ;;  %v2032_v1 = vld [vmem:[%s2133_s20 + $0xe4] sm:$0xf0]  ;;  %v1810_v2 = vld [vmem:[%s2133_s20 + $0x60] sm:$0xf] }
  0x50   : > { %1980 = vmatmul.msk.bf16.vlgmr.msrb.gmra.mxu0 %vm680_vm1, %v2170_v56  ;;  %1981 = vmatmul.msk.bf16.vlgmr.msrb.gmra.mxu1 %vm680_vm1, %v2170_v56  ;;  %v1819_v12 = vor.u32 %v2032_v1, %v1818_v62  ;;  %v1811_v13 = vor.u32 %v2031_v3, %v1810_v2 }
  0x51   : > { %1982 = vmatmul.msk.bf16.vlgmr.msrb.gmra.mxu2 %vm680_vm1, %v2170_v56  ;;  %1046 = vmatpush.bf16.msrb.mxu0 %v746_v16  ;;  %v518_v16 = vunpack.c.l.b16 %v279_v10 }
  0x52   : > { %1983 = vmatmul.msk.bf16.vlgmr.msrb.gmra.mxu3 %vm680_vm1, %v2170_v56  ;;  %1072 = vmatpush.bf16.msrb.mxu2 %v752_v15  ;;  %v1823_v15 = vor.u32 %v2016_v8, %v1820_v9 }
  0x53   : > { %1085 = vmatpush.bf16.msrb.mxu3 %v755_v19  ;;  %1059 = vmatpush.bf16.msrb.mxu1 %v749_v20  ;;  %v517_v19 = vunpack.c.h.b16 %v278_v11  ;;  %v614_v20 = vpack.c.b16 %v518_v16, %v518_v16 }
  0x55   : > { %1047 = vmatpush.bf16.msrb.mxu0 %v1923_v25  ;;  %v613_v23 = vpack.c.b16 %v517_v19, %v517_v19  ;;  %v2066_v25 = vld [vmem:[%s2133_s20 + $0x1f4] sm:$0xf0]  ;;  %v776_v28 = vsel %vm684_vm0, %v614_v20, 0 }
  0x56   : > { %1073 = vmatpush.bf16.msrb.mxu2 %v1931_v24  ;;  %v1962_v24 = vld [vmem:[%s2133_s20 + $0x178] sm:$0xf] }
  0x57   : > { %1086 = vmatpush.bf16.msrb.mxu3 %v1935_v29  ;;  %1060 = vmatpush.bf16.msrb.mxu1 %v1927_v30  ;;  %v770_v29 = vsel %vm684_vm0, %v612_v21, 0  ;;  %v2050_v30 = vld [vmem:[%s2133_s20 + $0x17c] sm:$0xf]  ;;  %v773_v33 = vsel %vm684_vm0, %v613_v23, 0  ;;  %v1963_v36 = vor.u32 %v2066_v25, %v1962_v24 }
  0x59   : > { %1048 = vmatpush.bf16.msrb.mxu0 %v1795_v38  ;;  %v1834_v38 = vld [vmem:[%s2133_s20 + $0x78] sm:$0xf] }
  0x5a   : > { %1074 = vmatpush.bf16.msrb.mxu2 %v1803_v37  ;;  %v1955_v37 = vor.u32 %v2065_v27, %v1954_v26 }
  0x5b   : > { %1061 = vmatpush.bf16.msrb.mxu1 %v1799_v39  ;;  %1087 = vmatpush.bf16.msrb.mxu3 %v1807_v40  ;;  %v2034_v39 = vld [vmem:[%s2133_s20 + $0xf4] sm:$0xf0]  ;;  %v1967_v40 = vor.u32 %v2050_v30, %v1964_v31 }
  0x5c   : > { %v1835_v48 = vor.u32 %v2034_v39, %v1834_v38 }
  0x60   : > { %1984 = vmatmul.msk.bf16.vlgmr.msra.gmra.mxu0 %vm680_vm1, %v2170_v56  ;;  %1985 = vmatmul.msk.bf16.vlgmr.msra.gmra.mxu1 %vm680_vm1, %v2170_v56 }
  0x61   : > { %1986 = vmatmul.msk.bf16.vlgmr.msra.gmra.mxu2 %vm680_vm1, %v2170_v56  ;;  %1098 = vmatpush.bf16.msra.mxu0 %v758_v54 }
  0x62   : > { %1987 = vmatmul.msk.bf16.vlgmr.msra.gmra.mxu3 %vm680_vm1, %v2170_v56  ;;  %1124 = vmatpush.bf16.msra.mxu2 %v764_v53 }
  0x63   : > { %1137 = vmatpush.bf16.msra.mxu3 %v767_v58  ;;  %1111 = vmatpush.bf16.msra.mxu1 %v761_v59 }
  0x65   : > { %1099 = vmatpush.bf16.msra.mxu0 %v1939_v0 }
  0x66   : > { %1125 = vmatpush.bf16.msra.mxu2 %v1947_v63 }
  0x67   : > { %1138 = vmatpush.bf16.msra.mxu3 %v1951_v4  ;;  %1112 = vmatpush.bf16.msra.mxu1 %v1943_v5 }
  0x69   : > { %1100 = vmatpush.bf16.msra.mxu0 %v1811_v13 }
  0x6a   : > { %1126 = vmatpush.bf16.msra.mxu2 %v1819_v12 }
  0x6b   : > { %1113 = vmatpush.bf16.msra.mxu1 %v1815_v14  ;;  %1139 = vmatpush.bf16.msra.mxu3 %v1823_v15 }
  0x70   : > { %1988 = vmatmul.msk.bf16.vlgmr.msrb.gmra.mxu0 %vm680_vm1, %v2170_v56  ;;  %1989 = vmatmul.msk.bf16.vlgmr.msrb.gmra.mxu1 %vm680_vm1, %v2170_v56 }
  0x71   : > { %1990 = vmatmul.msk.bf16.vlgmr.msrb.gmra.mxu2 %vm680_vm1, %v2170_v56  ;;  %1150 = vmatpush.bf16.msrb.mxu0 %v770_v29 }
  0x72   : > { %1991 = vmatmul.msk.bf16.vlgmr.msrb.gmra.mxu3 %vm680_vm1, %v2170_v56  ;;  %1176 = vmatpush.bf16.msrb.mxu2 %v776_v28 }
  0x73   : > { %1189 = vmatpush.bf16.msrb.mxu3 %v779_v32  ;;  %1163 = vmatpush.bf16.msrb.mxu1 %v773_v33 }
  0x75   : > { %1151 = vmatpush.bf16.msrb.mxu0 %v1955_v37 }
  0x76   : > { %1177 = vmatpush.bf16.msrb.mxu2 %v1963_v36 }
  0x77   : > { %1190 = vmatpush.bf16.msrb.mxu3 %v1967_v40  ;;  %1164 = vmatpush.bf16.msrb.mxu1 %v1959_v41 }
  0x79   : > { %1152 = vmatpush.bf16.msrb.mxu0 %v1827_v49 }
  0x7a   : > { %1178 = vmatpush.bf16.msrb.mxu2 %v1835_v48 }
  0x7b   : > { %1165 = vmatpush.bf16.msrb.mxu1 %v1831_v50  ;;  %1191 = vmatpush.bf16.msrb.mxu3 %v1839_v51 }
  0x80   : > { %1992 = vmatmul.msk.bf16.vlgmr.msra.gmra.mxu0 %vm680_vm1, %v2170_v56  ;;  %1993 = vmatmul.msk.bf16.vlgmr.msra.gmra.mxu1 %vm680_vm1, %v2170_v56 }
  0x81   : > { %1994 = vmatmul.msk.bf16.vlgmr.msra.gmra.mxu2 %vm680_vm1, %v2170_v56 }
  0x82   : > { %1995 = vmatmul.msk.bf16.vlgmr.msra.gmra.mxu3 %vm680_vm1, %v2170_v56 }
  0x90   : > { %1996 = vmatmul.msk.bf16.vlgmr.msrb.gmra.mxu0 %vm680_vm1, %v2170_v56  ;;  %1997 = vmatmul.msk.bf16.vlgmr.msrb.gmra.mxu1 %vm680_vm1, %v2170_v56 }
  0x91   : > { %1998 = vmatmul.msk.bf16.vlgmr.msrb.gmra.mxu2 %vm680_vm1, %v2170_v56 }
  0x92   : > { %1999 = vmatmul.msk.bf16.vlgmr.msrb.gmra.mxu3 %vm680_vm1, %v2170_v56 }
  0x9d   : > { %v2380_v52 = vpop.f32.mrf.mxu0  ;;  %v2382_v53 = vpop.f32.mrf.mxu1 }
  0x9e   : > { %v1197_v4 = vsel %vm684_vm0, %v2380_v52, 0.0  ;;  %v1198_v5 = vsel %vm684_vm0, %v2382_v53, 0.0 }
  0x9f   : > { %v1199_v9 = vadd.f32 %v1198_v5, %v1197_v4 }
  0xa4   : > { %v2384_v54 = vpop.f32.mrf.mxu2 }
  0xa5   : > { %v2386_v55 = vpop.f32.mrf.mxu3  ;;  %v792_v57 = vpop.f32.mrf.mxu0  ;;  %v1200_v8 = vsel %vm684_vm0, %v2384_v54, 0.0 }
  0xa6   : > { %v805_v58 = vpop.f32.mrf.mxu1  ;;  %v1201_v10 = vadd.f32 %v1200_v8, %v1199_v9  ;;  %v1202_v11 = vsel %vm684_vm0, %v2386_v55, 0.0 }
  0xa8   : > { %v1203_v17 = vadd.f32 %v1202_v11, %v1201_v10 }
  0xac   : > { %v818_v59 = vpop.f32.mrf.mxu2 }
  0xad   : > { %v831_v60 = vpop.f32.mrf.mxu3  ;;  %v2388_v61 = vpop.f32.mrf.mxu0 }
  0xae   : > { %v2390_v62 = vpop.f32.mrf.mxu1  ;;  %v1204_v14 = vsel %vm684_vm0, %v2388_v61, 0.0 }
  0xaf   : > { %v1205_v18 = vadd.f32 %v1204_v14, %v1203_v17  ;;  %v1206_v19 = vsel %vm684_vm0, %v2390_v62, 0.0 }
  0xb1   : > { %v1207_v21 = vadd.f32 %v1206_v19, %v1205_v18 }
  0xb4   : > { %v2392_v63 = vpop.f32.mrf.mxu2 }
  0xb5   : > { %v2394_v0 = vpop.f32.mrf.mxu3  ;;  %v844_v56 = vpop.f32.mrf.mxu0  ;;  %v1208_v20 = vsel %vm684_vm0, %v2392_v63, 0.0 }
  0xb6   : > { %v857_v1 = vpop.f32.mrf.mxu1  ;;  %v1209_v26 = vadd.f32 %v1208_v20, %v1207_v21  ;;  %v1210_v27 = vsel %vm684_vm0, %v2394_v0, 0.0 }
  0xb8   : > { %v1211_v29 = vadd.f32 %v1210_v27, %v1209_v26 }
  0xbc   : > { %v870_v2 = vpop.f32.mrf.mxu2 }
  0xbd   : > { %v883_v3 = vpop.f32.mrf.mxu3  ;;  %v2400_v6 = vpop.f32.mrf.mxu0 }
  0xbe   : > { %v2402_v7 = vpop.f32.mrf.mxu1  ;;  %v1212_v28 = vsel %vm684_vm0, %v2400_v6, 0.0 }
  0xbf   : > { %v1213_v30 = vadd.f32 %v1212_v28, %v1211_v29  ;;  %v1214_v33 = vsel %vm684_vm0, %v2402_v7, 0.0 }
  0xc1   : > { %v1215_v37 = vadd.f32 %v1214_v33, %v1213_v30 }
  0xc4   : > { %v2408_v12 = vpop.f32.mrf.mxu2 }
  0xc5   : > { %v2410_v13 = vpop.f32.mrf.mxu3  ;;  %v896_v15 = vpop.f32.mrf.mxu0  ;;  %v1216_v36 = vsel %vm684_vm0, %v2408_v12, 0.0 }
  0xc6   : > { %v909_v16 = vpop.f32.mrf.mxu1  ;;  %v1217_v38 = vadd.f32 %v1216_v36, %v1215_v37  ;;  %v1218_v39 = vsel %vm684_vm0, %v2410_v13, 0.0 }
  0xc8   : > { %v1219_v45 = vadd.f32 %v1218_v39, %v1217_v38 }
  0xcc   : > { %v922_v22 = vpop.f32.mrf.mxu2 }
  0xcd   : > { %v935_v23 = vpop.f32.mrf.mxu3  ;;  %v2418_v24 = vpop.f32.mrf.mxu0 }
  0xce   : > { %v2420_v25 = vpop.f32.mrf.mxu1  ;;  %v1220_v42 = vsel %vm684_vm0, %v2418_v24, 0.0 }
  0xcf   : > { %v1221_v46 = vadd.f32 %v1220_v42, %v1219_v45  ;;  %v1222_v47 = vsel %vm684_vm0, %v2420_v25, 0.0 }
  0xd1   : > { %v1223_v49 = vadd.f32 %v1222_v47, %v1221_v46 }
  0xd4   : > { %v2426_v31 = vpop.f32.mrf.mxu2 }
  0xd5   : > { %v2428_v32 = vpop.f32.mrf.mxu3  ;;  %v948_v34 = vpop.f32.mrf.mxu0  ;;  %v1224_v48 = vsel %vm684_vm0, %v2426_v31, 0.0 }
  0xd6   : > { %v961_v35 = vpop.f32.mrf.mxu1  ;;  %v1225_v59 = vadd.f32 %v1224_v48, %v1223_v49  ;;  %v1226_v60 = vsel %vm684_vm0, %v2428_v32, 0.0 }
  0xd8   : > { %v1227_v1 = vadd.f32 %v1226_v60, %v1225_v59 }
  0xdc   : > { %v974_v40 = vpop.f32.mrf.mxu2 }
  0xdd   : > { %v987_v41 = vpop.f32.mrf.mxu3  ;;  %v2438_v43 = vpop.f32.mrf.mxu0 }
  0xde   : > { %v2440_v44 = vpop.f32.mrf.mxu1  ;;  %v1228_v56 = vsel %vm684_vm0, %v2438_v43, 0.0 }
  0xdf   : > { %v1229_v2 = vadd.f32 %v1228_v56, %v1227_v1  ;;  %v1230_v5 = vsel %vm684_vm0, %v2440_v44, 0.0 }
  0xe1   : > { %v1231_v11 = vadd.f32 %v1230_v5, %v1229_v2 }
  0xe4   : > { %v2446_v50 = vpop.f32.mrf.mxu2 }
  0xe5   : > { %v2448_v51 = vpop.f32.mrf.mxu3  ;;  %v1000_v57 = vpop.f32.mrf.mxu0  ;;  %v1232_v10 = vsel %vm684_vm0, %v2446_v50, 0.0 }
  0xe6   : > { %v1013_v58 = vpop.f32.mrf.mxu1  ;;  %v1233_v14 = vadd.f32 %v1232_v10, %v1231_v11  ;;  %v1234_v15 = vsel %vm684_vm0, %v2448_v51, 0.0 }
  0xe8   : > { %v1235_v21 = vadd.f32 %v1234_v15, %v1233_v14 }
  0xec   : > { %v1026_v3 = vpop.f32.mrf.mxu2 }
  0xed   : > { %v1039_v4 = vpop.f32.mrf.mxu3  ;;  %v2456_v8 = vpop.f32.mrf.mxu0 }
  0xee   : > { %v2458_v9 = vpop.f32.mrf.mxu1  ;;  %v1236_v18 = vsel %vm684_vm0, %v2456_v8, 0.0 }
  0xef   : > { %v1237_v22 = vadd.f32 %v1236_v18, %v1235_v21  ;;  %v1238_v23 = vsel %vm684_vm0, %v2458_v9, 0.0 }
  0xf1   : > { %v1239_v27 = vadd.f32 %v1238_v23, %v1237_v22  ;;  %v2092_v23 = vmov 4096.0  }
  0xf2   : > { %2080 = vrcp.f32 %v2092_v23 }
  0xf4   : > { %v2464_v16 = vpop.f32.mrf.mxu2 }
  0xf5   : > { %v2466_v17 = vpop.f32.mrf.mxu3  ;;  %v1052_v19 = vpop.f32.mrf.mxu0  ;;  %v1240_v26 = vsel %vm684_vm0, %v2464_v16, 0.0 }
  0xf6   : > { %v1065_v20 = vpop.f32.mrf.mxu1  ;;  %v1241_v34 = vadd.f32 %v1240_v26, %v1239_v27  ;;  %v1242_v35 = vsel %vm684_vm0, %v2466_v17, 0.0 }
  0xf8   : > { %v1243_v37 = vadd.f32 %v1242_v35, %v1241_v34  ;;  %v2081_v26 = vpop.eup %2080 }
  0xf9   : > { %v1263_v27 = vmul.f32 4096.0, %v2081_v26  ;;  %vm1267_vm2 = vweird.f32 %v2081_v26 }
  0xfc   : > { %v1078_v28 = vpop.f32.mrf.mxu2 }
  0xfd   : > { %v1091_v29 = vpop.f32.mrf.mxu3  ;;  %v2474_v30 = vpop.f32.mrf.mxu0  ;;  %v1264_v28 = vsub.f32 1.0, %v1263_v27 }
  0xfe   : > { %v2476_v33 = vpop.f32.mrf.mxu1  ;;  %v1244_v36 = vsel %vm684_vm0, %v2474_v30, 0.0 }
  0xff   : > { %v1245_v38 = vadd.f32 %v1244_v36, %v1243_v37  ;;  %v1246_v41 = vsel %vm684_vm0, %v2476_v33, 0.0  ;;  %v1265_v29 = vmul.f32 %v2081_v26, %v1264_v28 }
 0x101   : > { %v1247_v47 = vadd.f32 %v1246_v41, %v1245_v38  ;;  %v1266_v34 = vadd.f32 %v2081_v26, %v1265_v29 }
 0x103   : > { %v2508_v35 = vsel %vm1267_vm2, %v2081_v26, %v1266_v34 }
 0x104   : > { %v2482_v39 = vpop.f32.mrf.mxu2 }
 0x105   : > { %v2484_v40 = vpop.f32.mrf.mxu3  ;;  %v1104_v42 = vpop.f32.mrf.mxu0  ;;  %v1248_v46 = vsel %vm684_vm0, %v2482_v39, 0.0 }
 0x106   : > { %v1117_v45 = vpop.f32.mrf.mxu1  ;;  %v1249_v48 = vadd.f32 %v1248_v46, %v1247_v47  ;;  %v1250_v49 = vsel %vm684_vm0, %v2484_v40, 0.0 }
 0x108   : > { %v1251_v56 = vadd.f32 %v1250_v49, %v1249_v48 }
 0x10c   : > { %v1130_v57 = vpop.f32.mrf.mxu2 }
 0x10d   : > { %v1143_v58 = vpop.f32.mrf.mxu3  ;;  %v2492_v59 = vpop.f32.mrf.mxu0 }
 0x10e   : > { %v2494_v60 = vpop.f32.mrf.mxu1  ;;  %v1252_v1 = vsel %vm684_vm0, %v2492_v59, 0.0 }
 0x10f   : > { %v1253_v2 = vadd.f32 %v1252_v1, %v1251_v56  ;;  %v1254_v3 = vsel %vm684_vm0, %v2494_v60, 0.0 }
 0x111   : > { %v1255_v4 = vadd.f32 %v1254_v3, %v1253_v2 }
 0x114   : > { %v2500_v5 = vpop.f32.mrf.mxu2 }
 0x115   : > { %v2502_v10 = vpop.f32.mrf.mxu3  ;;  %v1256_v11 = vsel %vm684_vm0, %v2500_v5, 0.0  ;;  %v1156_v14 = vpop.f32.mrf.mxu0 }
 0x116   : > { %v1169_v15 = vpop.f32.mrf.mxu1  ;;  %v1258_v18 = vsel %vm684_vm0, %v2502_v10, 0.0  ;;  %v1257_v19 = vadd.f32 %v1256_v11, %v1255_v4 }
 0x118   : > { %v1259_v20 = vadd.f32 %v1258_v18, %v1257_v19 }
 0x11a   : > { %1260 = vadd.xlane.f32.xlu0 %v1259_v20 }
 0x11c   : > { %v1182_v21 = vpop.f32.mrf.mxu2 }
 0x11d   : > { %v1195_v22 = vpop.f32.mrf.mxu3 }
 0x18d   : > { %v1261_v36 = vpop.xlane.xlu0 %1260 }
 0x18e   : > { %v2511_v37 = vmul.f32 %v2508_v35, %v1261_v36 }
 0x190   : > { %v2515_v38 = vsub.f32 %v2380_v52, %v2511_v37  ;;  %v2519_v41 = vsub.f32 %v2382_v53, %v2511_v37  ;;  %v2523_v42 = vsub.f32 %v2384_v54, %v2511_v37  ;;  %v2527_v45 = vsub.f32 %v2386_v55, %v2511_v37 }
 0x191   : > { %v2535_v52 = vsub.f32 %v2388_v61, %v2511_v37  ;;  %v2541_v54 = vsub.f32 %v2390_v62, %v2511_v37  ;;  %v2549_v58 = vsub.f32 %v2392_v63, %v2511_v37  ;;  %v2556_v62 = vsub.f32 %v2394_v0, %v2511_v37 }
 0x192   : > { %v1302_v46 = vmul.f32 %v2515_v38, %v2515_v38  ;;  %v1303_v47 = vmul.f32 %v2519_v41, %v2519_v41  ;;  %v1304_v53 = vmul.f32 %v2523_v42, %v2523_v42  ;;  %v1305_v55 = vmul.f32 %v2527_v45, %v2527_v45 }
 0x193   : > { %v1306_v61 = vmul.f32 %v2535_v52, %v2535_v52  ;;  %v1307_v2 = vmul.f32 %v2541_v54, %v2541_v54  ;;  %v2563_v63 = vsub.f32 %v2400_v6, %v2511_v37  ;;  %v1308_v11 = vmul.f32 %v2549_v58, %v2549_v58 }
 0x194   : > { %v1334_v48 = vsel %vm684_vm0, %v1302_v46, 0.0  ;;  %v1335_v49 = vsel %vm684_vm0, %v1303_v47, 0.0  ;;  %v1337_v56 = vsel %vm684_vm0, %v1304_v53, 0.0  ;;  %v1339_v3 = vsel %vm684_vm0, %v1305_v55, 0.0 }
 0x195   : > { %v1336_v57 = vadd.f32 %v1335_v49, %v1334_v48  ;;  %v1341_v14 = vsel %vm684_vm0, %v1306_v61, 0.0  ;;  %v2570_v0 = vsub.f32 %v2402_v7, %v2511_v37  ;;  %v1309_v18 = vmul.f32 %v2556_v62, %v2556_v62 }
 0x196   : > { %v1343_v19 = vsel %vm684_vm0, %v1307_v2, 0.0  ;;  %v2577_v6 = vsub.f32 %v2408_v12, %v2511_v37  ;;  %v1310_v21 = vmul.f32 %v2563_v63, %v2563_v63  ;;  %v1345_v22 = vsel %vm684_vm0, %v1308_v11, 0.0 }
 0x197   : > { %v1338_v1 = vadd.f32 %v1337_v56, %v1336_v57  ;;  %v2584_v7 = vsub.f32 %v2410_v13, %v2511_v37  ;;  %v1311_v26 = vmul.f32 %v2570_v0, %v2570_v0  ;;  %v1347_v27 = vsel %vm684_vm0, %v1309_v18, 0.0 }
 0x198   : > { %v2591_v12 = vsub.f32 %v2418_v24, %v2511_v37  ;;  %v1312_v29 = vmul.f32 %v2577_v6, %v2577_v6  ;;  %v1349_v34 = vsel %vm684_vm0, %v1310_v21, 0.0  ;;  %v2598_v13 = vsub.f32 %v2420_v25, %v2511_v37 }
 0x199   : > { %v1340_v4 = vadd.f32 %v1339_v3, %v1338_v1  ;;  %v1313_v46 = vmul.f32 %v2584_v7, %v2584_v7  ;;  %v1351_v47 = vsel %vm684_vm0, %v1311_v26, 0.0  ;;  %v2605_v24 = vsub.f32 %v2426_v31, %v2511_v37 }
 0x19a   : > { %v1314_v55 = vmul.f32 %v2591_v12, %v2591_v12  ;;  %v1353_v48 = vsel %vm684_vm0, %v1312_v29, 0.0  ;;  %v2612_v25 = vsub.f32 %v2428_v32, %v2511_v37  ;;  %v1315_v57 = vmul.f32 %v2598_v13, %v2598_v13 }
 0x19b   : > { %v1342_v15 = vadd.f32 %v1341_v14, %v1340_v4  ;;  %v1355_v61 = vsel %vm684_vm0, %v1313_v46, 0.0  ;;  %v2619_v31 = vsub.f32 %v2438_v43, %v2511_v37  ;;  %v1316_v1 = vmul.f32 %v2605_v24, %v2605_v24 }
 0x19c   : > { %v1357_v2 = vsel %vm684_vm0, %v1314_v55, 0.0  ;;  %v2626_v32 = vsub.f32 %v2440_v44, %v2511_v37  ;;  %v1317_v4 = vmul.f32 %v2612_v25, %v2612_v25  ;;  %v1359_v11 = vsel %vm684_vm0, %v1315_v57, 0.0 }
 0x19d   : > { %v1344_v20 = vadd.f32 %v1343_v19, %v1342_v15  ;;  %v2633_v43 = vsub.f32 %v2446_v50, %v2511_v37  ;;  %v1318_v15 = vmul.f32 %v2619_v31, %v2619_v31  ;;  %v1361_v18 = vsel %vm684_vm0, %v1316_v1, 0.0 }
 0x19e   : > { %v2640_v44 = vsub.f32 %v2448_v51, %v2511_v37  ;;  %v1363_v21 = vsel %vm684_vm0, %v1317_v4, 0.0  ;;  %v2647_v50 = vsub.f32 %v2456_v8, %v2511_v37  ;;  %v1443_v51 = vld [vmem:[%s2873_s1] sm:$0x3]  ;;  %v2664_v46 = vsub.f32 %v2464_v16, %v2511_v37 }
 0x19f   : > { %v1346_v23 = vadd.f32 %v1345_v22, %v1344_v20  ;;  %v1319_v20 = vmul.f32 %v2626_v32, %v2626_v32  ;;  %v1365_v26 = vsel %vm684_vm0, %v1318_v15, 0.0  ;;  %v2671_v55 = vsub.f32 %v2466_v17, %v2511_v37  ;;  %v1481_v17 = vld [vmem:[%s2874_s2] sm:$0x3] }
 0x1a0   : > { %v1321_v29 = vmul.f32 %v2640_v44, %v2640_v44  ;;  %v2678_v16 = vsub.f32 %v2474_v30, %v2511_v37 }
 0x1a1   : > { %v1348_v28 = vadd.f32 %v1347_v27, %v1346_v23  ;;  %v1320_v23 = vmul.f32 %v2633_v43, %v2633_v43  ;;  %v1367_v8 = vsel %vm684_vm0, %v1319_v20, 0.0 }
 0x1a3   : > { %v1350_v36 = vadd.f32 %v1349_v34, %v1348_v28  ;;  %v2657_v28 = vsub.f32 %v2458_v9, %v2511_v37  ;;  %v2093_v34 = vmov 0   ;;  %v1369_v9 = vsel %vm684_vm0, %v1320_v23, 0.0 }
 0x1a4   : > { %2078 = vset.pattern.permute.xlu1 %v2093_v34  ;;  %2079 = vset.pattern.permute.xlu0 %v2093_v34 }
 0x1a5   : > { %v1352_v53 = vadd.f32 %v1351_v47, %v1350_v36  ;;  %1446 = vperm.xlu1 %2078, %v1443_v51   ;;  %v1322_v47 = vmul.f32 %v2647_v50, %v2647_v50 }
 0x1a7   : > { %v1354_v49 = vadd.f32 %v1353_v48, %v1352_v53  ;;  %v1323_v48 = vmul.f32 %v2657_v28, %v2657_v28 }
 0x1a9   : > { %v1356_v56 = vadd.f32 %v1355_v61, %v1354_v49  ;;  %v1371_v49 = vsel %vm684_vm0, %v1321_v29, 0.0  ;;  %v1324_v61 = vmul.f32 %v2664_v46, %v2664_v46  ;;  %v1375_v30 = vsel %vm684_vm0, %v1323_v48, 0.0 }
 0x1ab   : > { %v1358_v3 = vadd.f32 %v1357_v2, %v1356_v56  ;;  %v1373_v56 = vsel %vm684_vm0, %v1322_v47, 0.0  ;;  %v2688_v2 = vsub.f32 %v2476_v33, %v2511_v37  ;;  %v1377_v15 = vsel %vm684_vm0, %v1324_v61, 0.0 }
 0x1ac   : > { %v2702_v33 = vsub.f32 %v2484_v40, %v2511_v37  ;;  %v2716_v40 = vsub.f32 %v2494_v60, %v2511_v37  ;;  %v1301_v60 = vsub.f32 %v2502_v10, %v2511_v37 }
 0x1ad   : > { %v1360_v14 = vadd.f32 %v1359_v11, %v1358_v3  ;;  %v1325_v3 = vmul.f32 %v2671_v55, %v2671_v55  ;;  %1484 = vperm.xlu1 %2078, %v1481_v17   ;;  %v2695_v11 = vsub.f32 %v2482_v39, %v2511_v37  ;;  %v2709_v39 = vsub.f32 %v2492_v59, %v2511_v37 }
 0x1ae   : > { %v2723_v59 = vsub.f32 %v2500_v5, %v2511_v37  ;;  %v1331_v47 = vmul.f32 %v2716_v40, %v2716_v40 }
 0x1af   : > { %v1362_v19 = vadd.f32 %v1361_v18, %v1360_v14  ;;  %v1326_v14 = vmul.f32 %v2678_v16, %v2678_v16  ;;  %v1379_v20 = vsel %vm684_vm0, %v1325_v3, 0.0 }
 0x1b0   : > { %v1332_v48 = vmul.f32 %v2723_v59, %v2723_v59  ;;  %v1391_v61 = vsel %vm684_vm0, %v1331_v47, 0.0 }
 0x1b1   : > { %v1364_v22 = vadd.f32 %v1363_v21, %v1362_v19  ;;  %v1327_v19 = vmul.f32 %v2688_v2, %v2688_v2  ;;  %v1381_v23 = vsel %vm684_vm0, %v1326_v14, 0.0 }
 0x1b2   : > { %v1393_v17 = vsel %vm684_vm0, %v1332_v48, 0.0 }
 0x1b3   : > { %v1366_v27 = vadd.f32 %v1365_v26, %v1364_v22  ;;  %v1328_v22 = vmul.f32 %v2695_v11, %v2695_v11  ;;  %v1383_v51 = vsel %vm684_vm0, %v1327_v19, 0.0 }
 0x1b5   : > { %v1368_v36 = vadd.f32 %v1367_v8, %v1366_v27  ;;  %v1329_v27 = vmul.f32 %v2702_v33, %v2702_v33  ;;  %v1330_v8 = vmul.f32 %v2709_v39, %v2709_v39  ;;  %v1385_v34 = vsel %vm684_vm0, %v1328_v22, 0.0 }
 0x1b7   : > { %v1370_v53 = vadd.f32 %v1369_v9, %v1368_v36  ;;  %v1387_v9 = vsel %vm684_vm0, %v1329_v27, 0.0  ;;  %v1389_v5 = vsel %vm684_vm0, %v1330_v8, 0.0 }
 0x1b9   : > { %v1372_v57 = vadd.f32 %v1371_v49, %v1370_v53 }
 0x1bb   : > { %v1374_v1 = vadd.f32 %v1373_v56, %v1372_v57  ;;  %v1333_v57 = vmul.f32 %v1301_v60, %v1301_v60 }
 0x1bd   : > { %v1376_v4 = vadd.f32 %v1375_v30, %v1374_v1  ;;  %v1395_v10 = vsel %vm684_vm0, %v1333_v57, 0.0 }
 0x1bf   : > { %v1378_v18 = vadd.f32 %v1377_v15, %v1376_v4 }
 0x1c1   : > { %v1380_v21 = vadd.f32 %v1379_v20, %v1378_v18 }
 0x1c3   : > { %v1382_v26 = vadd.f32 %v1381_v23, %v1380_v21 }
 0x1c5   : > { %v1384_v29 = vadd.f32 %v1383_v51, %v1382_v26 }
 0x1c7   : > { %v1386_v36 = vadd.f32 %v1385_v34, %v1384_v29 }
 0x1c9   : > { %v1388_v53 = vadd.f32 %v1387_v9, %v1386_v36 }
 0x1cb   : > { %v1390_v49 = vadd.f32 %v1389_v5, %v1388_v53 }
 0x1cd   : > { %v1392_v56 = vadd.f32 %v1391_v61, %v1390_v49 }
 0x1cf   : > { %v1394_v1 = vadd.f32 %v1393_v17, %v1392_v56 }
 0x1d1   : > { %v1396_v37 = vadd.f32 %v1395_v10, %v1394_v1 }
 0x1d3   : > { %1397 = vadd.xlane.f32.xlu0 %v1396_v37 }
 0x217   : > { %v1447_v9 = vpop.permute.xlu1 %1446 }
 0x246   : > { %v1398_v3 = vpop.xlane.xlu0 %1397 }
 0x247   : > { %v1399_v30 = vmul.f32 %v1398_v3, %v2508_v35 }
 0x249   : > { %v1400_v4 = vadd.f32 1e-05, %v1399_v30 }
 0x24b   : > { %2082 = vrsqrt.f32 %v1400_v4  ;;  %vm1407_vm4 = vweird.f32 %v1400_v4 }
 0x251   : > { %v2083_v14 = vpop.eup %2082 }
 0x252   : > { %v1402_v15 = vmul.f32 %v2083_v14, %v1400_v4  ;;  %vm1408_vm3 = vweird.f32 %v2083_v14 }
 0x253   : > { %vm1409_vm5 = vmor %vm1407_vm4, %vm1408_vm3 }
 0x254   : > { %v1403_v18 = vmul.f32 %v2083_v14, %v1402_v15 }
 0x256   : > { %v1404_v19 = vmul.f32 0.5, %v1403_v18 }
 0x258   : > { %v1405_v20 = vsub.f32 1.5, %v1404_v19 }
 0x25a   : > { %v1406_v21 = vmul.f32 %v2083_v14, %v1405_v20  ;;  %v1485_v20 = vpop.permute.xlu1 %1484 }
 0x25c   : > { %v1410_v22 = vsel %vm1409_vm5, %v2083_v14, %v1406_v21 }
 0x25d   : > { %v1411_v23 = vmul.f32 %v1410_v22, %v2515_v38  ;;  %v1412_v26 = vmul.f32 %v1410_v22, %v2519_v41  ;;  %v1413_v27 = vmul.f32 %v1410_v22, %v2523_v42  ;;  %v1414_v35 = vmul.f32 %v1410_v22, %v2527_v45 }
 0x25e   : > { %v1415_v51 = vmul.f32 %v1410_v22, %v2535_v52  ;;  %v1416_v29 = vmul.f32 %v1410_v22, %v2541_v54  ;;  %v1417_v8 = vmul.f32 %v1410_v22, %v2549_v58  ;;  %v1418_v34 = vmul.f32 %v1410_v22, %v2556_v62 }
 0x25f   : > { %v1419_v36 = vmul.f32 %v1410_v22, %v2563_v63  ;;  %v1420_v47 = vmul.f32 %v1410_v22, %v2570_v0  ;;  %v1421_v38 = vmul.f32 %v1410_v22, %v2577_v6  ;;  %v1422_v41 = vmul.f32 %v1410_v22, %v2584_v7 }
 0x260   : > { %v1423_v42 = vmul.f32 %v1410_v22, %v2591_v12  ;;  %v1424_v45 = vmul.f32 %v1410_v22, %v2598_v13  ;;  %v1425_v52 = vmul.f32 %v1410_v22, %v2605_v24  ;;  %v1426_v54 = vmul.f32 %v1410_v22, %v2612_v25 }
 0x261   : > { %v1427_v58 = vmul.f32 %v1410_v22, %v2619_v31  ;;  %v1428_v62 = vmul.f32 %v1410_v22, %v2626_v32  ;;  %v1429_v63 = vmul.f32 %v1410_v22, %v2633_v43  ;;  %v1430_v0 = vmul.f32 %v1410_v22, %v2640_v44 }
 0x262   : > { %v1431_v6 = vmul.f32 %v1410_v22, %v2647_v50  ;;  %v1432_v7 = vmul.f32 %v1410_v22, %v2657_v28  ;;  %v1433_v12 = vmul.f32 %v1410_v22, %v2664_v46  ;;  %v1434_v13 = vmul.f32 %v1410_v22, %v2671_v55 }
 0x263   : > { %v1435_v24 = vmul.f32 %v1410_v22, %v2678_v16  ;;  %v1436_v25 = vmul.f32 %v1410_v22, %v2688_v2  ;;  %v1437_v31 = vmul.f32 %v1410_v22, %v2695_v11  ;;  %v1438_v32 = vmul.f32 %v1410_v22, %v2702_v33 }
 0x264   : > { %v1439_v43 = vmul.f32 %v1410_v22, %v2709_v39  ;;  %v1440_v44 = vmul.f32 %v1410_v22, %v2716_v40  ;;  %v1441_v50 = vmul.f32 %v1410_v22, %v2723_v59  ;;  %v1442_v53 = vmul.f32 %v1410_v22, %v1301_v60 }
 0x265   : > { %v1449_v28 = vmul.f32 %v1447_v9, %v1411_v23  ;;  %v1450_v48 = vmul.f32 %v1447_v9, %v1412_v26  ;;  %v1451_v46 = vmul.f32 %v1447_v9, %v1413_v27  ;;  %v1452_v5 = vmul.f32 %v1447_v9, %v1414_v35 }
 0x266   : > { %v1453_v55 = vmul.f32 %v1447_v9, %v1415_v51  ;;  %v1454_v49 = vmul.f32 %v1447_v9, %v1416_v29  ;;  %v1455_v16 = vmul.f32 %v1447_v9, %v1417_v8  ;;  %v1456_v57 = vmul.f32 %v1447_v9, %v1418_v34 }
 0x267   : > { %v1457_v2 = vmul.f32 %v1447_v9, %v1419_v36  ;;  %v1458_v61 = vmul.f32 %v1447_v9, %v1420_v47  ;;  %v1459_v11 = vmul.f32 %v1447_v9, %v1421_v38  ;;  %v1460_v56 = vmul.f32 %v1447_v9, %v1422_v41 }
 0x268   : > { %v1461_v33 = vmul.f32 %v1447_v9, %v1423_v42  ;;  %v1462_v17 = vmul.f32 %v1447_v9, %v1424_v45  ;;  %v1463_v39 = vmul.f32 %v1447_v9, %v1425_v52  ;;  %v1464_v1 = vmul.f32 %v1447_v9, %v1426_v54 }
 0x269   : > { %v1465_v40 = vmul.f32 %v1447_v9, %v1427_v58  ;;  %v1466_v10 = vmul.f32 %v1447_v9, %v1428_v62  ;;  %v1467_v59 = vmul.f32 %v1447_v9, %v1429_v63  ;;  %v1468_v60 = vmul.f32 %v1447_v9, %v1430_v0 }
 0x26a   : > { %v1469_v37 = vmul.f32 %v1447_v9, %v1431_v6  ;;  %v1470_v3 = vmul.f32 %v1447_v9, %v1432_v7  ;;  %v1471_v30 = vmul.f32 %v1447_v9, %v1433_v12  ;;  %v1472_v4 = vmul.f32 %v1447_v9, %v1434_v13 }
 0x26b   : > { %v1473_v14 = vmul.f32 %v1447_v9, %v1435_v24  ;;  %v1474_v15 = vmul.f32 %v1447_v9, %v1436_v25  ;;  %v1475_v18 = vmul.f32 %v1447_v9, %v1437_v31  ;;  %v1476_v19 = vmul.f32 %v1447_v9, %v1438_v32 }
 0x26c   : > { %v1477_v21 = vmul.f32 %v1447_v9, %v1439_v43  ;;  %v1478_v22 = vmul.f32 %v1447_v9, %v1440_v44  ;;  %v1479_v23 = vmul.f32 %v1447_v9, %v1441_v50  ;;  %v1480_v26 = vmul.f32 %v1447_v9, %v1442_v53 }
 0x26d   : > { %v2771_v27 = vadd.f32 %v1485_v20, %v1449_v28  ;;  %v2773_v35 = vadd.f32 %v1485_v20, %v1450_v48  ;;  %v2775_v51 = vadd.f32 %v1485_v20, %v1451_v46  ;;  %v2777_v29 = vadd.f32 %v1485_v20, %v1452_v5 }
 0x26e   : > { %v2779_v8 = vadd.f32 %v1485_v20, %v1453_v55  ;;  %v2781_v34 = vadd.f32 %v1485_v20, %v1454_v49  ;;  %v2783_v36 = vadd.f32 %v1485_v20, %v1455_v16  ;;  %v2785_v47 = vadd.f32 %v1485_v20, %v1456_v57 }
 0x26f   : > { %v2787_v38 = vadd.f32 %v1485_v20, %v1457_v2  ;;  %v2789_v41 = vadd.f32 %v1485_v20, %v1458_v61  ;;  %v2791_v42 = vadd.f32 %v1485_v20, %v1459_v11  ;;  %v2793_v45 = vadd.f32 %v1485_v20, %v1460_v56 }
 0x270   : > { %v2795_v52 = vadd.f32 %v1485_v20, %v1461_v33  ;;  %v2797_v54 = vadd.f32 %v1485_v20, %v1462_v17  ;;  %v2799_v58 = vadd.f32 %v1485_v20, %v1463_v39  ;;  %v2801_v62 = vadd.f32 %v1485_v20, %v1464_v1 }
 0x271   : > { %v2803_v63 = vadd.f32 %v1485_v20, %v1465_v40  ;;  %v1504_v0 = vadd.f32 %v1485_v20, %v1466_v10  ;;  %v1505_v9 = vadd.f32 %v1485_v20, %v1467_v59  ;;  %v1506_v6 = vadd.f32 %v1485_v20, %v1468_v60 }
 0x272   : > { %v2805_v7 = vadd.f32 %v1485_v20, %v1469_v37  ;;  %v1508_v12 = vadd.f32 %v1485_v20, %v1470_v3  ;;  %v1509_v13 = vadd.f32 %v1485_v20, %v1471_v30  ;;  %v1510_v24 = vadd.f32 %v1485_v20, %v1472_v4 }
 0x273   : > { %v2807_v25 = vadd.f32 %v1485_v20, %v1473_v14  ;;  %v1512_v31 = vadd.f32 %v1485_v20, %v1474_v15  ;;  %v1513_v32 = vadd.f32 %v1485_v20, %v1475_v18  ;;  %v1514_v43 = vadd.f32 %v1485_v20, %v1476_v19 }
 0x274   : > { %v2809_v44 = vadd.f32 %v1485_v20, %v1477_v21  ;;  %v1516_v50 = vadd.f32 %v1485_v20, %v1478_v22  ;;  %v1517_v53 = vadd.f32 %v1485_v20, %v1479_v23  ;;  %v1518_v28 = vadd.f32 %v1485_v20, %v1480_v26 }
 0x275   : > { %v1519_v48 = vmax.f32 %v2771_v27, 0.0  ;;  %v1520_v46 = vmax.f32 %v2773_v35, 0.0  ;;  %v1521_v5 = vmax.f32 %v2775_v51, 0.0  ;;  %v1522_v55 = vmax.f32 %v2777_v29, 0.0 }
 0x276   : > { %v1523_v49 = vmax.f32 %v2779_v8, 0.0  ;;  %v1524_v16 = vmax.f32 %v2781_v34, 0.0  ;;  %v1525_v57 = vmax.f32 %v2783_v36, 0.0  ;;  %v1526_v2 = vmax.f32 %v2785_v47, 0.0 }
 0x277   : > { %v1527_v61 = vmax.f32 %v2787_v38, 0.0  ;;  %v1528_v11 = vmax.f32 %v2789_v41, 0.0  ;;  %v1529_v56 = vmax.f32 %v2791_v42, 0.0  ;;  %v1530_v33 = vmax.f32 %v2793_v45, 0.0 }
 0x278   : > { %v1531_v17 = vmax.f32 %v2795_v52, 0.0  ;;  %v1532_v39 = vmax.f32 %v2797_v54, 0.0  ;;  %v1533_v1 = vmax.f32 %v2799_v58, 0.0  ;;  %v1534_v40 = vmax.f32 %v2801_v62, 0.0 }
 0x279   : > { %v1535_v10 = vmax.f32 %v2803_v63, 0.0  ;;  %v1536_v59 = vmax.f32 %v1504_v0, 0.0  ;;  %v1537_v60 = vmax.f32 %v1505_v9, 0.0  ;;  %v1538_v37 = vmax.f32 %v1506_v6, 0.0 }
 0x27a   : > { %v1539_v3 = vmax.f32 %v2805_v7, 0.0  ;;  %v1540_v30 = vmax.f32 %v1508_v12, 0.0  ;;  %v1541_v4 = vmax.f32 %v1509_v13, 0.0  ;;  %v1542_v14 = vmax.f32 %v1510_v24, 0.0 }
 0x27b   : > { %v1543_v15 = vmax.f32 %v2807_v25, 0.0  ;;  %v1544_v18 = vmax.f32 %v1512_v31, 0.0  ;;  %v1545_v19 = vmax.f32 %v1513_v32, 0.0  ;;  %v1546_v20 = vmax.f32 %v1514_v43, 0.0 }
 0x27c   : > { %v1547_v21 = vmax.f32 %v2809_v44, 0.0  ;;  %v1548_v22 = vmax.f32 %v1516_v50, 0.0  ;;  %v1549_v23 = vmax.f32 %v1517_v53, 0.0  ;;  %v1550_v26 = vmax.f32 %v1518_v28, 0.0 }
 0x27d   : > { %v1583_v27 = vrot.slane %v1520_v46, 6  ;;  %v1584_v35 = vrot.slane %v1521_v5, 4  ;;  %v1585_v51 = vrot.slane %v1522_v55, 2  ;;  %v1586_v29 = vrot.slane %v1524_v16, 6 }
 0x27e   : > { %v1587_v8 = vrot.slane %v1525_v57, 4  ;;  %v1588_v34 = vrot.slane %v1526_v2, 2  ;;  %v1589_v36 = vrot.slane %v1528_v11, 6  ;;  %v1590_v47 = vrot.slane %v1529_v56, 4 }
 0x27f   : > { %v1591_v38 = vrot.slane %v1530_v33, 2  ;;  %v1592_v41 = vrot.slane %v1532_v39, 6  ;;  %v1593_v42 = vrot.slane %v1533_v1, 4  ;;  %v1594_v45 = vrot.slane %v1534_v40, 2 }
 0x280   : > { %v1595_v52 = vrot.slane %v1536_v59, 6  ;;  %v1596_v54 = vrot.slane %v1537_v60, 4  ;;  %v1597_v58 = vrot.slane %v1538_v37, 2  ;;  %v1598_v62 = vrot.slane %v1540_v30, 6 }
 0x281   : > { %v1599_v63 = vrot.slane %v1541_v4, 4  ;;  %v1600_v0 = vrot.slane %v1542_v14, 2  ;;  %v1601_v9 = vrot.slane %v1544_v18, 6  ;;  %v1602_v6 = vrot.slane %v1545_v19, 4 }
 0x282   : > { %v1603_v7 = vrot.slane %v1546_v20, 2  ;;  %v1604_v12 = vrot.slane %v1548_v22, 6  ;;  %v1605_v13 = vrot.slane %v1549_v23, 4  ;;  %v1606_v24 = vrot.slane %v1550_v26, 2 }
 0x283   : > { %v1607_v25 = vsel %vm684_vm0, %v1519_v48, %v1583_v27  ;;  %v1609_v31 = vsel %vm1608_vm6, %v1584_v35, %v1585_v51  ;;  %v1612_v32 = vsel %vm684_vm0, %v1523_v49, %v1586_v29  ;;  %v1613_v43 = vsel %vm1608_vm6, %v1587_v8, %v1588_v34 }
 0x284   : > { %v1611_v44 = vsel %vm1610_vm7, %v1607_v25, %v1609_v31  ;;  %v1614_v50 = vsel %vm1610_vm7, %v1612_v32, %v1613_v43  ;;  %v1615_v53 = vsel %vm684_vm0, %v1527_v61, %v1589_v36  ;;  %v1616_v28 = vsel %vm1608_vm6, %v1590_v47, %v1591_v38 }
 0x285   : > { %v1617_v46 = vsel %vm1610_vm7, %v1615_v53, %v1616_v28  ;;  %v1618_v48 = vsel %vm684_vm0, %v1531_v17, %v1592_v41  ;;  %v1619_v5 = vsel %vm1608_vm6, %v1593_v42, %v1594_v45  ;;  %v1621_v55 = vsel %vm684_vm0, %v1535_v10, %v1595_v52  ;;  %1641 = vst [vmem:[%s2835_s30] sm:$0xff] %v1611_v44 }
 0x286   : > { %v1620_v49 = vsel %vm1610_vm7, %v1618_v48, %v1619_v5  ;;  %v1622_v16 = vsel %vm1608_vm6, %v1596_v54, %v1597_v58  ;;  %v1624_v57 = vsel %vm684_vm0, %v1539_v3, %v1598_v62  ;;  %v1625_v2 = vsel %vm1608_vm6, %v1599_v63, %v1600_v0  ;;  %1642 = vst [vmem:[%s2835_s30 + $0x8] sm:$0xff] %v1614_v50 }
 0x287   : > { %v1623_v61 = vsel %vm1610_vm7, %v1621_v55, %v1622_v16  ;;  %v1626_v11 = vsel %vm1610_vm7, %v1624_v57, %v1625_v2  ;;  %v1627_v56 = vsel %vm684_vm0, %v1543_v15, %v1601_v9  ;;  %v1628_v33 = vsel %vm1608_vm6, %v1602_v6, %v1603_v7  ;;  %1643 = vst [vmem:[%s2835_s30 + $0x10] sm:$0xff] %v1617_v46 }
 0x288   : > { %v1629_v17 = vsel %vm1610_vm7, %v1627_v56, %v1628_v33  ;;  %v1630_v39 = vsel %vm684_vm0, %v1547_v21, %v1604_v12  ;;  %v1631_v1 = vsel %vm1608_vm6, %v1605_v13, %v1606_v24  ;;  %1644 = vst [vmem:[%s2835_s30 + $0x18] sm:$0xff] %v1620_v49 }
 0x289   : > { %v1632_v40 = vsel %vm1610_vm7, %v1630_v39, %v1631_v1  ;;  %1645 = vst [vmem:[%s2835_s30 + $0x20] sm:$0xff] %v1623_v61 }
 0x28a   : > { %1646 = vst [vmem:[%s2835_s30 + $0x28] sm:$0xff] %v1626_v11 }
 0x28b   : > { %1647 = vst [vmem:[%s2835_s30 + $0x30] sm:$0xff] %v1629_v17 }
 0x28c   : > { %1648 = vst [vmem:[%s2835_s30 + $0x38] sm:$0xff] %v1632_v40 }
 0x28d PF: > { %s14_s15 = sadd.s32 1, %s2090_s15  }
 0x28e   : > { %p11_p4 = scmp.ge.s32.totalorder %s14_s15, 4  }
 0x290   :  { %13 = sbr.rel (!%p11_p4) target bundleno = 1 (0x1), region = 66 }

// kernel: generator_forward.15
= control target key start
LH: loop header
LB: loop body
LE: loop exit
PB: predicated region body
PF: predicated region fallthrough
CT: control target
= control target key end

     0   :  { %s3130_s9 = smov 0   ;;  %s3693_s0 = inlined_call_operand.vmem [shape: bf16[6,98], index: 0, kind: input, shape index: {}]   ;;  %s3694_s1 = inlined_call_operand.vmem [shape: bf16[2,98,4096], index: 1, kind: input, shape index: {}]   ;;  %s3695_s2 = inlined_call_operand.vmem [shape: f32[2,6,4096], index: 2, kind: output, shape index: {}]  }
   0x1 LB: > { %s2030_s10 = sadd.s32 4294967295, %s3113_s9   ;;  %p2034_p0 = scmp.ge.s32.totalorder %s3113_s9, 1  ;;  %s3113_s9 = sphi %s3130_s9, %s12_s9  }
   0x2   : > { %p112_p1 = scmp.lt.s32.totalorder %s3113_s9, 3 }
   0x4   : > { %p113_p2 = pnand %p2034_p0, %p112_p1 }
   0x5   : > { %p134_p3 = scmp.lt.s32.totalorder (!%p113_p2), %s2030_s10, 1 }
   0x6   : > { %116 = sbr.rel (%p113_p2) target bundleno = 386 (0x182), region = 28 }
   0xb   : > { %s3697_s10 = smov (!%p134_p3, %s2030_s10), 1  ;;  %vm1398_vm0 = vcmask 1040384   ;;  %vm1394_vm1 = vcmask 801792  }
   0xc   : > { %s3033_s11 = smul.u32 1664, %s3697_s10  ;;  %s2840_s17 = sshll.u32 %s3697_s10, 8 }
   0xd   : > { %s3554_s22 = scalar_lea.vmem %s3695_s2, %s2840_s17 }
   0xe   : > { %s3144_s14 = scalar_lea.vmem %s3694_s1, %s3033_s11 }
   0xf   : > { %v338_v0 = vld [vmem:[%s3144_s14 + $0x600] sm:$0x11]  ;;  %v339_v1 = vld [vmem:[%s3144_s14 + $0x608] sm:$0x11]  ;;  %v340_v63 = vld [vmem:[%s3144_s14 + $0x610] sm:$0x11] }
  0x10   : > { %v946_v2 = vunpack.c.l.b16 %v338_v0  ;;  %v947_v3 = vunpack.c.h.b16 %v338_v0  ;;  %v948_v4 = vunpack.c.l.b16 %v339_v1  ;;  %v949_v5 = vunpack.c.h.b16 %v339_v1  ;;  %v2680_v6 = vld [vmem:[%s3144_s14 + $0x500] sm:$0xf]  ;;  %v3001_v12 = vld [vmem:[%s3144_s14 + $0x504] sm:$0xf]  ;;  %v2688_v14 = vld [vmem:[%s3144_s14 + $0x508] sm:$0xf] }
  0x11   : > { %v3017_v7 = vld [vmem:[%s3144_s14 + $0x57c] sm:$0xf0]  ;;  %v2682_v13 = vld [vmem:[%s3144_s14 + $0x580] sm:$0xf0]  ;;  %v3018_v15 = vld [vmem:[%s3144_s14 + $0x584] sm:$0xf0] }
  0x12   : > { %v1170_v8 = vpack.c.b16 %v946_v2, %v946_v2  ;;  %v1171_v9 = vpack.c.b16 %v947_v3, %v947_v3  ;;  %v1172_v10 = vpack.c.b16 %v948_v4, %v948_v4  ;;  %v1173_v11 = vpack.c.b16 %v949_v5, %v949_v5  ;;  %v3002_v16 = vld [vmem:[%s3144_s14 + $0x50c] sm:$0xf]  ;;  %v2552_v24 = vld [vmem:[%s3144_s14 + $0x400] sm:$0xf]  ;;  %v2969_v28 = vld [vmem:[%s3144_s14 + $0x404] sm:$0xf] }
  0x13   : > { %v2690_v17 = vld [vmem:[%s3144_s14 + $0x588] sm:$0xf0]  ;;  %v2681_v22 = vor.u32 %v3017_v7, %v2680_v6  ;;  %v2685_v23 = vor.u32 %v3001_v12, %v2682_v13  ;;  %v2985_v25 = vld [vmem:[%s3144_s14 + $0x47c] sm:$0xf0]  ;;  %v2689_v26 = vor.u32 %v3018_v15, %v2688_v14  ;;  %v2554_v29 = vld [vmem:[%s3144_s14 + $0x480] sm:$0xf0] }
  0x14   : > { %v1400_v18 = vsel %vm1398_vm0, %v1170_v8, 0  ;;  %v1403_v19 = vsel %vm1398_vm0, %v1171_v9, 0  ;;  %v1406_v20 = vsel %vm1398_vm0, %v1172_v10, 0  ;;  %v1409_v21 = vsel %vm1398_vm0, %v1173_v11, 0  ;;  %v2560_v30 = vld [vmem:[%s3144_s14 + $0x408] sm:$0xf] }
  0x15   : > { %1496 = vmatpush.bf16.msra.mxu0 %v1400_v18  ;;  %1509 = vmatpush.bf16.msra.mxu1 %v1403_v19  ;;  %v2693_v27 = vor.u32 %v3002_v16, %v2690_v17  ;;  %v2986_v31 = vld [vmem:[%s3144_s14 + $0x484] sm:$0xf0]  ;;  %v2970_v32 = vld [vmem:[%s3144_s14 + $0x40c] sm:$0xf]  ;;  %v2553_v34 = vor.u32 %v2985_v25, %v2552_v24  ;;  %v2557_v35 = vor.u32 %v2969_v28, %v2554_v29  ;;  %v2424_v36 = vld [vmem:[%s3144_s14 + $0x300] sm:$0xf]  ;;  %v950_v8 = vunpack.c.l.b16 %v340_v63 }
  0x16   : > { %1522 = vmatpush.bf16.msra.mxu2 %v1406_v20  ;;  %1535 = vmatpush.bf16.msra.mxu3 %v1409_v21  ;;  %v2562_v33 = vld [vmem:[%s3144_s14 + $0x488] sm:$0xf0]  ;;  %v2953_v37 = vld [vmem:[%s3144_s14 + $0x37c] sm:$0xf0]  ;;  %v2561_v38 = vor.u32 %v2986_v31, %v2560_v30  ;;  %v2937_v40 = vld [vmem:[%s3144_s14 + $0x304] sm:$0xf]  ;;  %v951_v9 = vunpack.c.h.b16 %v340_v63 }
  0x17   : > { %v2565_v39 = vor.u32 %v2970_v32, %v2562_v33  ;;  %v2426_v41 = vld [vmem:[%s3144_s14 + $0x380] sm:$0xf0]  ;;  %v2432_v42 = vld [vmem:[%s3144_s14 + $0x308] sm:$0xf]  ;;  %v2938_v44 = vld [vmem:[%s3144_s14 + $0x30c] sm:$0xf]  ;;  %v2425_v46 = vor.u32 %v2953_v37, %v2424_v36  ;;  %v1174_v25 = vpack.c.b16 %v950_v8, %v950_v8 }
  0x18   : > { %v2954_v43 = vld [vmem:[%s3144_s14 + $0x384] sm:$0xf0]  ;;  %v2434_v45 = vld [vmem:[%s3144_s14 + $0x388] sm:$0xf0]  ;;  %v2429_v47 = vor.u32 %v2937_v40, %v2426_v41  ;;  %v2296_v48 = vld [vmem:[%s3144_s14 + $0x200] sm:$0xf] }
  0x19   : > { %1497 = vmatpush.bf16.msra.mxu0 %v2681_v22  ;;  %1510 = vmatpush.bf16.msra.mxu1 %v2685_v23  ;;  %v2921_v49 = vld [vmem:[%s3144_s14 + $0x27c] sm:$0xf0]  ;;  %v2433_v50 = vor.u32 %v2954_v43, %v2432_v42  ;;  %v2437_v51 = vor.u32 %v2938_v44, %v2434_v45  ;;  %v2905_v52 = vld [vmem:[%s3144_s14 + $0x204] sm:$0xf]  ;;  %v2304_v54 = vld [vmem:[%s3144_s14 + $0x208] sm:$0xf] }
  0x1a   : > { %1523 = vmatpush.bf16.msra.mxu2 %v2689_v26  ;;  %1536 = vmatpush.bf16.msra.mxu3 %v2693_v27  ;;  %v2298_v53 = vld [vmem:[%s3144_s14 + $0x280] sm:$0xf0]  ;;  %v2922_v55 = vld [vmem:[%s3144_s14 + $0x284] sm:$0xf0]  ;;  %v2906_v56 = vld [vmem:[%s3144_s14 + $0x20c] sm:$0xf]  ;;  %v2297_v59 = vor.u32 %v2921_v49, %v2296_v48  ;;  %v1175_v26 = vpack.c.b16 %v951_v9, %v951_v9 }
  0x1b   : > { %v2306_v57 = vld [vmem:[%s3144_s14 + $0x288] sm:$0xf0]  ;;  %v2168_v58 = vld [vmem:[%s3144_s14 + $0x100] sm:$0xf]  ;;  %v2301_v60 = vor.u32 %v2905_v52, %v2298_v53  ;;  %v2873_v62 = vld [vmem:[%s3144_s14 + $0x104] sm:$0xf]  ;;  %v2305_v0 = vor.u32 %v2922_v55, %v2304_v54 }
  0x1c   : > { %v2889_v61 = vld [vmem:[%s3144_s14 + $0x17c] sm:$0xf0]  ;;  %v2309_v1 = vor.u32 %v2906_v56, %v2306_v57  ;;  %v2170_v2 = vld [vmem:[%s3144_s14 + $0x180] sm:$0xf0]  ;;  %v2176_v3 = vld [vmem:[%s3144_s14 + $0x108] sm:$0xf] }
  0x1d   : > { %1498 = vmatpush.bf16.msra.mxu0 %v2553_v34  ;;  %1511 = vmatpush.bf16.msra.mxu1 %v2557_v35  ;;  %v341_v4 = vld [vmem:[%s3144_s14 + $0x618] sm:$0x11]  ;;  %v2890_v5 = vld [vmem:[%s3144_s14 + $0x184] sm:$0xf0]  ;;  %v2874_v6 = vld [vmem:[%s3144_s14 + $0x10c] sm:$0xf]  ;;  %v2169_v10 = vor.u32 %v2889_v61, %v2168_v58  ;;  %v2173_v11 = vor.u32 %v2873_v62, %v2170_v2 }
  0x1e   : > { %1524 = vmatpush.bf16.msra.mxu2 %v2561_v38  ;;  %1537 = vmatpush.bf16.msra.mxu3 %v2565_v39  ;;  %v2178_v7 = vld [vmem:[%s3144_s14 + $0x188] sm:$0xf0]  ;;  %v2040_v12 = vld [vmem:[%s3144_s14] sm:$0xf]  ;;  %v952_v14 = vunpack.c.l.b16 %v341_v4  ;;  %v953_v15 = vunpack.c.h.b16 %v341_v4  ;;  %v2177_v16 = vor.u32 %v2890_v5, %v2176_v3  ;;  %v2841_v18 = vld [vmem:[%s3144_s14 + $0x4] sm:$0xf] }
  0x1f   : > { %v2857_v13 = vld [vmem:[%s3144_s14 + $0x7c] sm:$0xf0]  ;;  %v2181_v17 = vor.u32 %v2874_v6, %v2178_v7  ;;  %v2042_v19 = vld [vmem:[%s3144_s14 + $0x80] sm:$0xf0]  ;;  %v2048_v20 = vld [vmem:[%s3144_s14 + $0x8] sm:$0xf] }
  0x20   : > { %v2858_v21 = vld [vmem:[%s3144_s14 + $0x84] sm:$0xf0]  ;;  %v2842_v22 = vld [vmem:[%s3144_s14 + $0xc] sm:$0xf]  ;;  %v2041_v24 = vor.u32 %v2857_v13, %v2040_v12  ;;  %v2045_v27 = vor.u32 %v2841_v18, %v2042_v19  ;;  %v1176_v28 = vpack.c.b16 %v952_v14, %v952_v14  ;;  %v1177_v29 = vpack.c.b16 %v953_v15, %v953_v15  ;;  %v2696_v32 = vld [vmem:[%s3144_s14 + $0x510] sm:$0xf] }
  0x21   : > { %1499 = vmatpush.bf16.msra.mxu0 %v2425_v46  ;;  %1512 = vmatpush.bf16.msra.mxu1 %v2429_v47  ;;  %v2050_v23 = vld [vmem:[%s3144_s14 + $0x88] sm:$0xf0]  ;;  %v2049_v30 = vor.u32 %v2858_v21, %v2048_v20  ;;  %v3019_v33 = vld [vmem:[%s3144_s14 + $0x58c] sm:$0xf0]  ;;  %v3003_v34 = vld [vmem:[%s3144_s14 + $0x514] sm:$0xf] }
  0x22   : > { %1525 = vmatpush.bf16.msra.mxu2 %v2433_v50  ;;  %1538 = vmatpush.bf16.msra.mxu3 %v2437_v51  ;;  %v2053_v31 = vor.u32 %v2842_v22, %v2050_v23  ;;  %v2698_v35 = vld [vmem:[%s3144_s14 + $0x590] sm:$0xf0]  ;;  %v1412_v36 = vsel %vm1398_vm0, %v1174_v25, 0  ;;  %v1415_v37 = vsel %vm1398_vm0, %v1175_v26, 0  ;;  %v2704_v38 = vld [vmem:[%s3144_s14 + $0x518] sm:$0xf]  ;;  %v2697_v45 = vor.u32 %v3019_v33, %v2696_v32 }
  0x23   : > { %v3020_v39 = vld [vmem:[%s3144_s14 + $0x594] sm:$0xf0]  ;;  %v1418_v40 = vsel %vm1398_vm0, %v1176_v28, 0  ;;  %v1421_v41 = vsel %vm1398_vm0, %v1177_v29, 0  ;;  %v3004_v42 = vld [vmem:[%s3144_s14 + $0x51c] sm:$0xf]  ;;  %v2701_v46 = vor.u32 %v3003_v34, %v2698_v35 }
  0x24   : > { %v2706_v43 = vld [vmem:[%s3144_s14 + $0x598] sm:$0xf0]  ;;  %v3217_v44 = vld [vmem:[%s3693_s0] sm:$0x7]  ;;  %v2568_v47 = vld [vmem:[%s3144_s14 + $0x410] sm:$0xf]  ;;  %v2705_v49 = vor.u32 %v3020_v39, %v2704_v38 }
  0x25   : > { %1500 = vmatpush.bf16.msra.mxu0 %v2297_v59  ;;  %1513 = vmatpush.bf16.msra.mxu1 %v2301_v60  ;;  %v2987_v48 = vld [vmem:[%s3144_s14 + $0x48c] sm:$0xf0]  ;;  %v2709_v50 = vor.u32 %v3004_v42, %v2706_v43  ;;  %v2971_v51 = vld [vmem:[%s3144_s14 + $0x414] sm:$0xf]  ;;  %v2576_v53 = vld [vmem:[%s3144_s14 + $0x418] sm:$0xf] }
  0x26   : > { %1526 = vmatpush.bf16.msra.mxu2 %v2305_v0  ;;  %1539 = vmatpush.bf16.msra.mxu3 %v2309_v1  ;;  %v2570_v52 = vld [vmem:[%s3144_s14 + $0x490] sm:$0xf0]  ;;  %v2988_v54 = vld [vmem:[%s3144_s14 + $0x494] sm:$0xf0]  ;;  %v2972_v55 = vld [vmem:[%s3144_s14 + $0x41c] sm:$0xf]  ;;  %v2569_v57 = vor.u32 %v2987_v48, %v2568_v47 }
  0x27   : > { %v2578_v56 = vld [vmem:[%s3144_s14 + $0x498] sm:$0xf0]  ;;  %v2573_v58 = vor.u32 %v2971_v51, %v2570_v52  ;;  %v2440_v59 = vld [vmem:[%s3144_s14 + $0x310] sm:$0xf]  ;;  %v2577_v61 = vor.u32 %v2988_v54, %v2576_v53  ;;  %v2939_v63 = vld [vmem:[%s3144_s14 + $0x314] sm:$0xf] }
  0x28   : > { %v2955_v60 = vld [vmem:[%s3144_s14 + $0x38c] sm:$0xf0]  ;;  %v2581_v62 = vor.u32 %v2972_v55, %v2578_v56  ;;  %v2442_v0 = vld [vmem:[%s3144_s14 + $0x390] sm:$0xf0]  ;;  %v2448_v1 = vld [vmem:[%s3144_s14 + $0x318] sm:$0xf] }
  0x29   : > { %1501 = vmatpush.bf16.msra.mxu0 %v2169_v10  ;;  %1514 = vmatpush.bf16.msra.mxu1 %v2173_v11  ;;  %v2956_v2 = vld [vmem:[%s3144_s14 + $0x394] sm:$0xf0]  ;;  %v2940_v3 = vld [vmem:[%s3144_s14 + $0x31c] sm:$0xf]  ;;  %v2441_v5 = vor.u32 %v2955_v60, %v2440_v59  ;;  %v2445_v6 = vor.u32 %v2939_v63, %v2442_v0  ;;  %v2312_v7 = vld [vmem:[%s3144_s14 + $0x210] sm:$0xf] }
  0x2a   : > { %1527 = vmatpush.bf16.msra.mxu2 %v2177_v16  ;;  %1540 = vmatpush.bf16.msra.mxu3 %v2181_v17  ;;  %v2450_v4 = vld [vmem:[%s3144_s14 + $0x398] sm:$0xf0]  ;;  %v2923_v8 = vld [vmem:[%s3144_s14 + $0x28c] sm:$0xf0]  ;;  %v2449_v9 = vor.u32 %v2956_v2, %v2448_v1  ;;  %v2907_v11 = vld [vmem:[%s3144_s14 + $0x214] sm:$0xf] }
  0x2b   : > { %v2453_v10 = vor.u32 %v2940_v3, %v2450_v4  ;;  %v2314_v12 = vld [vmem:[%s3144_s14 + $0x290] sm:$0xf0]  ;;  %v2320_v13 = vld [vmem:[%s3144_s14 + $0x218] sm:$0xf]  ;;  %v2908_v15 = vld [vmem:[%s3144_s14 + $0x21c] sm:$0xf]  ;;  %v2313_v18 = vor.u32 %v2923_v8, %v2312_v7 }
  0x2c   : > { %v2924_v14 = vld [vmem:[%s3144_s14 + $0x294] sm:$0xf0]  ;;  %v2322_v16 = vld [vmem:[%s3144_s14 + $0x298] sm:$0xf0]  ;;  %v2184_v17 = vld [vmem:[%s3144_s14 + $0x110] sm:$0xf]  ;;  %v2317_v19 = vor.u32 %v2907_v11, %v2314_v12 }
  0x2d   : > { %1502 = vmatpush.bf16.msra.mxu0 %v2041_v24  ;;  %1515 = vmatpush.bf16.msra.mxu1 %v2045_v27  ;;  %v2891_v20 = vld [vmem:[%s3144_s14 + $0x18c] sm:$0xf0]  ;;  %v2875_v21 = vld [vmem:[%s3144_s14 + $0x114] sm:$0xf]  ;;  %v342_v22 = vld [vmem:[%s3144_s14 + $0x620] sm:$0x11]  ;;  %v2321_v23 = vor.u32 %v2924_v14, %v2320_v13  ;;  %v2325_v24 = vor.u32 %v2908_v15, %v2322_v16 }
  0x2e   : > { %1528 = vmatpush.bf16.msra.mxu2 %v2049_v30  ;;  %1541 = vmatpush.bf16.msra.mxu3 %v2053_v31  ;;  %v2186_v25 = vld [vmem:[%s3144_s14 + $0x190] sm:$0xf0]  ;;  %v2192_v26 = vld [vmem:[%s3144_s14 + $0x118] sm:$0xf]  ;;  %v343_v27 = vld [vmem:[%s3144_s14 + $0x628] sm:$0x11]  ;;  %v954_v31 = vunpack.c.l.b16 %v342_v22  ;;  %v955_v32 = vunpack.c.h.b16 %v342_v22  ;;  %v2185_v33 = vor.u32 %v2891_v20, %v2184_v17 }
  0x2f   : > { %v2892_v28 = vld [vmem:[%s3144_s14 + $0x194] sm:$0xf0]  ;;  %v2876_v29 = vld [vmem:[%s3144_s14 + $0x11c] sm:$0xf]  ;;  %v2189_v34 = vor.u32 %v2875_v21, %v2186_v25  ;;  %v2056_v35 = vld [vmem:[%s3144_s14 + $0x10] sm:$0xf]  ;;  %v957_v38 = vunpack.c.h.b16 %v343_v27 }
  0x30   : > { %2806 = vmatmul.msk.bf16.vlgmr.msra.gmra.mxu0 %vm1394_vm1, %v3217_v44  ;;  %2807 = vmatmul.msk.bf16.vlgmr.msra.gmra.mxu1 %vm1394_vm1, %v3217_v44  ;;  %v2194_v30 = vld [vmem:[%s3144_s14 + $0x198] sm:$0xf0]  ;;  %v2193_v39 = vor.u32 %v2892_v28, %v2192_v26  ;;  %v2058_v42 = vld [vmem:[%s3144_s14 + $0x90] sm:$0xf0]  ;;  %v2064_v43 = vld [vmem:[%s3144_s14 + $0x18] sm:$0xf] }
  0x31   : > { %1548 = vmatpush.bf16.msrb.mxu0 %v1412_v36  ;;  %1561 = vmatpush.bf16.msrb.mxu1 %v1415_v37  ;;  %v2859_v36 = vld [vmem:[%s3144_s14 + $0x8c] sm:$0xf0]  ;;  %v956_v37 = vunpack.c.l.b16 %v343_v27  ;;  %v2066_v47 = vld [vmem:[%s3144_s14 + $0x98] sm:$0xf0]  ;;  %v1181_v53 = vpack.c.b16 %v957_v38, %v957_v38  ;;  %v2712_v56 = vld [vmem:[%s3144_s14 + $0x520] sm:$0xf] }
  0x32   : > { %1574 = vmatpush.bf16.msrb.mxu2 %v1418_v40  ;;  %1587 = vmatpush.bf16.msrb.mxu3 %v1421_v41  ;;  %v2197_v40 = vor.u32 %v2876_v29, %v2194_v30  ;;  %v2843_v41 = vld [vmem:[%s3144_s14 + $0x14] sm:$0xf]  ;;  %v2057_v48 = vor.u32 %v2859_v36, %v2056_v35  ;;  %v2714_v59 = vld [vmem:[%s3144_s14 + $0x5a0] sm:$0xf0]  ;;  %v3022_v63 = vld [vmem:[%s3144_s14 + $0x5a4] sm:$0xf0] }
  0x33   : > { %2808 = vmatmul.msk.bf16.vlgmr.msra.gmra.mxu2 %vm1394_vm1, %v3217_v44  ;;  %2809 = vmatmul.msk.bf16.vlgmr.msra.gmra.mxu3 %vm1394_vm1, %v3217_v44  ;;  %v2061_v51 = vor.u32 %v2843_v41, %v2058_v42  ;;  %v1180_v52 = vpack.c.b16 %v956_v37, %v956_v37  ;;  %v1433_v1 = vsel %vm1398_vm0, %v1181_v53, 0  ;;  %v3006_v2 = vld [vmem:[%s3144_s14 + $0x52c] sm:$0xf]  ;;  %v2989_v7 = vld [vmem:[%s3144_s14 + $0x49c] sm:$0xf0] }
  0x34   : > { %v2722_v3 = vld [vmem:[%s3144_s14 + $0x5a8] sm:$0xf0]  ;;  %v2586_v11 = vld [vmem:[%s3144_s14 + $0x4a0] sm:$0xf0]  ;;  %v2592_v12 = vld [vmem:[%s3144_s14 + $0x428] sm:$0xf] }
  0x35   : > { %1549 = vmatpush.bf16.msrb.mxu0 %v2697_v45  ;;  %1562 = vmatpush.bf16.msrb.mxu1 %v2701_v46  ;;  %v2860_v45 = vld [vmem:[%s3144_s14 + $0x94] sm:$0xf0]  ;;  %v2844_v46 = vld [vmem:[%s3144_s14 + $0x1c] sm:$0xf]  ;;  %v1430_v0 = vsel %vm1398_vm0, %v1180_v52, 0 }
  0x36   : > { %1575 = vmatpush.bf16.msrb.mxu2 %v2705_v49  ;;  %1588 = vmatpush.bf16.msrb.mxu3 %v2709_v50  ;;  %v1178_v49 = vpack.c.b16 %v954_v31, %v954_v31  ;;  %v1179_v50 = vpack.c.b16 %v955_v32, %v955_v32  ;;  %v2065_v54 = vor.u32 %v2860_v45, %v2064_v43  ;;  %v2990_v13 = vld [vmem:[%s3144_s14 + $0x4a4] sm:$0xf0]  ;;  %v2974_v14 = vld [vmem:[%s3144_s14 + $0x42c] sm:$0xf]  ;;  %v2941_v22 = vld [vmem:[%s3144_s14 + $0x324] sm:$0xf] }
  0x37   : > { %v2069_v55 = vor.u32 %v2844_v46, %v2066_v47  ;;  %v2594_v15 = vld [vmem:[%s3144_s14 + $0x4a8] sm:$0xf0]  ;;  %v2593_v20 = vor.u32 %v2990_v13, %v2592_v12  ;;  %v2958_v25 = vld [vmem:[%s3144_s14 + $0x3a4] sm:$0xf0]  ;;  %v2328_v30 = vld [vmem:[%s3144_s14 + $0x220] sm:$0xf] }
  0x38   : > { %v1424_v60 = vsel %vm1398_vm0, %v1178_v49, 0  ;;  %v2597_v21 = vor.u32 %v2974_v14, %v2594_v15  ;;  %v2942_v26 = vld [vmem:[%s3144_s14 + $0x32c] sm:$0xf]  ;;  %v2925_v31 = vld [vmem:[%s3144_s14 + $0x29c] sm:$0xf0] }
  0x39   : > { %1550 = vmatpush.bf16.msrb.mxu0 %v2569_v57  ;;  %1563 = vmatpush.bf16.msrb.mxu1 %v2573_v58  ;;  %v3021_v57 = vld [vmem:[%s3144_s14 + $0x59c] sm:$0xf0]  ;;  %v3005_v58 = vld [vmem:[%s3144_s14 + $0x524] sm:$0xf]  ;;  %v2466_v27 = vld [vmem:[%s3144_s14 + $0x3a8] sm:$0xf0]  ;;  %v2329_v41 = vor.u32 %v2925_v31, %v2328_v30 }
  0x3a   : > { %1576 = vmatpush.bf16.msrb.mxu2 %v2577_v61  ;;  %1589 = vmatpush.bf16.msrb.mxu3 %v2581_v62  ;;  %v1427_v61 = vsel %vm1398_vm0, %v1179_v50, 0  ;;  %v2720_v62 = vld [vmem:[%s3144_s14 + $0x528] sm:$0xf]  ;;  %v2713_v4 = vor.u32 %v3021_v57, %v2712_v56  ;;  %v2330_v35 = vld [vmem:[%s3144_s14 + $0x2a0] sm:$0xf0] }
  0x3b   : > { %v2721_v8 = vor.u32 %v3022_v63, %v2720_v62  ;;  %v2336_v36 = vld [vmem:[%s3144_s14 + $0x228] sm:$0xf]  ;;  %v2910_v38 = vld [vmem:[%s3144_s14 + $0x22c] sm:$0xf]  ;;  %v2893_v43 = vld [vmem:[%s3144_s14 + $0x19c] sm:$0xf0] }
  0x3c   : > { %v2926_v37 = vld [vmem:[%s3144_s14 + $0x2a4] sm:$0xf0]  ;;  %v2877_v45 = vld [vmem:[%s3144_s14 + $0x124] sm:$0xf]  ;;  %v344_v46 = vld [vmem:[%s3144_s14 + $0x630] sm:$0x11] }
  0x3d   : > { %1551 = vmatpush.bf16.msrb.mxu0 %v2441_v5  ;;  %1564 = vmatpush.bf16.msrb.mxu1 %v2445_v6  ;;  %v2717_v5 = vor.u32 %v3005_v58, %v2714_v59  ;;  %v2584_v6 = vld [vmem:[%s3144_s14 + $0x420] sm:$0xf]  ;;  %v2337_v47 = vor.u32 %v2926_v37, %v2336_v36  ;;  %v2202_v49 = vld [vmem:[%s3144_s14 + $0x1a0] sm:$0xf0]  ;;  %v2208_v50 = vld [vmem:[%s3144_s14 + $0x128] sm:$0xf]  ;;  %v959_v56 = vunpack.c.h.b16 %v344_v46 }
  0x3e   : > { %1577 = vmatpush.bf16.msrb.mxu2 %v2449_v9  ;;  %1590 = vmatpush.bf16.msrb.mxu3 %v2453_v10  ;;  %v2725_v9 = vor.u32 %v3006_v2, %v2722_v3  ;;  %v2973_v10 = vld [vmem:[%s3144_s14 + $0x424] sm:$0xf]  ;;  %v2585_v16 = vor.u32 %v2989_v7, %v2584_v6  ;;  %v2894_v52 = vld [vmem:[%s3144_s14 + $0x1a4] sm:$0xf0]  ;;  %v2878_v53 = vld [vmem:[%s3144_s14 + $0x12c] sm:$0xf]  ;;  %v2205_v58 = vor.u32 %v2877_v45, %v2202_v49 }
  0x3f   : > { %v2589_v17 = vor.u32 %v2973_v10, %v2586_v11  ;;  %v2072_v59 = vld [vmem:[%s3144_s14 + $0x20] sm:$0xf]  ;;  %v2209_v63 = vor.u32 %v2894_v52, %v2208_v50  ;;  %v2074_v2 = vld [vmem:[%s3144_s14 + $0xa0] sm:$0xf0]  ;;  %v2080_v3 = vld [vmem:[%s3144_s14 + $0x28] sm:$0xf] }
  0x40   : > { %v2082_v6 = vld [vmem:[%s3144_s14 + $0xa8] sm:$0xf0]  ;;  %v2728_v15 = vld [vmem:[%s3144_s14 + $0x530] sm:$0xf]  ;;  %v2992_v36 = vld [vmem:[%s3144_s14 + $0x4b4] sm:$0xf0] }
  0x41   : > { %1552 = vmatpush.bf16.msrb.mxu0 %v2313_v18  ;;  %1565 = vmatpush.bf16.msrb.mxu1 %v2317_v19  ;;  %v2456_v18 = vld [vmem:[%s3144_s14 + $0x320] sm:$0xf]  ;;  %v2991_v30 = vld [vmem:[%s3144_s14 + $0x4ac] sm:$0xf0]  ;;  %v2976_v37 = vld [vmem:[%s3144_s14 + $0x43c] sm:$0xf] }
  0x42   : > { %1578 = vmatpush.bf16.msrb.mxu2 %v2321_v23  ;;  %1591 = vmatpush.bf16.msrb.mxu3 %v2325_v24  ;;  %v2957_v19 = vld [vmem:[%s3144_s14 + $0x39c] sm:$0xf0]  ;;  %v2458_v23 = vld [vmem:[%s3144_s14 + $0x3a0] sm:$0xf0]  ;;  %v2464_v24 = vld [vmem:[%s3144_s14 + $0x328] sm:$0xf] }
  0x43   : > { %v2457_v28 = vor.u32 %v2957_v19, %v2456_v18  ;;  %v2461_v29 = vor.u32 %v2941_v22, %v2458_v23  ;;  %v2465_v32 = vor.u32 %v2958_v25, %v2464_v24  ;;  %v2730_v18 = vld [vmem:[%s3144_s14 + $0x5b0] sm:$0xf0]  ;;  %v3024_v22 = vld [vmem:[%s3144_s14 + $0x5b4] sm:$0xf0]  ;;  %v3008_v25 = vld [vmem:[%s3144_s14 + $0x53c] sm:$0xf] }
  0x44   : > { %v2960_v49 = vld [vmem:[%s3144_s14 + $0x3b4] sm:$0xf0]  ;;  %v2944_v50 = vld [vmem:[%s3144_s14 + $0x33c] sm:$0xf] }
  0x45   : > { %1553 = vmatpush.bf16.msrb.mxu0 %v2185_v33  ;;  %1566 = vmatpush.bf16.msrb.mxu1 %v2189_v34  ;;  %v2469_v33 = vor.u32 %v2942_v26, %v2466_v27  ;;  %v2909_v34 = vld [vmem:[%s3144_s14 + $0x224] sm:$0xf]  ;;  %v2738_v26 = vld [vmem:[%s3144_s14 + $0x5b8] sm:$0xf0] }
  0x46   : > { %1579 = vmatpush.bf16.msrb.mxu2 %v2193_v39  ;;  %1592 = vmatpush.bf16.msrb.mxu3 %v2197_v40  ;;  %v2338_v39 = vld [vmem:[%s3144_s14 + $0x2a8] sm:$0xf0]  ;;  %v2200_v40 = vld [vmem:[%s3144_s14 + $0x120] sm:$0xf]  ;;  %v2333_v42 = vor.u32 %v2909_v34, %v2330_v35  ;;  %v2602_v34 = vld [vmem:[%s3144_s14 + $0x4b0] sm:$0xf0] }
  0x47   : > { %v2201_v57 = vor.u32 %v2893_v43, %v2200_v40  ;;  %v2608_v35 = vld [vmem:[%s3144_s14 + $0x438] sm:$0xf] }
  0x48   : > { %v2609_v43 = vor.u32 %v2992_v36, %v2608_v35 }
  0x49   : > { %1554 = vmatpush.bf16.msrb.mxu0 %v2057_v48  ;;  %1567 = vmatpush.bf16.msrb.mxu1 %v2061_v51  ;;  %v2341_v48 = vor.u32 %v2910_v38, %v2338_v39  ;;  %v345_v51 = vld [vmem:[%s3144_s14 + $0x638] sm:$0x11] }
  0x4a   : > { %1580 = vmatpush.bf16.msrb.mxu2 %v2065_v54  ;;  %1593 = vmatpush.bf16.msrb.mxu3 %v2069_v55  ;;  %v2210_v54 = vld [vmem:[%s3144_s14 + $0x1a8] sm:$0xf0]  ;;  %v958_v55 = vunpack.c.l.b16 %v344_v46  ;;  %v961_v62 = vunpack.c.h.b16 %v345_v51  ;;  %v2610_v38 = vld [vmem:[%s3144_s14 + $0x4b8] sm:$0xf0]  ;;  %v2943_v46 = vld [vmem:[%s3144_s14 + $0x334] sm:$0xf] }
  0x4b   : > { %v2613_v45 = vor.u32 %v2976_v37, %v2610_v38 }
  0x4c   : > { %2810 = vmatmul.msk.bf16.vlgmr.msrb.gmra.mxu0 %vm1394_vm1, %v3217_v44  ;;  %2811 = vmatmul.msk.bf16.vlgmr.msrb.gmra.mxu1 %vm1394_vm1, %v3217_v44  ;;  %v1185_v12 = vpack.c.b16 %v961_v62, %v961_v62  ;;  %v2912_v62 = vld [vmem:[%s3144_s14 + $0x23c] sm:$0xf] }
  0x4d   : > { %1600 = vmatpush.bf16.msra.mxu0 %v1424_v60  ;;  %1613 = vmatpush.bf16.msra.mxu1 %v1427_v61  ;;  %v2861_v60 = vld [vmem:[%s3144_s14 + $0x9c] sm:$0xf0]  ;;  %v960_v61 = vunpack.c.l.b16 %v345_v51  ;;  %v2482_v51 = vld [vmem:[%s3144_s14 + $0x3b8] sm:$0xf0] }
  0x4e   : > { %1626 = vmatpush.bf16.msra.mxu2 %v1430_v0  ;;  %1639 = vmatpush.bf16.msra.mxu3 %v1433_v1  ;;  %v2213_v0 = vor.u32 %v2878_v53, %v2210_v54  ;;  %v2845_v1 = vld [vmem:[%s3144_s14 + $0x24] sm:$0xf]  ;;  %v2073_v7 = vor.u32 %v2861_v60, %v2072_v59  ;;  %v1445_v24 = vsel %vm1398_vm0, %v1185_v12, 0  ;;  %v2344_v54 = vld [vmem:[%s3144_s14 + $0x230] sm:$0xf] }
  0x4f   : > { %2812 = vmatmul.msk.bf16.vlgmr.msrb.gmra.mxu2 %vm1394_vm1, %v3217_v44  ;;  %2813 = vmatmul.msk.bf16.vlgmr.msrb.gmra.mxu3 %vm1394_vm1, %v3217_v44  ;;  %v2077_v10 = vor.u32 %v2845_v1, %v2074_v2  ;;  %v1184_v11 = vpack.c.b16 %v960_v61, %v960_v61  ;;  %v2346_v59 = vld [vmem:[%s3144_s14 + $0x2b0] sm:$0xf0]  ;;  %v2352_v60 = vld [vmem:[%s3144_s14 + $0x238] sm:$0xf]  ;;  %v347_v1 = vld [vmem:[%s3144_s14 + $0x648] sm:$0x11] }
  0x50   : > { %v2928_v61 = vld [vmem:[%s3144_s14 + $0x2b4] sm:$0xf0] }
  0x51   : > { %1601 = vmatpush.bf16.msra.mxu0 %v2713_v4  ;;  %1614 = vmatpush.bf16.msra.mxu1 %v2717_v5  ;;  %v2862_v4 = vld [vmem:[%s3144_s14 + $0xa4] sm:$0xf0]  ;;  %v2846_v5 = vld [vmem:[%s3144_s14 + $0x2c] sm:$0xf]  ;;  %v1442_v23 = vsel %vm1398_vm0, %v1184_v11, 0 }
  0x52   : > { %1627 = vmatpush.bf16.msra.mxu2 %v2721_v8  ;;  %1640 = vmatpush.bf16.msra.mxu3 %v2725_v9  ;;  %v1182_v8 = vpack.c.b16 %v958_v55, %v958_v55  ;;  %v1183_v9 = vpack.c.b16 %v959_v56, %v959_v56  ;;  %v2081_v13 = vor.u32 %v2862_v4, %v2080_v3  ;;  %v2927_v55 = vld [vmem:[%s3144_s14 + $0x2ac] sm:$0xf0]  ;;  %v2911_v56 = vld [vmem:[%s3144_s14 + $0x234] sm:$0xf]  ;;  %v2896_v11 = vld [vmem:[%s3144_s14 + $0x1b4] sm:$0xf0] }
  0x53   : > { %v2085_v14 = vor.u32 %v2846_v5, %v2082_v6  ;;  %v2345_v2 = vor.u32 %v2927_v55, %v2344_v54  ;;  %v2349_v3 = vor.u32 %v2911_v56, %v2346_v59  ;;  %v2216_v4 = vld [vmem:[%s3144_s14 + $0x130] sm:$0xf]  ;;  %v2879_v6 = vld [vmem:[%s3144_s14 + $0x134] sm:$0xf]  ;;  %v2993_v54 = vld [vmem:[%s3144_s14 + $0x4bc] sm:$0xf0] }
  0x54   : > { %v1436_v19 = vsel %vm1398_vm0, %v1182_v8, 0  ;;  %v2895_v5 = vld [vmem:[%s3144_s14 + $0x1ac] sm:$0xf0]  ;;  %v2624_v59 = vld [vmem:[%s3144_s14 + $0x448] sm:$0xf] }
  0x55   : > { %1602 = vmatpush.bf16.msra.mxu0 %v2585_v16  ;;  %1615 = vmatpush.bf16.msra.mxu1 %v2589_v17  ;;  %v3023_v16 = vld [vmem:[%s3144_s14 + $0x5ac] sm:$0xf0]  ;;  %v3007_v17 = vld [vmem:[%s3144_s14 + $0x534] sm:$0xf] }
  0x56   : > { %1628 = vmatpush.bf16.msra.mxu2 %v2593_v20  ;;  %1641 = vmatpush.bf16.msra.mxu3 %v2597_v21  ;;  %v1439_v20 = vsel %vm1398_vm0, %v1183_v9, 0  ;;  %v2736_v21 = vld [vmem:[%s3144_s14 + $0x538] sm:$0xf]  ;;  %v2729_v27 = vor.u32 %v3023_v16, %v2728_v15  ;;  %v2218_v9 = vld [vmem:[%s3144_s14 + $0x1b0] sm:$0xf0]  ;;  %v964_v16 = vunpack.c.l.b16 %v347_v1 }
  0x57   : > { %v2737_v31 = vor.u32 %v3024_v22, %v2736_v21  ;;  %v2226_v15 = vld [vmem:[%s3144_s14 + $0x1b8] sm:$0xf0]  ;;  %v2088_v21 = vld [vmem:[%s3144_s14 + $0x30] sm:$0xf] }
  0x58   : > { %v2863_v22 = vld [vmem:[%s3144_s14 + $0xac] sm:$0xf0] }
  0x59   : > { %1603 = vmatpush.bf16.msra.mxu0 %v2457_v28  ;;  %1616 = vmatpush.bf16.msra.mxu1 %v2461_v29  ;;  %v2733_v28 = vor.u32 %v3007_v17, %v2730_v18  ;;  %v2600_v29 = vld [vmem:[%s3144_s14 + $0x430] sm:$0xf]  ;;  %v965_v17 = vunpack.c.h.b16 %v347_v1  ;;  %v2217_v18 = vor.u32 %v2895_v5, %v2216_v4  ;;  %v2488_v1 = vld [vmem:[%s3144_s14 + $0x340] sm:$0xf]  ;;  %v2945_v5 = vld [vmem:[%s3144_s14 + $0x344] sm:$0xf] }
  0x5a   : > { %1629 = vmatpush.bf16.msra.mxu2 %v2465_v32  ;;  %1642 = vmatpush.bf16.msra.mxu3 %v2469_v33  ;;  %v2741_v32 = vor.u32 %v3008_v25, %v2738_v26  ;;  %v2975_v33 = vld [vmem:[%s3144_s14 + $0x434] sm:$0xf]  ;;  %v2601_v39 = vor.u32 %v2991_v30, %v2600_v29  ;;  %v2096_v26 = vld [vmem:[%s3144_s14 + $0x38] sm:$0xf]  ;;  %v2848_v30 = vld [vmem:[%s3144_s14 + $0x3c] sm:$0xf] }
  0x5b   : > { %v2605_v40 = vor.u32 %v2975_v33, %v2602_v34  ;;  %v2090_v25 = vld [vmem:[%s3144_s14 + $0xb0] sm:$0xf0]  ;;  %v2864_v29 = vld [vmem:[%s3144_s14 + $0xb4] sm:$0xf0]  ;;  %v1189_v33 = vpack.c.b16 %v965_v17, %v965_v17  ;;  %v2089_v34 = vor.u32 %v2863_v22, %v2088_v21  ;;  %v2914_v21 = vld [vmem:[%s3144_s14 + $0x24c] sm:$0xf] }
  0x5c   : > { %v2097_v36 = vor.u32 %v2864_v29, %v2096_v26  ;;  %v2370_v22 = vld [vmem:[%s3144_s14 + $0x2c8] sm:$0xf0]  ;;  %v2881_v29 = vld [vmem:[%s3144_s14 + $0x144] sm:$0xf] }
  0x5d   : > { %1604 = vmatpush.bf16.msra.mxu0 %v2329_v41  ;;  %1617 = vmatpush.bf16.msra.mxu1 %v2333_v42  ;;  %v2472_v41 = vld [vmem:[%s3144_s14 + $0x330] sm:$0xf] }
  0x5e   : > { %1630 = vmatpush.bf16.msra.mxu2 %v2337_v47  ;;  %1643 = vmatpush.bf16.msra.mxu3 %v2341_v48  ;;  %v2959_v42 = vld [vmem:[%s3144_s14 + $0x3ac] sm:$0xf0]  ;;  %v2474_v47 = vld [vmem:[%s3144_s14 + $0x3b0] sm:$0xf0]  ;;  %v2480_v48 = vld [vmem:[%s3144_s14 + $0x338] sm:$0xf] }
  0x5f   : > { %v2473_v52 = vor.u32 %v2959_v42, %v2472_v41  ;;  %v2477_v53 = vor.u32 %v2943_v46, %v2474_v47  ;;  %v1457_v41 = vsel %vm1398_vm0, %v1189_v33, 0  ;;  %v2744_v42 = vld [vmem:[%s3144_s14 + $0x540] sm:$0xf]  ;;  %v2746_v46 = vld [vmem:[%s3144_s14 + $0x5c0] sm:$0xf0] }
  0x60   : > { %v2752_v47 = vld [vmem:[%s3144_s14 + $0x548] sm:$0xf] }
  0x61   : > { %1605 = vmatpush.bf16.msra.mxu0 %v2201_v57  ;;  %1618 = vmatpush.bf16.msra.mxu1 %v2205_v58  ;;  %v2481_v57 = vor.u32 %v2960_v49, %v2480_v48  ;;  %v2485_v58 = vor.u32 %v2944_v50, %v2482_v51  ;;  %v3026_v48 = vld [vmem:[%s3144_s14 + $0x5c4] sm:$0xf0]  ;;  %v3010_v49 = vld [vmem:[%s3144_s14 + $0x54c] sm:$0xf] }
  0x62   : > { %1631 = vmatpush.bf16.msra.mxu2 %v2209_v63  ;;  %1644 = vmatpush.bf16.msra.mxu3 %v2213_v0  ;;  %v2354_v63 = vld [vmem:[%s3144_s14 + $0x2b8] sm:$0xf0]  ;;  %v346_v0 = vld [vmem:[%s3144_s14 + $0x640] sm:$0x11]  ;;  %v2754_v50 = vld [vmem:[%s3144_s14 + $0x5c8] sm:$0xf0]  ;;  %v2753_v55 = vor.u32 %v3026_v48, %v2752_v47 }
  0x63   : > { %v2357_v8 = vor.u32 %v2912_v62, %v2354_v63  ;;  %v962_v12 = vunpack.c.l.b16 %v346_v0  ;;  %v2757_v56 = vor.u32 %v3010_v49, %v2754_v50  ;;  %v2626_v62 = vld [vmem:[%s3144_s14 + $0x4c8] sm:$0xf0]  ;;  %v2240_v33 = vld [vmem:[%s3144_s14 + $0x148] sm:$0xf]  ;;  %v2849_v48 = vld [vmem:[%s3144_s14 + $0x44] sm:$0xf] }
  0x64   : > { %v2106_v49 = vld [vmem:[%s3144_s14 + $0xc0] sm:$0xf0]  ;;  %v2112_v50 = vld [vmem:[%s3144_s14 + $0x48] sm:$0xf] }
  0x65   : > { %1606 = vmatpush.bf16.msra.mxu0 %v2073_v7  ;;  %1619 = vmatpush.bf16.msra.mxu1 %v2077_v10  ;;  %v2353_v7 = vor.u32 %v2928_v61, %v2352_v60  ;;  %v2224_v10 = vld [vmem:[%s3144_s14 + $0x138] sm:$0xf]  ;;  %v2994_v60 = vld [vmem:[%s3144_s14 + $0x4c4] sm:$0xf0]  ;;  %v2978_v61 = vld [vmem:[%s3144_s14 + $0x44c] sm:$0xf] }
  0x66   : > { %1632 = vmatpush.bf16.msra.mxu2 %v2081_v13  ;;  %1645 = vmatpush.bf16.msra.mxu3 %v2085_v14  ;;  %v963_v13 = vunpack.c.h.b16 %v346_v0  ;;  %v2880_v14 = vld [vmem:[%s3144_s14 + $0x13c] sm:$0xf]  ;;  %v2629_v4 = vor.u32 %v2978_v61, %v2626_v62 }
  0x68   : > { %2814 = vmatmul.msk.bf16.vlgmr.msra.gmra.mxu0 %vm1394_vm1, %v3217_v44  ;;  %2815 = vmatmul.msk.bf16.vlgmr.msra.gmra.mxu1 %vm1394_vm1, %v3217_v44 }
  0x69   : > { %1652 = vmatpush.bf16.msrb.mxu0 %v1436_v19  ;;  %1665 = vmatpush.bf16.msrb.mxu1 %v1439_v20  ;;  %v2221_v19 = vor.u32 %v2879_v6, %v2218_v9  ;;  %v2225_v20 = vor.u32 %v2896_v11, %v2224_v10  ;;  %v2490_v6 = vld [vmem:[%s3144_s14 + $0x3c0] sm:$0xf0]  ;;  %v2946_v9 = vld [vmem:[%s3144_s14 + $0x34c] sm:$0xf] }
  0x6a   : > { %1678 = vmatpush.bf16.msrb.mxu2 %v1442_v23  ;;  %1691 = vmatpush.bf16.msrb.mxu3 %v1445_v24  ;;  %v2229_v23 = vor.u32 %v2880_v14, %v2226_v15  ;;  %v2847_v24 = vld [vmem:[%s3144_s14 + $0x34] sm:$0xf]  ;;  %v2498_v10 = vld [vmem:[%s3144_s14 + $0x3c8] sm:$0xf0]  ;;  %v2929_v14 = vld [vmem:[%s3144_s14 + $0x2bc] sm:$0xf0] }
  0x6b   : > { %2816 = vmatmul.msk.bf16.vlgmr.msra.gmra.mxu2 %vm1394_vm1, %v3217_v44  ;;  %2817 = vmatmul.msk.bf16.vlgmr.msra.gmra.mxu3 %vm1394_vm1, %v3217_v44  ;;  %v2093_v35 = vor.u32 %v2847_v24, %v2090_v25  ;;  %v2913_v15 = vld [vmem:[%s3144_s14 + $0x244] sm:$0xf]  ;;  %v2501_v17 = vor.u32 %v2946_v9, %v2498_v10  ;;  %v349_v24 = vld [vmem:[%s3144_s14 + $0x658] sm:$0x11] }
  0x6c   : > { %v2770_v9 = vld [vmem:[%s3144_s14 + $0x5d8] sm:$0xf0] }
  0x6d   : > { %1653 = vmatpush.bf16.msrb.mxu0 %v2729_v27  ;;  %1666 = vmatpush.bf16.msrb.mxu1 %v2733_v28  ;;  %v1186_v27 = vpack.c.b16 %v962_v12, %v962_v12  ;;  %v1187_v28 = vpack.c.b16 %v963_v13, %v963_v13  ;;  %v2493_v12 = vor.u32 %v2945_v5, %v2490_v6  ;;  %v2360_v13 = vld [vmem:[%s3144_s14 + $0x240] sm:$0xf]  ;;  %v2762_v5 = vld [vmem:[%s3144_s14 + $0x5d0] sm:$0xf0]  ;;  %v2768_v6 = vld [vmem:[%s3144_s14 + $0x558] sm:$0xf] }
  0x6e   : > { %1679 = vmatpush.bf16.msrb.mxu2 %v2737_v31  ;;  %1692 = vmatpush.bf16.msrb.mxu3 %v2741_v32  ;;  %v2098_v31 = vld [vmem:[%s3144_s14 + $0xb8] sm:$0xf0]  ;;  %v1188_v32 = vpack.c.b16 %v964_v16, %v964_v16  ;;  %v2361_v25 = vor.u32 %v2929_v14, %v2360_v13  ;;  %v2995_v13 = vld [vmem:[%s3144_s14 + $0x4cc] sm:$0xf0] }
  0x6f   : > { %v2101_v37 = vor.u32 %v2848_v30, %v2098_v31  ;;  %v1448_v38 = vsel %vm1398_vm0, %v1186_v27, 0  ;;  %v2232_v27 = vld [vmem:[%s3144_s14 + $0x140] sm:$0xf]  ;;  %v2373_v31 = vor.u32 %v2914_v21, %v2370_v22  ;;  %v2642_v21 = vld [vmem:[%s3144_s14 + $0x4d8] sm:$0xf0] }
  0x71   : > { %1654 = vmatpush.bf16.msrb.mxu0 %v2601_v39  ;;  %1667 = vmatpush.bf16.msrb.mxu1 %v2605_v40  ;;  %v1451_v39 = vsel %vm1398_vm0, %v1187_v28, 0  ;;  %v1454_v40 = vsel %vm1398_vm0, %v1188_v32, 0  ;;  %v2897_v28 = vld [vmem:[%s3144_s14 + $0x1bc] sm:$0xf0]  ;;  %v2234_v32 = vld [vmem:[%s3144_s14 + $0x1c0] sm:$0xf0] }
  0x72   : > { %1680 = vmatpush.bf16.msrb.mxu2 %v2609_v43  ;;  %1693 = vmatpush.bf16.msrb.mxu3 %v2613_v45  ;;  %v3025_v43 = vld [vmem:[%s3144_s14 + $0x5bc] sm:$0xf0]  ;;  %v3009_v45 = vld [vmem:[%s3144_s14 + $0x544] sm:$0xf] }
  0x73   : > { %v2745_v51 = vor.u32 %v3025_v43, %v2744_v42  ;;  %v2237_v42 = vor.u32 %v2881_v29, %v2234_v32  ;;  %v2506_v29 = vld [vmem:[%s3144_s14 + $0x3d0] sm:$0xf0]  ;;  %v2514_v32 = vld [vmem:[%s3144_s14 + $0x3d8] sm:$0xf0] }
  0x75   : > { %1655 = vmatpush.bf16.msrb.mxu0 %v2473_v52  ;;  %1668 = vmatpush.bf16.msrb.mxu1 %v2477_v53  ;;  %v2749_v52 = vor.u32 %v3009_v45, %v2746_v46  ;;  %v2616_v53 = vld [vmem:[%s3144_s14 + $0x440] sm:$0xf] }
  0x76   : > { %1681 = vmatpush.bf16.msrb.mxu2 %v2481_v57  ;;  %1694 = vmatpush.bf16.msrb.mxu3 %v2485_v58  ;;  %v2977_v57 = vld [vmem:[%s3144_s14 + $0x444] sm:$0xf]  ;;  %v2617_v63 = vor.u32 %v2993_v54, %v2616_v53  ;;  %v2104_v45 = vld [vmem:[%s3144_s14 + $0x40] sm:$0xf]  ;;  %v2866_v53 = vld [vmem:[%s3144_s14 + $0xc4] sm:$0xf0] }
  0x77   : > { %v2618_v58 = vld [vmem:[%s3144_s14 + $0x4c0] sm:$0xf0]  ;;  %v2865_v46 = vld [vmem:[%s3144_s14 + $0xbc] sm:$0xf0]  ;;  %v2850_v54 = vld [vmem:[%s3144_s14 + $0x4c] sm:$0xf] }
  0x78   : > { %v2621_v0 = vor.u32 %v2977_v57, %v2618_v58  ;;  %v2105_v58 = vor.u32 %v2865_v46, %v2104_v45  ;;  %v2386_v45 = vld [vmem:[%s3144_s14 + $0x2d8] sm:$0xf0]  ;;  %v350_v46 = vld [vmem:[%s3144_s14 + $0x660] sm:$0x11] }
  0x79   : > { %1656 = vmatpush.bf16.msrb.mxu0 %v2345_v2  ;;  %1669 = vmatpush.bf16.msrb.mxu1 %v2349_v3  ;;  %v2961_v2 = vld [vmem:[%s3144_s14 + $0x3bc] sm:$0xf0]  ;;  %v2625_v3 = vor.u32 %v2994_v60, %v2624_v59  ;;  %v2109_v59 = vor.u32 %v2849_v48, %v2106_v49  ;;  %v2113_v60 = vor.u32 %v2866_v53, %v2112_v50  ;;  %v2248_v50 = vld [vmem:[%s3144_s14 + $0x150] sm:$0xf] }
  0x7a   : > { %1682 = vmatpush.bf16.msrb.mxu2 %v2353_v7  ;;  %1695 = vmatpush.bf16.msrb.mxu3 %v2357_v8  ;;  %v2496_v7 = vld [vmem:[%s3144_s14 + $0x348] sm:$0xf]  ;;  %v2489_v11 = vor.u32 %v2961_v2, %v2488_v1  ;;  %v2760_v2 = vld [vmem:[%s3144_s14 + $0x550] sm:$0xf] }
  0x7b   : > { %v2962_v8 = vld [vmem:[%s3144_s14 + $0x3c4] sm:$0xf0] }
  0x7c   : > { %v2497_v16 = vor.u32 %v2962_v8, %v2496_v7  ;;  %v3028_v7 = vld [vmem:[%s3144_s14 + $0x5d4] sm:$0xf0]  ;;  %v3012_v8 = vld [vmem:[%s3144_s14 + $0x55c] sm:$0xf] }
  0x7d   : > { %1657 = vmatpush.bf16.msrb.mxu0 %v2217_v18  ;;  %1670 = vmatpush.bf16.msrb.mxu1 %v2221_v19  ;;  %v2362_v18 = vld [vmem:[%s3144_s14 + $0x2c0] sm:$0xf0]  ;;  %v2368_v19 = vld [vmem:[%s3144_s14 + $0x248] sm:$0xf]  ;;  %v2769_v14 = vor.u32 %v3028_v7, %v2768_v6  ;;  %v2851_v6 = vld [vmem:[%s3144_s14 + $0x54] sm:$0xf] }
  0x7e   : > { %1683 = vmatpush.bf16.msrb.mxu2 %v2225_v20  ;;  %1696 = vmatpush.bf16.msrb.mxu3 %v2229_v23  ;;  %v2930_v20 = vld [vmem:[%s3144_s14 + $0x2c4] sm:$0xf0]  ;;  %v348_v23 = vld [vmem:[%s3144_s14 + $0x650] sm:$0x11]  ;;  %v2365_v26 = vor.u32 %v2913_v15, %v2362_v18  ;;  %v2773_v15 = vor.u32 %v3012_v8, %v2770_v9  ;;  %v2640_v18 = vld [vmem:[%s3144_s14 + $0x458] sm:$0xf] }
  0x7f   : > { %v2369_v30 = vor.u32 %v2930_v20, %v2368_v19  ;;  %v2996_v19 = vld [vmem:[%s3144_s14 + $0x4d4] sm:$0xf0]  ;;  %v2980_v20 = vld [vmem:[%s3144_s14 + $0x45c] sm:$0xf]  ;;  %v2122_v7 = vld [vmem:[%s3144_s14 + $0xd0] sm:$0xf0] }
  0x80   : > { %v2128_v8 = vld [vmem:[%s3144_s14 + $0x58] sm:$0xf] }
  0x81   : > { %1658 = vmatpush.bf16.msrb.mxu0 %v2089_v34  ;;  %1671 = vmatpush.bf16.msrb.mxu1 %v2093_v35  ;;  %v2898_v34 = vld [vmem:[%s3144_s14 + $0x1c4] sm:$0xf0]  ;;  %v966_v35 = vunpack.c.l.b16 %v348_v23 }
  0x82   : > { %1684 = vmatpush.bf16.msrb.mxu2 %v2097_v36  ;;  %1697 = vmatpush.bf16.msrb.mxu3 %v2101_v37  ;;  %v967_v36 = vunpack.c.h.b16 %v348_v23  ;;  %v2882_v37 = vld [vmem:[%s3144_s14 + $0x14c] sm:$0xf]  ;;  %v2241_v43 = vor.u32 %v2898_v34, %v2240_v33 }
  0x84   : > { %2818 = vmatmul.msk.bf16.vlgmr.msrb.gmra.mxu0 %vm1394_vm1, %v3217_v44  ;;  %2819 = vmatmul.msk.bf16.vlgmr.msrb.gmra.mxu1 %vm1394_vm1, %v3217_v44 }
  0x85   : > { %1704 = vmatpush.bf16.msra.mxu0 %v1448_v38  ;;  %1717 = vmatpush.bf16.msra.mxu1 %v1451_v39  ;;  %v2242_v38 = vld [vmem:[%s3144_s14 + $0x1c8] sm:$0xf0]  ;;  %v968_v39 = vunpack.c.l.b16 %v349_v24 }
  0x86   : > { %1730 = vmatpush.bf16.msra.mxu2 %v1454_v40  ;;  %1743 = vmatpush.bf16.msra.mxu3 %v1457_v41  ;;  %v969_v40 = vunpack.c.h.b16 %v349_v24  ;;  %v2233_v41 = vor.u32 %v2897_v28, %v2232_v27  ;;  %v2245_v47 = vor.u32 %v2882_v37, %v2242_v38  ;;  %v2504_v24 = vld [vmem:[%s3144_s14 + $0x350] sm:$0xf]  ;;  %v2645_v27 = vor.u32 %v2980_v20, %v2642_v21  ;;  %v2947_v28 = vld [vmem:[%s3144_s14 + $0x354] sm:$0xf] }
  0x87   : > { %2820 = vmatmul.msk.bf16.vlgmr.msrb.gmra.mxu2 %vm1394_vm1, %v3217_v44  ;;  %2821 = vmatmul.msk.bf16.vlgmr.msrb.gmra.mxu3 %vm1394_vm1, %v3217_v44  ;;  %v2509_v34 = vor.u32 %v2947_v28, %v2506_v29  ;;  %v2915_v37 = vld [vmem:[%s3144_s14 + $0x254] sm:$0xf]  ;;  %v2784_v28 = vld [vmem:[%s3144_s14 + $0x568] sm:$0xf] }
  0x88   : > { %v1193_v57 = vpack.c.b16 %v969_v40, %v969_v40  ;;  %v2378_v40 = vld [vmem:[%s3144_s14 + $0x2d0] sm:$0xf0]  ;;  %v3030_v29 = vld [vmem:[%s3144_s14 + $0x5e4] sm:$0xf0] }
  0x89   : > { %1705 = vmatpush.bf16.msra.mxu0 %v2745_v51  ;;  %1718 = vmatpush.bf16.msra.mxu1 %v2749_v52  ;;  %v1190_v51 = vpack.c.b16 %v966_v35, %v966_v35  ;;  %v1191_v52 = vpack.c.b16 %v967_v36, %v967_v36  ;;  %v2376_v35 = vld [vmem:[%s3144_s14 + $0x250] sm:$0xf]  ;;  %v2381_v49 = vor.u32 %v2915_v37, %v2378_v40  ;;  %v2650_v40 = vld [vmem:[%s3144_s14 + $0x4e0] sm:$0xf0] }
  0x8a   : > { %1731 = vmatpush.bf16.msra.mxu2 %v2753_v55  ;;  %1744 = vmatpush.bf16.msra.mxu3 %v2757_v56  ;;  %v2114_v55 = vld [vmem:[%s3144_s14 + $0xc8] sm:$0xf0]  ;;  %v1192_v56 = vpack.c.b16 %v968_v39, %v968_v39  ;;  %v1469_v1 = vsel %vm1398_vm0, %v1193_v57, 0  ;;  %v2931_v36 = vld [vmem:[%s3144_s14 + $0x2cc] sm:$0xf0]  ;;  %v2785_v37 = vor.u32 %v3030_v29, %v2784_v28 }
  0x8b   : > { %v2117_v61 = vor.u32 %v2850_v54, %v2114_v55  ;;  %v1460_v62 = vsel %vm1398_vm0, %v1190_v51, 0  ;;  %v2377_v48 = vor.u32 %v2931_v36, %v2376_v35  ;;  %v2899_v51 = vld [vmem:[%s3144_s14 + $0x1cc] sm:$0xf0]  ;;  %v2250_v55 = vld [vmem:[%s3144_s14 + $0x1d0] sm:$0xf0] }
  0x8c   : > { %v2900_v57 = vld [vmem:[%s3144_s14 + $0x1d4] sm:$0xf0]  ;;  %v2648_v35 = vld [vmem:[%s3144_s14 + $0x460] sm:$0xf]  ;;  %v2902_v28 = vld [vmem:[%s3144_s14 + $0x1e4] sm:$0xf0] }
  0x8d   : > { %1706 = vmatpush.bf16.msra.mxu0 %v2617_v63  ;;  %1719 = vmatpush.bf16.msra.mxu1 %v2621_v0  ;;  %v1463_v63 = vsel %vm1398_vm0, %v1191_v52, 0  ;;  %v1466_v0 = vsel %vm1398_vm0, %v1192_v56, 0  ;;  %v2883_v52 = vld [vmem:[%s3144_s14 + $0x154] sm:$0xf]  ;;  %v2256_v56 = vld [vmem:[%s3144_s14 + $0x158] sm:$0xf] }
  0x8e   : > { %1732 = vmatpush.bf16.msra.mxu2 %v2625_v3  ;;  %1745 = vmatpush.bf16.msra.mxu3 %v2629_v4  ;;  %v3027_v3 = vld [vmem:[%s3144_s14 + $0x5cc] sm:$0xf0]  ;;  %v3011_v4 = vld [vmem:[%s3144_s14 + $0x554] sm:$0xf]  ;;  %v2997_v36 = vld [vmem:[%s3144_s14 + $0x4dc] sm:$0xf0] }
  0x8f   : > { %v2761_v10 = vor.u32 %v3027_v3, %v2760_v2  ;;  %v2257_v2 = vor.u32 %v2900_v57, %v2256_v56  ;;  %v2120_v3 = vld [vmem:[%s3144_s14 + $0x50] sm:$0xf]  ;;  %v2522_v57 = vld [vmem:[%s3144_s14 + $0x3e0] sm:$0xf0] }
  0x91   : > { %1707 = vmatpush.bf16.msra.mxu0 %v2489_v11  ;;  %1720 = vmatpush.bf16.msra.mxu1 %v2493_v12  ;;  %v2765_v11 = vor.u32 %v3011_v4, %v2762_v5  ;;  %v2632_v12 = vld [vmem:[%s3144_s14 + $0x450] sm:$0xf] }
  0x92   : > { %1733 = vmatpush.bf16.msra.mxu2 %v2497_v16  ;;  %1746 = vmatpush.bf16.msra.mxu3 %v2501_v17  ;;  %v2979_v16 = vld [vmem:[%s3144_s14 + $0x454] sm:$0xf]  ;;  %v2633_v22 = vor.u32 %v2995_v13, %v2632_v12  ;;  %v2867_v4 = vld [vmem:[%s3144_s14 + $0xcc] sm:$0xf0]  ;;  %v2852_v12 = vld [vmem:[%s3144_s14 + $0x5c] sm:$0xf] }
  0x93   : > { %v2634_v17 = vld [vmem:[%s3144_s14 + $0x4d0] sm:$0xf0]  ;;  %v2130_v13 = vld [vmem:[%s3144_s14 + $0xd8] sm:$0xf0] }
  0x94   : > { %v2637_v23 = vor.u32 %v2979_v16, %v2634_v17  ;;  %v2121_v16 = vor.u32 %v2867_v4, %v2120_v3  ;;  %v2125_v17 = vor.u32 %v2851_v6, %v2122_v7  ;;  %v2392_v3 = vld [vmem:[%s3144_s14 + $0x260] sm:$0xf] }
  0x95   : > { %1708 = vmatpush.bf16.msra.mxu0 %v2361_v25  ;;  %1721 = vmatpush.bf16.msra.mxu1 %v2365_v26  ;;  %v2963_v25 = vld [vmem:[%s3144_s14 + $0x3cc] sm:$0xf0]  ;;  %v2641_v26 = vor.u32 %v2996_v19, %v2640_v18  ;;  %v2133_v19 = vor.u32 %v2852_v12, %v2130_v13  ;;  %v2933_v4 = vld [vmem:[%s3144_s14 + $0x2dc] sm:$0xf0]  ;;  %v2918_v12 = vld [vmem:[%s3144_s14 + $0x26c] sm:$0xf] }
  0x96   : > { %1734 = vmatpush.bf16.msra.mxu2 %v2369_v30  ;;  %1747 = vmatpush.bf16.msra.mxu3 %v2373_v31  ;;  %v2512_v30 = vld [vmem:[%s3144_s14 + $0x358] sm:$0xf]  ;;  %v2948_v31 = vld [vmem:[%s3144_s14 + $0x35c] sm:$0xf]  ;;  %v2505_v33 = vor.u32 %v2963_v25, %v2504_v24  ;;  %v2776_v24 = vld [vmem:[%s3144_s14 + $0x560] sm:$0xf] }
  0x97   : > { %v2517_v39 = vor.u32 %v2948_v31, %v2514_v32  ;;  %v3029_v25 = vld [vmem:[%s3144_s14 + $0x5dc] sm:$0xf0]  ;;  %v2402_v13 = vld [vmem:[%s3144_s14 + $0x2e8] sm:$0xf0] }
  0x99   : > { %1709 = vmatpush.bf16.msra.mxu0 %v2233_v41  ;;  %1722 = vmatpush.bf16.msra.mxu1 %v2237_v42  ;;  %v2384_v41 = vld [vmem:[%s3144_s14 + $0x258] sm:$0xf] }
  0x9a   : > { %1735 = vmatpush.bf16.msra.mxu2 %v2241_v43  ;;  %1748 = vmatpush.bf16.msra.mxu3 %v2245_v47  ;;  %v2932_v42 = vld [vmem:[%s3144_s14 + $0x2d4] sm:$0xf0]  ;;  %v2916_v43 = vld [vmem:[%s3144_s14 + $0x25c] sm:$0xf]  ;;  %v351_v47 = vld [vmem:[%s3144_s14 + $0x668] sm:$0x11] }
  0x9b   : > { %v2385_v53 = vor.u32 %v2932_v42, %v2384_v41  ;;  %v2389_v54 = vor.u32 %v2916_v43, %v2386_v45  ;;  %v2656_v41 = vld [vmem:[%s3144_s14 + $0x468] sm:$0xf]  ;;  %v2982_v43 = vld [vmem:[%s3144_s14 + $0x46c] sm:$0xf] }
  0x9c   : > { %v2998_v42 = vld [vmem:[%s3144_s14 + $0x4e4] sm:$0xf0]  ;;  %v2658_v45 = vld [vmem:[%s3144_s14 + $0x4e8] sm:$0xf0] }
  0x9d   : > { %1710 = vmatpush.bf16.msra.mxu0 %v2105_v58  ;;  %1723 = vmatpush.bf16.msra.mxu1 %v2109_v59  ;;  %v970_v58 = vunpack.c.l.b16 %v350_v46  ;;  %v971_v59 = vunpack.c.h.b16 %v350_v46  ;;  %v3541_v46 = vld [vmem:[%s3693_s0] sm:$0x7]  ;;  %v2661_v56 = vor.u32 %v2982_v43, %v2658_v45 }
  0x9e   : > { %1736 = vmatpush.bf16.msra.mxu2 %v2113_v60  ;;  %1749 = vmatpush.bf16.msra.mxu3 %v2117_v61  ;;  %v2884_v60 = vld [vmem:[%s3144_s14 + $0x15c] sm:$0xf] }
  0x9f   : > { %v2258_v61 = vld [vmem:[%s3144_s14 + $0x1d8] sm:$0xf0]  ;;  %v1194_v9 = vpack.c.b16 %v970_v58, %v970_v58  ;;  %v2528_v58 = vld [vmem:[%s3144_s14 + $0x368] sm:$0xf] }
  0xa0   : > { %2822 = vmatmul.msk.bf16.vlgmr.msra.gmra.mxu0 %vm1394_vm1, %v3217_v44  ;;  %2823 = vmatmul.msk.bf16.vlgmr.msra.gmra.mxu1 %vm1394_vm1, %v3217_v44  ;;  %v2261_v5 = vor.u32 %v2884_v60, %v2258_v61  ;;  %v2950_v61 = vld [vmem:[%s3144_s14 + $0x36c] sm:$0xf] }
  0xa1   : > { %1756 = vmatpush.bf16.msrb.mxu0 %v1460_v62  ;;  %1769 = vmatpush.bf16.msrb.mxu1 %v1463_v63  ;;  %v972_v62 = vunpack.c.l.b16 %v351_v47  ;;  %v973_v63 = vunpack.c.h.b16 %v351_v47  ;;  %v1472_v20 = vsel %vm1398_vm0, %v1194_v9, 0  ;;  %v2400_v9 = vld [vmem:[%s3144_s14 + $0x268] sm:$0xf] }
  0xa2   : > { %1782 = vmatpush.bf16.msrb.mxu2 %v1466_v0  ;;  %1795 = vmatpush.bf16.msrb.mxu3 %v1469_v1  ;;  %v2249_v0 = vor.u32 %v2899_v51, %v2248_v50  ;;  %v2253_v1 = vor.u32 %v2883_v52, %v2250_v55  ;;  %v2520_v51 = vld [vmem:[%s3144_s14 + $0x360] sm:$0xf]  ;;  %v2657_v55 = vor.u32 %v2998_v42, %v2656_v41  ;;  %v2138_v41 = vld [vmem:[%s3144_s14 + $0xe0] sm:$0xf0]  ;;  %v2144_v42 = vld [vmem:[%s3144_s14 + $0x68] sm:$0xf] }
  0xa3   : > { %2824 = vmatmul.msk.bf16.vlgmr.msra.gmra.mxu2 %vm1394_vm1, %v3217_v44  ;;  %2825 = vmatmul.msk.bf16.vlgmr.msra.gmra.mxu3 %vm1394_vm1, %v3217_v44  ;;  %v2964_v44 = vld [vmem:[%s3144_s14 + $0x3d4] sm:$0xf0]  ;;  %v2965_v52 = vld [vmem:[%s3144_s14 + $0x3dc] sm:$0xf0] }
  0xa4   : > { %v2513_v38 = vor.u32 %v2964_v44, %v2512_v30  ;;  %v3014_v30 = vld [vmem:[%s3144_s14 + $0x56c] sm:$0xf] }
  0xa5   : > { %1757 = vmatpush.bf16.msrb.mxu0 %v2761_v10  ;;  %1770 = vmatpush.bf16.msrb.mxu1 %v2765_v11  ;;  %v1195_v10 = vpack.c.b16 %v971_v59, %v971_v59  ;;  %v2868_v11 = vld [vmem:[%s3144_s14 + $0xd4] sm:$0xf0]  ;;  %v2786_v44 = vld [vmem:[%s3144_s14 + $0x5e8] sm:$0xf0]  ;;  %v2966_v59 = vld [vmem:[%s3144_s14 + $0x3e4] sm:$0xf0] }
  0xa6   : > { %1783 = vmatpush.bf16.msrb.mxu2 %v2769_v14  ;;  %1796 = vmatpush.bf16.msrb.mxu3 %v2773_v15  ;;  %v1196_v14 = vpack.c.b16 %v972_v62, %v972_v62  ;;  %v1197_v15 = vpack.c.b16 %v973_v63, %v973_v63  ;;  %v2129_v18 = vor.u32 %v2868_v11, %v2128_v8  ;;  %v2530_v62 = vld [vmem:[%s3144_s14 + $0x3e8] sm:$0xf0]  ;;  %v2394_v8 = vld [vmem:[%s3144_s14 + $0x2e0] sm:$0xf0] }
  0xa7   : > { %v1475_v21 = vsel %vm1398_vm0, %v1195_v10, 0  ;;  %v2529_v6 = vor.u32 %v2966_v59, %v2528_v58  ;;  %v2533_v7 = vor.u32 %v2950_v61, %v2530_v62  ;;  %v2934_v10 = vld [vmem:[%s3144_s14 + $0x2e4] sm:$0xf0]  ;;  %v3031_v61 = vld [vmem:[%s3144_s14 + $0x5ec] sm:$0xf0] }
  0xa8   : > { %v3015_v62 = vld [vmem:[%s3144_s14 + $0x574] sm:$0xf] }
  0xa9   : > { %1758 = vmatpush.bf16.msrb.mxu0 %v2633_v22  ;;  %1771 = vmatpush.bf16.msrb.mxu1 %v2637_v23  ;;  %v1478_v22 = vsel %vm1398_vm0, %v1196_v14, 0  ;;  %v1481_v23 = vsel %vm1398_vm0, %v1197_v15, 0  ;;  %v352_v14 = vld [vmem:[%s3144_s14 + $0x670] sm:$0x11] }
  0xaa   : > { %1784 = vmatpush.bf16.msrb.mxu2 %v2641_v26  ;;  %1797 = vmatpush.bf16.msrb.mxu3 %v2645_v27  ;;  %v3013_v26 = vld [vmem:[%s3144_s14 + $0x564] sm:$0xf]  ;;  %v974_v29 = vunpack.c.l.b16 %v352_v14 }
  0xab   : > { %v2778_v27 = vld [vmem:[%s3144_s14 + $0x5e0] sm:$0xf0] }
  0xac   : > { %v1198_v43 = vpack.c.b16 %v974_v29, %v974_v29  ;;  %v2544_v29 = vld [vmem:[%s3144_s14 + $0x378] sm:$0xf] }
  0xad   : > { %1759 = vmatpush.bf16.msrb.mxu0 %v2505_v33  ;;  %1772 = vmatpush.bf16.msrb.mxu1 %v2509_v34  ;;  %v1504_v31 = vpop.f32.mrf.mxu0  ;;  %v1517_v32 = vpop.f32.mrf.mxu1  ;;  %v2777_v33 = vor.u32 %v3029_v25, %v2776_v24  ;;  %v2781_v34 = vor.u32 %v3013_v26, %v2778_v27  ;;  %v2401_v24 = vor.u32 %v2934_v10, %v2400_v9  ;;  %v2266_v26 = vld [vmem:[%s3144_s14 + $0x1e0] sm:$0xf0]  ;;  %v2272_v27 = vld [vmem:[%s3144_s14 + $0x168] sm:$0xf]  ;;  %v2999_v9 = vld [vmem:[%s3144_s14 + $0x4ec] sm:$0xf0] }
  0xae   : > { %1785 = vmatpush.bf16.msrb.mxu2 %v2513_v38  ;;  %1798 = vmatpush.bf16.msrb.mxu3 %v2517_v39  ;;  %3042 = vtanh.f32 %v1504_v31  ;;  %v2789_v38 = vor.u32 %v3014_v30, %v2786_v44  ;;  %v2981_v39 = vld [vmem:[%s3144_s14 + $0x464] sm:$0xf]  ;;  %v2405_v25 = vor.u32 %v2918_v12, %v2402_v13  ;;  %v975_v30 = vunpack.c.h.b16 %v352_v14  ;;  %v2886_v44 = vld [vmem:[%s3144_s14 + $0x16c] sm:$0xf]  ;;  %v2983_v12 = vld [vmem:[%s3144_s14 + $0x474] sm:$0xf] }
  0xaf   : > { %3044 = vtanh.f32 %v1517_v32  ;;  %v2653_v50 = vor.u32 %v2981_v39, %v2650_v40  ;;  %v2274_v31 = vld [vmem:[%s3144_s14 + $0x1e8] sm:$0xf0]  ;;  %v2853_v40 = vld [vmem:[%s3144_s14 + $0x64] sm:$0xf]  ;;  %v2666_v13 = vld [vmem:[%s3144_s14 + $0x4f0] sm:$0xf0] }
  0xb0   : > { %v2277_v39 = vor.u32 %v2886_v44, %v2274_v31  ;;  %v1199_v45 = vpack.c.b16 %v975_v30, %v975_v30  ;;  %v2672_v14 = vld [vmem:[%s3144_s14 + $0x478] sm:$0xf]  ;;  %v2952_v31 = vld [vmem:[%s3144_s14 + $0x37c] sm:$0xf] }
  0xb1   : > { %1760 = vmatpush.bf16.msrb.mxu0 %v2377_v48  ;;  %1773 = vmatpush.bf16.msrb.mxu1 %v2381_v49  ;;  %v2649_v49 = vor.u32 %v2997_v36, %v2648_v35  ;;  %v2273_v36 = vor.u32 %v2902_v28, %v2272_v27  ;;  %v2538_v28 = vld [vmem:[%s3144_s14 + $0x3f0] sm:$0xf0]  ;;  %v2968_v30 = vld [vmem:[%s3144_s14 + $0x3f4] sm:$0xf0] }
  0xb2   : > { %1786 = vmatpush.bf16.msrb.mxu2 %v2385_v53  ;;  %1799 = vmatpush.bf16.msrb.mxu3 %v2389_v54  ;;  %v2949_v53 = vld [vmem:[%s3144_s14 + $0x364] sm:$0xf] }
  0xb4   : > { %v3043_v54 = vpop.eup %3042 }
  0xb5   : > { %1761 = vmatpush.bf16.msrb.mxu0 %v2249_v0  ;;  %1774 = vmatpush.bf16.msrb.mxu1 %v2253_v1  ;;  %v3045_v60 = vpop.eup %3044  ;;  %1943 = vst [vmem:[%s3554_s22] sm:$0x3f] %v3043_v54  ;;  %v1506_v63 = vpop.f32.mrf.mxu0  ;;  %v2521_v1 = vor.u32 %v2965_v52, %v2520_v51 }
  0xb6   : > { %1787 = vmatpush.bf16.msrb.mxu2 %v2257_v2  ;;  %1800 = vmatpush.bf16.msrb.mxu3 %v2261_v5  ;;  %v1530_v47 = vpop.f32.mrf.mxu2  ;;  %v1543_v48 = vpop.f32.mrf.mxu3  ;;  %1944 = vst [vmem:[%s3554_s22 + $0x8] sm:$0x3f] %v3045_v60  ;;  %v2525_v2 = vor.u32 %v2949_v53, %v2522_v57  ;;  %v2917_v5 = vld [vmem:[%s3144_s14 + $0x264] sm:$0xf]  ;;  %v2141_v53 = vor.u32 %v2853_v40, %v2138_v41  ;;  %v1487_v57 = vsel %vm1398_vm0, %v1199_v45, 0 }
  0xb7   : > { %3046 = vtanh.f32 %v1530_v47  ;;  %v1519_v0 = vpop.f32.mrf.mxu1  ;;  %v2870_v47 = vld [vmem:[%s3144_s14 + $0xe4] sm:$0xf0]  ;;  %v2792_v60 = vld [vmem:[%s3144_s14 + $0x570] sm:$0xf]  ;;  %v2794_v63 = vld [vmem:[%s3144_s14 + $0x5f0] sm:$0xf0] }
  0xb8   : > { %3048 = vtanh.f32 %v1543_v48  ;;  %v2854_v48 = vld [vmem:[%s3144_s14 + $0x6c] sm:$0xf]  ;;  %v2145_v54 = vor.u32 %v2870_v47, %v2144_v42  ;;  %v2800_v0 = vld [vmem:[%s3144_s14 + $0x578] sm:$0xf]  ;;  %v2919_v41 = vld [vmem:[%s3144_s14 + $0x274] sm:$0xf] }
  0xb9   : > { %1762 = vmatpush.bf16.msrb.mxu0 %v2121_v16  ;;  %1775 = vmatpush.bf16.msrb.mxu1 %v2125_v17  ;;  %v2264_v16 = vld [vmem:[%s3144_s14 + $0x160] sm:$0xf]  ;;  %v353_v17 = vld [vmem:[%s3144_s14 + $0x678] sm:$0x11]  ;;  %v2410_v42 = vld [vmem:[%s3144_s14 + $0x2f0] sm:$0xf0] }
  0xba   : > { %1788 = vmatpush.bf16.msrb.mxu2 %v2129_v18  ;;  %1801 = vmatpush.bf16.msrb.mxu3 %v2133_v19  ;;  %v976_v32 = vunpack.c.l.b16 %v353_v17  ;;  %v2936_v47 = vld [vmem:[%s3144_s14 + $0x2f4] sm:$0xf0] }
  0xbc   : > { %2826 = vmatmul.msk.bf16.vlgmr.msrb.gmra.mxu0 %vm1394_vm1, %v3541_v46  ;;  %2827 = vmatmul.msk.bf16.vlgmr.msrb.gmra.mxu1 %vm1394_vm1, %v3541_v46 }
  0xbd   : > { %1808 = vmatpush.bf16.msra.mxu0 %v1472_v20  ;;  %1821 = vmatpush.bf16.msra.mxu1 %v1475_v21  ;;  %v3047_v11 = vpop.eup %3046  ;;  %v2393_v20 = vor.u32 %v2933_v4, %v2392_v3  ;;  %v2397_v21 = vor.u32 %v2917_v5, %v2394_v8  ;;  %v2802_v3 = vld [vmem:[%s3144_s14 + $0x5f8] sm:$0xf0]  ;;  %v2664_v8 = vld [vmem:[%s3144_s14 + $0x470] sm:$0xf] }
  0xbe   : > { %1834 = vmatpush.bf16.msra.mxu2 %v1478_v22  ;;  %1847 = vmatpush.bf16.msra.mxu3 %v1481_v23  ;;  %v3049_v15 = vpop.eup %3048  ;;  %1945 = vst [vmem:[%s3554_s22 + $0x10] sm:$0x3f] %v3047_v11  ;;  %v1532_v18 = vpop.f32.mrf.mxu2  ;;  %v2901_v22 = vld [vmem:[%s3144_s14 + $0x1dc] sm:$0xf0]  ;;  %v2885_v23 = vld [vmem:[%s3144_s14 + $0x164] sm:$0xf] }
  0xbf   : > { %2828 = vmatmul.msk.bf16.vlgmr.msrb.gmra.mxu2 %vm1394_vm1, %v3541_v46  ;;  %2829 = vmatmul.msk.bf16.vlgmr.msrb.gmra.mxu3 %vm1394_vm1, %v3541_v46  ;;  %v1545_v19 = vpop.f32.mrf.mxu3  ;;  %1946 = vst [vmem:[%s3554_s22 + $0x18] sm:$0x3f] %v3049_v15  ;;  %v2269_v35 = vor.u32 %v2885_v23, %v2266_v26  ;;  %v3000_v15 = vld [vmem:[%s3144_s14 + $0x4f4] sm:$0xf0]  ;;  %v2967_v23 = vld [vmem:[%s3144_s14 + $0x3ec] sm:$0xf0] }
  0xc0   : > { %v2673_v26 = vor.u32 %v3000_v15, %v2672_v14 }
  0xc1   : > { %1809 = vmatpush.bf16.msra.mxu0 %v2777_v33  ;;  %1822 = vmatpush.bf16.msra.mxu1 %v2781_v34  ;;  %v977_v33 = vunpack.c.h.b16 %v353_v17  ;;  %v2265_v34 = vor.u32 %v2901_v22, %v2264_v16  ;;  %v2984_v16 = vld [vmem:[%s3144_s14 + $0x47c] sm:$0xf]  ;;  %v2536_v22 = vld [vmem:[%s3144_s14 + $0x370] sm:$0xf] }
  0xc2   : > { %1835 = vmatpush.bf16.msra.mxu2 %v2785_v37  ;;  %1848 = vmatpush.bf16.msra.mxu3 %v2789_v38  ;;  %v2136_v37 = vld [vmem:[%s3144_s14 + $0x60] sm:$0xf]  ;;  %v2674_v17 = vld [vmem:[%s3144_s14 + $0x4f8] sm:$0xf0] }
  0xc3   : > { %v2869_v38 = vld [vmem:[%s3144_s14 + $0xdc] sm:$0xf0]  ;;  %v1201_v51 = vpack.c.b16 %v977_v33, %v977_v33  ;;  %v2677_v27 = vor.u32 %v2984_v16, %v2674_v17 }
  0xc4   : > { %v2137_v52 = vor.u32 %v2869_v38, %v2136_v37  ;;  %v2408_v37 = vld [vmem:[%s3144_s14 + $0x270] sm:$0xf] }
  0xc5   : > { %1810 = vmatpush.bf16.msra.mxu0 %v2649_v49  ;;  %1823 = vmatpush.bf16.msra.mxu1 %v2653_v50  ;;  %v2146_v49 = vld [vmem:[%s3144_s14 + $0xe8] sm:$0xf0]  ;;  %v1200_v50 = vpack.c.b16 %v976_v32, %v976_v32  ;;  %v1493_v59 = vsel %vm1398_vm0, %v1201_v51, 0  ;;  %v2546_v32 = vld [vmem:[%s3144_s14 + $0x3f8] sm:$0xf0] }
  0xc6   : > { %1836 = vmatpush.bf16.msra.mxu2 %v2657_v55  ;;  %1849 = vmatpush.bf16.msra.mxu3 %v2661_v56  ;;  %v2149_v55 = vor.u32 %v2854_v48, %v2146_v49  ;;  %v1484_v56 = vsel %vm1398_vm0, %v1198_v43, 0  ;;  %v2935_v38 = vld [vmem:[%s3144_s14 + $0x2ec] sm:$0xf0]  ;;  %v2549_v40 = vor.u32 %v2952_v31, %v2546_v32  ;;  %v2416_v43 = vld [vmem:[%s3144_s14 + $0x278] sm:$0xf] }
  0xc7   : > { %v1490_v58 = vsel %vm1398_vm0, %v1200_v50, 0  ;;  %v2920_v48 = vld [vmem:[%s3144_s14 + $0x27c] sm:$0xf] }
  0xc8   : > { %v2418_v49 = vld [vmem:[%s3144_s14 + $0x2f8] sm:$0xf0] }
  0xc9   : > { %1811 = vmatpush.bf16.msra.mxu0 %v2521_v1  ;;  %1824 = vmatpush.bf16.msra.mxu1 %v2525_v2  ;;  %v3032_v1 = vld [vmem:[%s3144_s14 + $0x5f4] sm:$0xf0]  ;;  %v3016_v2 = vld [vmem:[%s3144_s14 + $0x57c] sm:$0xf]  ;;  %v1556_v4 = vpop.f32.mrf.mxu0  ;;  %v1569_v5 = vpop.f32.mrf.mxu1 }
  0xca   : > { %1837 = vmatpush.bf16.msra.mxu2 %v2529_v6  ;;  %1850 = vmatpush.bf16.msra.mxu3 %v2533_v7  ;;  %3050 = vtanh.f32 %v1556_v4  ;;  %v2793_v6 = vor.u32 %v3031_v61, %v2792_v60  ;;  %v2797_v7 = vor.u32 %v3015_v62, %v2794_v63  ;;  %v2801_v10 = vor.u32 %v3032_v1, %v2800_v0  ;;  %v2282_v60 = vld [vmem:[%s3144_s14 + $0x1f0] sm:$0xf0]  ;;  %v2288_v61 = vld [vmem:[%s3144_s14 + $0x178] sm:$0xf]  ;;  %v2888_v63 = vld [vmem:[%s3144_s14 + $0x17c] sm:$0xf] }
  0xcb   : > { %3052 = vtanh.f32 %v1569_v5  ;;  %v2805_v11 = vor.u32 %v3016_v2, %v2802_v3  ;;  %v2904_v62 = vld [vmem:[%s3144_s14 + $0x1f4] sm:$0xf0]  ;;  %v2290_v0 = vld [vmem:[%s3144_s14 + $0x1f8] sm:$0xf0]  ;;  %v2152_v3 = vld [vmem:[%s3144_s14 + $0x70] sm:$0xf] }
  0xcc   : > { %v2871_v4 = vld [vmem:[%s3144_s14 + $0xec] sm:$0xf0]  ;;  %v2289_v5 = vor.u32 %v2904_v62, %v2288_v61 }
  0xcd   : > { %1812 = vmatpush.bf16.msra.mxu0 %v2393_v20  ;;  %1825 = vmatpush.bf16.msra.mxu1 %v2397_v21  ;;  %v2665_v20 = vor.u32 %v2999_v9, %v2664_v8  ;;  %v2669_v21 = vor.u32 %v2983_v12, %v2666_v13  ;;  %v2154_v8 = vld [vmem:[%s3144_s14 + $0xf0] sm:$0xf0]  ;;  %v2160_v9 = vld [vmem:[%s3144_s14 + $0x78] sm:$0xf]  ;;  %v2162_v12 = vld [vmem:[%s3144_s14 + $0xf8] sm:$0xf0]  ;;  %v2153_v13 = vor.u32 %v2871_v4, %v2152_v3 }
  0xce   : > { %1838 = vmatpush.bf16.msra.mxu2 %v2401_v24  ;;  %1851 = vmatpush.bf16.msra.mxu3 %v2405_v25  ;;  %v2951_v24 = vld [vmem:[%s3144_s14 + $0x374] sm:$0xf] }
  0xd0   : > { %v3051_v25 = vpop.eup %3050 }
  0xd1   : > { %1813 = vmatpush.bf16.msra.mxu0 %v2265_v34  ;;  %1826 = vmatpush.bf16.msra.mxu1 %v2269_v35  ;;  %v3053_v44 = vpop.eup %3052  ;;  %1947 = vst [vmem:[%s3554_s22 + $0x20] sm:$0x3f] %v3051_v25  ;;  %v1558_v33 = vpop.f32.mrf.mxu0  ;;  %v2537_v35 = vor.u32 %v2967_v23, %v2536_v22 }
  0xd2   : > { %1839 = vmatpush.bf16.msra.mxu2 %v2273_v36  ;;  %1852 = vmatpush.bf16.msra.mxu3 %v2277_v39  ;;  %v1582_v18 = vpop.f32.mrf.mxu2  ;;  %v1595_v19 = vpop.f32.mrf.mxu3  ;;  %1948 = vst [vmem:[%s3554_s22 + $0x28] sm:$0x3f] %v3053_v44  ;;  %v2541_v36 = vor.u32 %v2951_v24, %v2538_v28  ;;  %v2545_v39 = vor.u32 %v2968_v30, %v2544_v29 }
  0xd3   : > { %3054 = vtanh.f32 %v1582_v18  ;;  %v1571_v34 = vpop.f32.mrf.mxu1 }
  0xd4   : > { %3056 = vtanh.f32 %v1595_v19 }
  0xd5   : > { %1814 = vmatpush.bf16.msra.mxu0 %v2137_v52  ;;  %1827 = vmatpush.bf16.msra.mxu1 %v2141_v53  ;;  %v2409_v53 = vor.u32 %v2935_v38, %v2408_v37 }
  0xd6   : > { %1840 = vmatpush.bf16.msra.mxu2 %v2145_v54  ;;  %1853 = vmatpush.bf16.msra.mxu3 %v2149_v55  ;;  %v2413_v54 = vor.u32 %v2919_v41, %v2410_v42  ;;  %v2280_v55 = vld [vmem:[%s3144_s14 + $0x170] sm:$0xf] }
  0xd8   : > { %2830 = vmatmul.msk.bf16.vlgmr.msra.gmra.mxu0 %vm1394_vm1, %v3541_v46  ;;  %2831 = vmatmul.msk.bf16.vlgmr.msra.gmra.mxu1 %vm1394_vm1, %v3541_v46 }
  0xd9   : > { %1860 = vmatpush.bf16.msrb.mxu0 %v1484_v56  ;;  %1873 = vmatpush.bf16.msrb.mxu1 %v1487_v57  ;;  %v3055_v45 = vpop.eup %3054  ;;  %v2903_v56 = vld [vmem:[%s3144_s14 + $0x1ec] sm:$0xf0]  ;;  %v2417_v57 = vor.u32 %v2936_v47, %v2416_v43 }
  0xda   : > { %1886 = vmatpush.bf16.msrb.mxu2 %v1490_v58  ;;  %1899 = vmatpush.bf16.msrb.mxu3 %v1493_v59  ;;  %v3057_v50 = vpop.eup %3056  ;;  %1949 = vst [vmem:[%s3554_s22 + $0x30] sm:$0x3f] %v3055_v45  ;;  %v1584_v51 = vpop.f32.mrf.mxu2  ;;  %v2421_v58 = vor.u32 %v2920_v48, %v2418_v49  ;;  %v2887_v59 = vld [vmem:[%s3144_s14 + $0x174] sm:$0xf]  ;;  %v2281_v1 = vor.u32 %v2903_v56, %v2280_v55 }
  0xdb   : > { %2832 = vmatmul.msk.bf16.vlgmr.msra.gmra.mxu2 %vm1394_vm1, %v3541_v46  ;;  %2833 = vmatmul.msk.bf16.vlgmr.msra.gmra.mxu3 %vm1394_vm1, %v3541_v46  ;;  %v1597_v52 = vpop.f32.mrf.mxu3  ;;  %1950 = vst [vmem:[%s3554_s22 + $0x38] sm:$0x3f] %v3057_v50  ;;  %v2285_v2 = vor.u32 %v2887_v59, %v2282_v60 }
  0xdd   : > { %1861 = vmatpush.bf16.msrb.mxu0 %v2793_v6  ;;  %1874 = vmatpush.bf16.msrb.mxu1 %v2797_v7  ;;  %v2293_v6 = vor.u32 %v2888_v63, %v2290_v0  ;;  %v2855_v7 = vld [vmem:[%s3144_s14 + $0x74] sm:$0xf] }
  0xde   : > { %1887 = vmatpush.bf16.msrb.mxu2 %v2801_v10  ;;  %1900 = vmatpush.bf16.msrb.mxu3 %v2805_v11  ;;  %v2872_v10 = vld [vmem:[%s3144_s14 + $0xf4] sm:$0xf0]  ;;  %v2856_v11 = vld [vmem:[%s3144_s14 + $0x7c] sm:$0xf]  ;;  %v2157_v14 = vor.u32 %v2855_v7, %v2154_v8 }
  0xdf   : > { %v2161_v15 = vor.u32 %v2872_v10, %v2160_v9  ;;  %v2165_v16 = vor.u32 %v2856_v11, %v2162_v12 }
  0xe1   : > { %1862 = vmatpush.bf16.msrb.mxu0 %v2665_v20  ;;  %1875 = vmatpush.bf16.msrb.mxu1 %v2669_v21 }
  0xe2   : > { %1888 = vmatpush.bf16.msrb.mxu2 %v2673_v26  ;;  %1901 = vmatpush.bf16.msrb.mxu3 %v2677_v27 }
  0xe5   : > { %1863 = vmatpush.bf16.msrb.mxu0 %v2537_v35  ;;  %1876 = vmatpush.bf16.msrb.mxu1 %v2541_v36  ;;  %v1608_v17 = vpop.f32.mrf.mxu0  ;;  %v1621_v18 = vpop.f32.mrf.mxu1 }
  0xe6   : > { %1889 = vmatpush.bf16.msrb.mxu2 %v2545_v39  ;;  %1902 = vmatpush.bf16.msrb.mxu3 %v2549_v40  ;;  %3058 = vtanh.f32 %v1608_v17 }
  0xe7   : > { %3060 = vtanh.f32 %v1621_v18 }
  0xe9   : > { %1864 = vmatpush.bf16.msrb.mxu0 %v2409_v53  ;;  %1877 = vmatpush.bf16.msrb.mxu1 %v2413_v54 }
  0xea   : > { %1890 = vmatpush.bf16.msrb.mxu2 %v2417_v57  ;;  %1903 = vmatpush.bf16.msrb.mxu3 %v2421_v58 }
  0xec   : > { %v3059_v21 = vpop.eup %3058 }
  0xed   : > { %1865 = vmatpush.bf16.msrb.mxu0 %v2281_v1  ;;  %1878 = vmatpush.bf16.msrb.mxu1 %v2285_v2  ;;  %v3061_v22 = vpop.eup %3060  ;;  %1951 = vst [vmem:[%s3554_s22 + $0x40] sm:$0x3f] %v3059_v21  ;;  %v1610_v23 = vpop.f32.mrf.mxu0 }
  0xee   : > { %1891 = vmatpush.bf16.msrb.mxu2 %v2289_v5  ;;  %1904 = vmatpush.bf16.msrb.mxu3 %v2293_v6  ;;  %v1634_v19 = vpop.f32.mrf.mxu2  ;;  %v1647_v20 = vpop.f32.mrf.mxu3  ;;  %1952 = vst [vmem:[%s3554_s22 + $0x48] sm:$0x3f] %v3061_v22 }
  0xef   : > { %3062 = vtanh.f32 %v1634_v19  ;;  %v1623_v24 = vpop.f32.mrf.mxu1 }
  0xf0   : > { %3064 = vtanh.f32 %v1647_v20 }
  0xf1   : > { %1866 = vmatpush.bf16.msrb.mxu0 %v2153_v13  ;;  %1879 = vmatpush.bf16.msrb.mxu1 %v2157_v14 }
  0xf2   : > { %1892 = vmatpush.bf16.msrb.mxu2 %v2161_v15  ;;  %1905 = vmatpush.bf16.msrb.mxu3 %v2165_v16 }
  0xf4   : > { %2834 = vmatmul.msk.bf16.vlgmr.msrb.gmra.mxu0 %vm1394_vm1, %v3541_v46  ;;  %2835 = vmatmul.msk.bf16.vlgmr.msrb.gmra.mxu1 %vm1394_vm1, %v3541_v46 }
  0xf5   : > { %2836 = vmatmul.msk.bf16.vlgmr.msrb.gmra.mxu2 %vm1394_vm1, %v3541_v46  ;;  %2837 = vmatmul.msk.bf16.vlgmr.msrb.gmra.mxu3 %vm1394_vm1, %v3541_v46  ;;  %v3063_v25 = vpop.eup %3062 }
  0xf6   : > { %v3065_v26 = vpop.eup %3064  ;;  %1953 = vst [vmem:[%s3554_s22 + $0x50] sm:$0x3f] %v3063_v25  ;;  %v1636_v27 = vpop.f32.mrf.mxu2 }
  0xf7   : > { %v1649_v28 = vpop.f32.mrf.mxu3  ;;  %1954 = vst [vmem:[%s3554_s22 + $0x58] sm:$0x3f] %v3065_v26 }
 0x101   : > { %v1660_v46 = vpop.f32.mrf.mxu0  ;;  %v1673_v29 = vpop.f32.mrf.mxu1 }
 0x102   : > { %3066 = vtanh.f32 %v1660_v46 }
 0x103   : > { %3068 = vtanh.f32 %v1673_v29 }
 0x108   : > { %v3067_v31 = vpop.eup %3066 }
 0x109   : > { %v3069_v32 = vpop.eup %3068  ;;  %1955 = vst [vmem:[%s3554_s22 + $0x60] sm:$0x3f] %v3067_v31  ;;  %v1662_v33 = vpop.f32.mrf.mxu0 }
 0x10a   : > { %v1686_v30 = vpop.f32.mrf.mxu2  ;;  %v1699_v44 = vpop.f32.mrf.mxu3  ;;  %1956 = vst [vmem:[%s3554_s22 + $0x68] sm:$0x3f] %v3069_v32 }
 0x10b   : > { %3070 = vtanh.f32 %v1686_v30  ;;  %v1675_v34 = vpop.f32.mrf.mxu1 }
 0x10c   : > { %3072 = vtanh.f32 %v1699_v44 }
 0x111   : > { %v3071_v35 = vpop.eup %3070 }
 0x112   : > { %v3073_v36 = vpop.eup %3072  ;;  %1957 = vst [vmem:[%s3554_s22 + $0x70] sm:$0x3f] %v3071_v35  ;;  %v1688_v37 = vpop.f32.mrf.mxu2 }
 0x113   : > { %v1701_v38 = vpop.f32.mrf.mxu3  ;;  %1958 = vst [vmem:[%s3554_s22 + $0x78] sm:$0x3f] %v3073_v36 }
 0x11d   : > { %v1712_v39 = vpop.f32.mrf.mxu0  ;;  %v1725_v40 = vpop.f32.mrf.mxu1 }
 0x11e   : > { %3074 = vtanh.f32 %v1712_v39 }
 0x11f   : > { %3076 = vtanh.f32 %v1725_v40 }
 0x124   : > { %v3075_v43 = vpop.eup %3074 }
 0x125   : > { %v3077_v45 = vpop.eup %3076  ;;  %1959 = vst [vmem:[%s3554_s22 + $0x80] sm:$0x3f] %v3075_v43  ;;  %v1714_v47 = vpop.f32.mrf.mxu0 }
 0x126   : > { %v1738_v41 = vpop.f32.mrf.mxu2  ;;  %v1751_v42 = vpop.f32.mrf.mxu3  ;;  %1960 = vst [vmem:[%s3554_s22 + $0x88] sm:$0x3f] %v3077_v45 }
 0x127   : > { %3078 = vtanh.f32 %v1738_v41  ;;  %v1727_v48 = vpop.f32.mrf.mxu1 }
 0x128   : > { %3080 = vtanh.f32 %v1751_v42 }
 0x12d   : > { %v3079_v49 = vpop.eup %3078 }
 0x12e   : > { %v3081_v50 = vpop.eup %3080  ;;  %1961 = vst [vmem:[%s3554_s22 + $0x90] sm:$0x3f] %v3079_v49  ;;  %v1740_v51 = vpop.f32.mrf.mxu2 }
 0x12f   : > { %v1753_v52 = vpop.f32.mrf.mxu3  ;;  %1962 = vst [vmem:[%s3554_s22 + $0x98] sm:$0x3f] %v3081_v50 }
 0x139   : > { %v1764_v53 = vpop.f32.mrf.mxu0  ;;  %v1777_v54 = vpop.f32.mrf.mxu1 }
 0x13a   : > { %3082 = vtanh.f32 %v1764_v53 }
 0x13b   : > { %3084 = vtanh.f32 %v1777_v54 }
 0x140   : > { %v3083_v57 = vpop.eup %3082 }
 0x141   : > { %v3085_v58 = vpop.eup %3084  ;;  %1963 = vst [vmem:[%s3554_s22 + $0xa0] sm:$0x3f] %v3083_v57  ;;  %v1766_v59 = vpop.f32.mrf.mxu0 }
 0x142   : > { %v1790_v55 = vpop.f32.mrf.mxu2  ;;  %v1803_v56 = vpop.f32.mrf.mxu3  ;;  %1964 = vst [vmem:[%s3554_s22 + $0xa8] sm:$0x3f] %v3085_v58 }
 0x143   : > { %3086 = vtanh.f32 %v1790_v55  ;;  %v1779_v60 = vpop.f32.mrf.mxu1 }
 0x144   : > { %3088 = vtanh.f32 %v1803_v56 }
 0x149   : > { %v3087_v61 = vpop.eup %3086 }
 0x14a   : > { %v3089_v62 = vpop.eup %3088  ;;  %1965 = vst [vmem:[%s3554_s22 + $0xb0] sm:$0x3f] %v3087_v61  ;;  %v1792_v63 = vpop.f32.mrf.mxu2 }
 0x14b   : > { %v1805_v0 = vpop.f32.mrf.mxu3  ;;  %1966 = vst [vmem:[%s3554_s22 + $0xb8] sm:$0x3f] %v3089_v62 }
 0x155   : > { %v1816_v1 = vpop.f32.mrf.mxu0  ;;  %v1829_v2 = vpop.f32.mrf.mxu1 }
 0x156   : > { %3090 = vtanh.f32 %v1816_v1 }
 0x157   : > { %3092 = vtanh.f32 %v1829_v2 }
 0x15c   : > { %v3091_v5 = vpop.eup %3090 }
 0x15d   : > { %v3093_v6 = vpop.eup %3092  ;;  %1967 = vst [vmem:[%s3554_s22 + $0xc0] sm:$0x3f] %v3091_v5  ;;  %v1818_v7 = vpop.f32.mrf.mxu0 }
 0x15e   : > { %v1842_v3 = vpop.f32.mrf.mxu2  ;;  %v1855_v4 = vpop.f32.mrf.mxu3  ;;  %1968 = vst [vmem:[%s3554_s22 + $0xc8] sm:$0x3f] %v3093_v6 }
 0x15f   : > { %3094 = vtanh.f32 %v1842_v3  ;;  %v1831_v8 = vpop.f32.mrf.mxu1 }
 0x160   : > { %3096 = vtanh.f32 %v1855_v4 }
 0x165   : > { %v3095_v9 = vpop.eup %3094 }
 0x166   : > { %v3097_v10 = vpop.eup %3096  ;;  %1969 = vst [vmem:[%s3554_s22 + $0xd0] sm:$0x3f] %v3095_v9  ;;  %v1844_v11 = vpop.f32.mrf.mxu2 }
 0x167   : > { %v1857_v12 = vpop.f32.mrf.mxu3  ;;  %1970 = vst [vmem:[%s3554_s22 + $0xd8] sm:$0x3f] %v3097_v10 }
 0x171   : > { %v1868_v13 = vpop.f32.mrf.mxu0  ;;  %v1881_v14 = vpop.f32.mrf.mxu1 }
 0x172   : > { %3098 = vtanh.f32 %v1868_v13 }
 0x173   : > { %3100 = vtanh.f32 %v1881_v14 }
 0x178   : > { %v3099_v15 = vpop.eup %3098  ;;  %v1894_v16 = vpop.f32.mrf.mxu2 }
 0x179   : > { %v1907_v17 = vpop.f32.mrf.mxu3  ;;  %v3101_v18 = vpop.eup %3100  ;;  %1971 = vst [vmem:[%s3554_s22 + $0xe0] sm:$0x3f] %v3099_v15  ;;  %3102 = vtanh.f32 %v1894_v16 }
 0x17a   : > { %v1870_v19 = vpop.f32.mrf.mxu0  ;;  %v1883_v20 = vpop.f32.mrf.mxu1  ;;  %1972 = vst [vmem:[%s3554_s22 + $0xe8] sm:$0x3f] %v3101_v18  ;;  %3104 = vtanh.f32 %v1907_v17 }
 0x17f   : > { %v3103_v21 = vpop.eup %3102 }
 0x180   : > { %v3105_v22 = vpop.eup %3104  ;;  %1973 = vst [vmem:[%s3554_s22 + $0xf0] sm:$0x3f] %v3103_v21  ;;  %v1896_v23 = vpop.f32.mrf.mxu2 }
 0x181   : > { %v1909_v24 = vpop.f32.mrf.mxu3  ;;  %1974 = vst [vmem:[%s3554_s22 + $0xf8] sm:$0x3f] %v3105_v22 }
 0x182 PF: > { %s12_s9 = sadd.s32 1, %s3113_s9  }
 0x183   : > { %p9_p4 = scmp.ge.s32.totalorder %s12_s9, 4  }
 0x185   :  { %11 = sbr.rel (!%p9_p4) target bundleno = 1 (0x1), region = 58 }

</bundles_post_ra>
